<compile_context>
chip_gen: v7x
topology: tpu7x:2x2x1
jax: 0.10.0
libtpu: 0.0.40
codegen_flags: <defaults>
</compile_context>

<pallas_src>
import math
from functools import partial

import jax
import jax.numpy as jnp
from jax.experimental import pallas as pl
from jax.experimental.pallas import tpu as pltpu


_VMEM_LIMIT = 64 * 1024 * 1024   # <= physical VMEM on v5e/v6e (128 MiB) and v7x (64 MiB)


# ----------------------------------------------------------------------------
# tiling helpers
# ----------------------------------------------------------------------------

def _sublane_align(dtype):
    """Second-to-last block dim alignment: 8 for f32, 16 for bf16, 32 for int8/fp8."""
    return max(8, 32 // jnp.dtype(dtype).itemsize)


def _pick_tile(dim, target, align):
    """Largest tile <= target that divides `dim` and is a multiple of `align`.
    Falls back to the full dim (always legal for Mosaic's (8,128) rule)."""
    if dim <= target:
        return dim
    t = (target // align) * align
    while t >= align:
        if dim % t == 0:
            return t
        t -= align
    return dim


# ----------------------------------------------------------------------------
# fused (LayerNorm?) -> matmul -> bias? -> (GELU?) -> (+residual?) kernel
# ----------------------------------------------------------------------------

def _linear_kernel(x_ref, w_ref, *rest, fuse_ln, ln_once, has_res, has_bias,
                   activation, eps):
    rest = list(rest)
    b_ref = rest.pop(0) if has_bias else None
    if fuse_ln:
        g_ref = rest.pop(0)
        beta_ref = rest.pop(0)
    r_ref = rest.pop(0) if has_res else None
    o_ref = rest.pop(0)
    acc_ref = rest.pop(0)
    xn_ref = rest.pop(0) if (fuse_ln and ln_once) else None

    j = pl.program_id(1)
    k = pl.program_id(2)

    @pl.when(k == 0)
    def _():
        acc_ref[...] = jnp.zeros_like(acc_ref)

    def _layernorm():
        xf = x_ref[...].astype(jnp.float32)
        mu = jnp.mean(xf, axis=-1, keepdims=True)
        var = jnp.mean(jnp.square(xf - mu), axis=-1, keepdims=True)
        xn = (xf - mu) * jax.lax.rsqrt(var + eps)
        return (xn * g_ref[...].astype(jnp.float32)
                + beta_ref[...].astype(jnp.float32)).astype(x_ref.dtype)

    if fuse_ln and ln_once:
        # LN computed once per row tile (j == 0), reused for every column tile.
        @pl.when(j == 0)
        def _():
            xn_ref[...] = _layernorm()
        x = xn_ref[...]
    elif fuse_ln:
        x = _layernorm()
    else:
        x = x_ref[...]                                   # native dtype -> MXU

    acc_ref[...] += jnp.dot(x, w_ref[...], preferred_element_type=jnp.float32)

    @pl.when(k == pl.num_programs(2) - 1)
    def _():
        y = acc_ref[...]
        if has_bias:
            y = y + b_ref[...].astype(jnp.float32)
        if activation == "gelu":                         # exact (erf) GELU = torch.nn.GELU()
            y = 0.5 * y * (1.0 + jax.lax.erf(y * (1.0 / math.sqrt(2.0))))
        if has_res:
            y = y + r_ref[...].astype(jnp.float32)
        o_ref[...] = y.astype(o_ref.dtype)


def linear(x, w_t, b=None, *, ln=None, ln_once=True, residual=None,
           activation="none", tm=256, tn=512, tk=1024):
    """y = act(LN?(x) @ w_t [+ b]) (+ residual).  x: (M,K); w_t: (K,N) pre-transposed."""
    M, K = x.shape
    Kw, N = w_t.shape
    assert K == Kw
    fuse_ln = ln is not None
    has_res = residual is not None
    has_bias = b is not None
    ln_once = fuse_ln and ln_once

    btm = _pick_tile(M, tm, _sublane_align(x.dtype))
    btn = _pick_tile(N, tn, 128)
    btk = K if fuse_ln else _pick_tile(K, tk, 128)       # LN needs full feature rows
    nj = N // btn

    in_specs = [pl.BlockSpec((btm, btk), lambda i, j, k: (i, k)),
                pl.BlockSpec((btk, btn), lambda i, j, k: (k, j))]
    args = [x, w_t]
    if has_bias:
        in_specs.append(pl.BlockSpec((1, btn), lambda i, j, k: (0, j)))
        args.append(b.reshape(1, N))
    if fuse_ln:
        g, beta = ln
        in_specs += [pl.BlockSpec((1, K), lambda i, j, k: (0, 0)),
                     pl.BlockSpec((1, K), lambda i, j, k: (0, 0))]
        args += [g.reshape(1, K), beta.reshape(1, K)]
    if has_res:
        in_specs.append(pl.BlockSpec((btm, btn), lambda i, j, k: (i, j)))
        args.append(residual)

    scratch = [pltpu.VMEM((btm, btn), jnp.float32)]      # f32 accumulator
    if ln_once:
        scratch.append(pltpu.VMEM((btm, K), x.dtype))    # LN(x) reused across j tiles

    # LN-reuse requires the j axis to run sequentially per row tile -> "arbitrary".
    # lm_head (ln_once=False) keeps j "parallel" so v7x megacore still has work.
    dims = ("parallel", "arbitrary" if ln_once else "parallel", "arbitrary")

    itemsize = x.dtype.itemsize
    x_rereads = 1 if fuse_ln else nj                     # x refetched per j when k varies
    cost = pl.CostEstimate(
        flops=int(2 * M * N * K),
        transcendentals=int(M * N if activation == "gelu" else 0),
        bytes_accessed=int((M * K * x_rereads + K * N + M * N * (1 + has_res)) * itemsize))

    return pl.pallas_call(
        partial(_linear_kernel, fuse_ln=fuse_ln, ln_once=ln_once, has_res=has_res,
                has_bias=has_bias, activation=activation, eps=1e-5),
        out_shape=jax.ShapeDtypeStruct((M, N), x.dtype),
        grid=(M // btm, nj, K // btk),
        in_specs=in_specs,
        out_specs=pl.BlockSpec((btm, btn), lambda i, j, k: (i, j)),
        scratch_shapes=scratch,
        compiler_params=pltpu.CompilerParams(
            dimension_semantics=dims, vmem_limit_bytes=_VMEM_LIMIT),
        cost_estimate=cost,
    )(*args)


# ----------------------------------------------------------------------------
# fused MLP block: x + c_proj(GELU(c_fc(LN2(x))))  -- hidden never touches HBM
# ----------------------------------------------------------------------------

def _mlp_kernel(x_ref, fcw_ref, fcb_ref, pw_ref, pb_ref, g_ref, beta_ref,
                o_ref, acc_ref, xn_ref, *, eps):
    h = pl.program_id(1)

    @pl.when(h == 0)
    def _():
        xf = x_ref[...].astype(jnp.float32)
        mu = jnp.mean(xf, axis=-1, keepdims=True)
        var = jnp.mean(jnp.square(xf - mu), axis=-1, keepdims=True)
        xn = (xf - mu) * jax.lax.rsqrt(var + eps)
        xn_ref[...] = (xn * g_ref[...].astype(jnp.float32)
                       + beta_ref[...].astype(jnp.float32)).astype(xn_ref.dtype)
        acc_ref[...] = jnp.zeros_like(acc_ref)

    hid = jnp.dot(xn_ref[...], fcw_ref[...], preferred_element_type=jnp.float32)
    hid = hid + fcb_ref[...].astype(jnp.float32)
    hid = 0.5 * hid * (1.0 + jax.lax.erf(hid * (1.0 / math.sqrt(2.0))))   # exact GELU
    acc_ref[...] += jnp.dot(hid.astype(pw_ref.dtype), pw_ref[...],
                            preferred_element_type=jnp.float32)

    @pl.when(h == pl.num_programs(1) - 1)
    def _():
        y = acc_ref[...] + pb_ref[...].astype(jnp.float32) + x_ref[...].astype(jnp.float32)
        o_ref[...] = y.astype(o_ref.dtype)


def mlp_block(x, fc_w_t, fc_b, proj_w_t, proj_b, ln_w, ln_b, *, tm=256, th=512):
    """out = x + GELU(LN(x) @ fc_w_t + fc_b) @ proj_w_t + proj_b, tiled over the 4C axis."""
    M, C = x.shape
    Cf, H4 = fc_w_t.shape
    assert Cf == C and proj_w_t.shape == (H4, C)

    btm = _pick_tile(M, tm, _sublane_align(x.dtype))
    bth = _pick_tile(H4, th, 128)
    nh = H4 // bth

    itemsize = x.dtype.itemsize
    cost = pl.CostEstimate(
        flops=int(4 * M * H4 * C),
        transcendentals=int(M * H4),
        bytes_accessed=int((M * C * 2 + C * H4 + H4 * C) * itemsize))

    return pl.pallas_call(
        partial(_mlp_kernel, eps=1e-5),
        out_shape=jax.ShapeDtypeStruct((M, C), x.dtype),
        grid=(M // btm, nh),
        in_specs=[pl.BlockSpec((btm, C), lambda i, h: (i, 0)),   # x: LN input + residual
                  pl.BlockSpec((C, bth), lambda i, h: (0, h)),   # fc_w_t column tile
                  pl.BlockSpec((1, bth), lambda i, h: (0, h)),   # fc_b
                  pl.BlockSpec((bth, C), lambda i, h: (h, 0)),   # proj_w_t row tile
                  pl.BlockSpec((1, C), lambda i, h: (0, 0)),     # proj_b
                  pl.BlockSpec((1, C), lambda i, h: (0, 0)),     # ln2 weight
                  pl.BlockSpec((1, C), lambda i, h: (0, 0))],    # ln2 bias
        out_specs=pl.BlockSpec((btm, C), lambda i, h: (i, 0)),
        scratch_shapes=[pltpu.VMEM((btm, C), jnp.float32),       # c_proj accumulator
                        pltpu.VMEM((btm, C), x.dtype)],          # LN(x), computed once
        compiler_params=pltpu.CompilerParams(
            dimension_semantics=("parallel", "arbitrary"),
            vmem_limit_bytes=_VMEM_LIMIT),
        cost_estimate=cost,
    )(x, fc_w_t, fc_b.reshape(1, H4), proj_w_t, proj_b.reshape(1, C),
      ln_w.reshape(1, C), ln_b.reshape(1, C))


# ----------------------------------------------------------------------------
# banded (sliding-window) flash attention over fused QKV
# (1/sqrt(head_dim) is already folded into the Q projection weights/bias)
# ----------------------------------------------------------------------------

def _attention_kernel(q_ref, k_ref, v_ref, o_ref, m_ref, l_ref, acc_ref, *,
                      n_head, head_dim, tile, window, nb):
    qi = pl.program_id(1)
    ki = pl.program_id(2)

    @pl.when(ki == 0)
    def _():
        m_ref[...] = jnp.full_like(m_ref, -1e30)
        l_ref[...] = jnp.zeros_like(l_ref)
        acc_ref[...] = jnp.zeros_like(acc_ref)

    raw = qi - (nb - 1) + ki            # true kv block index; < 0 means outside the band

    @pl.when(raw >= 0)
    def _():
        # sliding-window causal mask from iota (no (T,T) mask array in HBM)
        rows = qi * tile + jax.lax.broadcasted_iota(jnp.int32, (tile, tile), 0)
        cols = raw * tile + jax.lax.broadcasted_iota(jnp.int32, (tile, tile), 1)
        allow = (cols <= rows) & (cols > rows - window)
        allow_f = allow.astype(jnp.float32)
        neg = jnp.float32(-1e30)

        # TODO(synk): for n_head >= 16 or head_dim < 128 switch this unrolled loop to a
        # lax.fori_loop with pl.ds(h*head_dim, head_dim) + lane-aligned head groups.
        for h in range(n_head):         # heads packed contiguously along the C axis
            sl = slice(h * head_dim, (h + 1) * head_dim)
            qh = q_ref[0, :, sl]        # (tile, head_dim)
            kh = k_ref[0, :, sl]
            vh = v_ref[0, :, sl]
            s = jax.lax.dot_general(qh, kh, (((1,), (1,)), ((), ())),
                                    preferred_element_type=jnp.float32)
            s = jnp.where(allow, s, neg)
            m_prev = m_ref[h]                                    # (tile, 1)
            m_new = jnp.maximum(m_prev, jnp.max(s, axis=-1, keepdims=True))
            alpha = jnp.exp(m_prev - m_new)
            p = jnp.exp(s - m_new) * allow_f                     # masked entries -> 0
            l_ref[h] = alpha * l_ref[h] + jnp.sum(p, axis=-1, keepdims=True)
            acc_ref[h] = alpha * acc_ref[h] + jnp.dot(
                p.astype(vh.dtype), vh, preferred_element_type=jnp.float32)
            m_ref[h] = m_new

    @pl.when(ki == nb - 1)
    def _():
        for h in range(n_head):
            inv_l = 1.0 / l_ref[h]                               # exact; epilogue-only cost
            o_ref[0, :, h * head_dim:(h + 1) * head_dim] = (
                acc_ref[h] * inv_l).astype(o_ref.dtype)


def attention(qkv, n_head, window, *, q_tile=256):
    """qkv: (B, T, 3C) = [q | k | v] along the last axis (head h = cols h*hs:(h+1)*hs
    within each C slab).  Returns y: (B, T, C), heads contiguous along C."""
    B, T, C3 = qkv.shape
    C = C3 // 3
    hs = C // n_head
    assert C % 128 == 0, "n_embd must be a multiple of 128 for fused-QKV column blocking"

    tt = _pick_tile(T, q_tile, _sublane_align(qkv.dtype))
    nq = T // tt
    nb = max(min(math.ceil((window - 1) / tt) + 1, nq), 1)       # band width in kv blocks

    # Out-of-band blocks clamp to kv block 0; consecutive identical block indices are not
    # re-fetched by the Pallas pipeline, and the pl.when(raw >= 0) skips their compute.
    def kv_row(qi, ki):
        return jnp.maximum(qi - (nb - 1) + ki, 0)

    itemsize = qkv.dtype.itemsize
    cost = pl.CostEstimate(
        flops=int(4 * B * nq * nb * n_head * tt * tt * hs),
        transcendentals=int(B * nq * nb * n_head * tt * tt),
        # K/V re-read once per q-block across the band; Q and O read/written once.
        bytes_accessed=int(B * nq * (2 * tt * C + nb * 2 * tt * C) * itemsize))

    return pl.pallas_call(
        partial(_attention_kernel, n_head=n_head, head_dim=hs, tile=tt,
                window=window, nb=nb),
        out_shape=jax.ShapeDtypeStruct((B, T, C), qkv.dtype),
        grid=(B, nq, nb),
        in_specs=[pl.BlockSpec((1, tt, C), lambda b, qi, ki: (b, qi, 0)),
                  pl.BlockSpec((1, tt, C), lambda b, qi, ki: (b, kv_row(qi, ki), 1)),
                  pl.BlockSpec((1, tt, C), lambda b, qi, ki: (b, kv_row(qi, ki), 2))],
        out_specs=pl.BlockSpec((1, tt, C), lambda b, qi, ki: (b, qi, 0)),
        scratch_shapes=[pltpu.VMEM((n_head, tt, 1), jnp.float32),    # m
                        pltpu.VMEM((n_head, tt, 1), jnp.float32),    # l
                        pltpu.VMEM((n_head, tt, hs), jnp.float32)],  # acc
        compiler_params=pltpu.CompilerParams(
            dimension_semantics=("parallel", "parallel", "arbitrary"),
            vmem_limit_bytes=_VMEM_LIMIT),
        cost_estimate=cost,
    )(qkv, qkv, qkv)


# ----------------------------------------------------------------------------
# parameters
# ----------------------------------------------------------------------------

def init_params(key, cfg):
    """PyTorch-shaped parameters, matching GPT._init_weights."""
    C, L, V, BS = cfg["n_embd"], cfg["n_layer"], cfg["vocab_size"], cfg["block_size"]
    std, std_proj = 0.02, 0.02 / math.sqrt(2 * L)
    keys = jax.random.split(key, 2 + 4 * L)
    params = {
        "wte": std * jax.random.normal(keys[0], (V, C), jnp.float32),  # tied lm_head
        "wpe": std * jax.random.normal(keys[1], (BS, C), jnp.float32),
        "lnf_w": jnp.ones((C,), jnp.float32), "lnf_b": jnp.zeros((C,), jnp.float32),
        "blocks": [],
    }
    for l in range(L):
        k1, k2, k3, k4 = keys[2 + 4 * l: 6 + 4 * l]
        params["blocks"].append(dict(
            ln1_w=jnp.ones((C,), jnp.float32), ln1_b=jnp.zeros((C,), jnp.float32),
            attn_w=std * jax.random.normal(k1, (3 * C, C), jnp.float32),
            attn_b=jnp.zeros((3 * C,), jnp.float32),
            attn_proj_w=std_proj * jax.random.normal(k2, (C, C), jnp.float32),
            attn_proj_b=jnp.zeros((C,), jnp.float32),
            ln2_w=jnp.ones((C,), jnp.float32), ln2_b=jnp.zeros((C,), jnp.float32),
            fc_w=std * jax.random.normal(k3, (4 * C, C), jnp.float32),
            fc_b=jnp.zeros((4 * C,), jnp.float32),
            mlp_proj_w=std_proj * jax.random.normal(k4, (C, 4 * C), jnp.float32),
            mlp_proj_b=jnp.zeros((C,), jnp.float32),
        ))
    return params


def prepare_params(params, cfg, dtype=jnp.float32):
    """One-time (outside jit) weight prep: transpose every matmul weight to (in, out),
    fold the 1/sqrt(head_dim) attention scale into the Q projection, and cast to the
    compute dtype (use jnp.bfloat16 for 2x MXU throughput on v6e/v7x)."""
    C = cfg["n_embd"]
    hs = C // cfg["n_head"]
    q_scale = 1.0 / math.sqrt(hs)
    scale_vec = jnp.concatenate([jnp.full((C,), q_scale, jnp.float32),
                                 jnp.ones((2 * C,), jnp.float32)])
    cast = lambda a: a.astype(dtype)
    prep = {
        "wte": cast(params["wte"]),            # (V, C) for the embedding gather
        "lm_head_w": cast(params["wte"].T),    # (C, V) tied lm_head, pre-transposed
        "wpe": cast(params["wpe"]),
        "lnf_w": cast(params["lnf_w"]), "lnf_b": cast(params["lnf_b"]),
        "blocks": [],
    }
    for blk in params["blocks"]:
        prep["blocks"].append(dict(
            ln1_w=cast(blk["ln1_w"]), ln1_b=cast(blk["ln1_b"]),
            attn_w_t=cast(blk["attn_w"].T * scale_vec[None, :]),   # scale folded into Q
            attn_b=cast(blk["attn_b"] * scale_vec),
            attn_proj_w_t=cast(blk["attn_proj_w"].T), attn_proj_b=cast(blk["attn_proj_b"]),
            ln2_w=cast(blk["ln2_w"]), ln2_b=cast(blk["ln2_b"]),
            fc_w_t=cast(blk["fc_w"].T), fc_b=cast(blk["fc_b"]),
            mlp_proj_w_t=cast(blk["mlp_proj_w"].T), mlp_proj_b=cast(blk["mlp_proj_b"]),
        ))
    return prep


# ----------------------------------------------------------------------------
# forward
# ----------------------------------------------------------------------------

def gpt_forward(prep, idx, cfg):
    """Inference path of GPT.forward (targets=None): returns logits (B, 1, vocab)."""
    B, T = idx.shape
    C, H = cfg["n_embd"], cfg["n_head"]
    W = cfg["sliding_window_size"]
    assert T <= cfg["block_size"]
    q_tile = cfg.get("attn_q_tile", 256)

    # token + position embedding (gather: plain-JAX glue); dropout p=0 -> identity
    x = prep["wte"][idx] + prep["wpe"][:T][None, :, :]             # (B, T, C)
    x2 = x.reshape(B * T, C)

    for blk in prep["blocks"]:
        # attention branch: LN1 fused into the QKV matmul (computed once per row tile),
        # the fused QKV slab feeds the banded flash kernel directly, and the residual
        # add is fused into the output projection.  scale_attn = 1.0 (LayerScale=False).
        qkv = linear(x2, blk["attn_w_t"], blk["attn_b"],
                     ln=(blk["ln1_w"], blk["ln1_b"]))              # (B*T, 3C)
        y = attention(qkv.reshape(B, T, 3 * C), H, W, q_tile=q_tile)   # (B, T, C)
        x2 = linear(y.reshape(B * T, C), blk["attn_proj_w_t"], blk["attn_proj_b"],
                    residual=x2)

        # MLP branch: LN2 -> c_fc -> GELU -> c_proj -> +residual fused in one kernel;
        # the (B*T, 4C) hidden never leaves VMEM.
        x2 = mlp_block(x2, blk["fc_w_t"], blk["fc_b"],
                       blk["mlp_proj_w_t"], blk["mlp_proj_b"],
                       blk["ln2_w"], blk["ln2_b"])

    # targets=None path: only the last position feeds lm_head, so slice BEFORE ln_f
    # and fuse ln_f into the (weight-tied, bias-free) lm_head matmul.
    x_last = x2.reshape(B, T, C)[:, -1, :]                          # (B, C)
    logits = linear(x_last, prep["lm_head_w"], None,
                    ln=(prep["lnf_w"], prep["lnf_b"]), ln_once=False)
    return logits.reshape(B, 1, cfg["vocab_size"])
    # TODO(synk): training path (cross_entropy over targets) not implemented; this
    # reproduces the inference (targets=None) branch only.


# ----------------------------------------------------------------------------
# plain-JAX reference (mirrors the PyTorch module) for a correctness check
# ----------------------------------------------------------------------------

def _ref_forward(params, idx, cfg):
    B, T = idx.shape
    C, H = cfg["n_embd"], cfg["n_head"]
    hs = C // H
    W = cfg["sliding_window_size"]
    i = jnp.arange(T)[:, None]
    j = jnp.arange(T)[None, :]
    mask = (j <= i) & (j > i - W)

    def ln(x, w, b):
        mu = jnp.mean(x, axis=-1, keepdims=True)
        var = jnp.mean(jnp.square(x - mu), axis=-1, keepdims=True)
        return (x - mu) * jax.lax.rsqrt(var + 1e-5) * w + b

    x = params["wte"][idx] + params["wpe"][:T][None]
    for blk in params["blocks"]:
        h = ln(x, blk["ln1_w"], blk["ln1_b"])
        qkv = h @ blk["attn_w"].T + blk["attn_b"]
        q, k, v = jnp.split(qkv, 3, axis=-1)
        q = q.reshape(B, T, H, hs).transpose(0, 2, 1, 3)
        k = k.reshape(B, T, H, hs).transpose(0, 2, 1, 3)
        v = v.reshape(B, T, H, hs).transpose(0, 2, 1, 3)
        att = (q @ k.transpose(0, 1, 3, 2)) / math.sqrt(hs)
        att = jnp.where(mask[None, None], att, -jnp.inf)
        att = jax.nn.softmax(att, axis=-1)
        y = (att @ v).transpose(0, 2, 1, 3).reshape(B, T, C)
        x = x + y @ blk["attn_proj_w"].T + blk["attn_proj_b"]
        h2 = ln(x, blk["ln2_w"], blk["ln2_b"])
        m = h2 @ blk["fc_w"].T + blk["fc_b"]
        m = 0.5 * m * (1.0 + jax.lax.erf(m / math.sqrt(2.0)))
        x = x + m @ blk["mlp_proj_w"].T + blk["mlp_proj_b"]
    xf = ln(x, params["lnf_w"], params["lnf_b"])
    return xf[:, -1:, :] @ params["wte"].T


# ---------------------------------- main -----------------------------------

if __name__ == "__main__":
    cfg = dict(
        block_size=16,
        vocab_size=256,
        n_layer=2,
        n_head=2,
        n_embd=256,              # multiple of 128 -> lane-dense tiles, hs=128 aligned
        sliding_window_size=4,   # exercises the banded sliding-window path
        attn_q_tile=8,           # tiny q tile so the demo exercises multi-block banding
    )
    B, T = 2, 16

    key = jax.random.PRNGKey(0)
    k_params, k_idx = jax.random.split(key)
    params = init_params(k_params, cfg)
    prep = prepare_params(params, cfg, dtype=jnp.float32)  # use jnp.bfloat16 for perf runs
    idx = jax.random.randint(k_idx, (B, T), 0, cfg["vocab_size"], dtype=jnp.int32)

    fwd = jax.jit(partial(gpt_forward, cfg=cfg))
    logits = fwd(prep, idx)
    jax.block_until_ready(logits)
    assert logits.shape == (B, 1, cfg["vocab_size"])
    assert bool(jnp.all(jnp.isfinite(logits)))

    # correctness vs. plain-JAX reference of the PyTorch forward (targets=None path)
    ref = _ref_forward(params, idx, cfg)
    err = float(jnp.max(jnp.abs(logits - ref)))
    assert err < 2e-2, f"max abs err vs reference: {err}"
    print("KERNEL_OK")
</pallas_src>

<mosaic_0001>
module attributes {stable_mosaic.version = 11 : i64} {
  func.func @_linear_kernel(%arg0: i32, %arg1: i32, %arg2: i32, %arg3: memref<32x256xf32, #tpu.memory_space<vmem>>, %arg4: memref<256x256xf32, #tpu.memory_space<vmem>>, %arg5: memref<1x256xf32, #tpu.memory_space<vmem>>, %arg6: memref<32x256xf32, #tpu.memory_space<vmem>>, %arg7: memref<32x256xf32, #tpu.memory_space<vmem>>, %arg8: memref<32x256xf32, #tpu.memory_space<vmem>>) attributes {dimension_semantics = [#tpu.dimension_semantics<parallel>, #tpu.dimension_semantics<parallel>, #tpu.dimension_semantics<arbitrary>], iteration_bounds = array<i64: 1, 1, 1>, scalar_prefetch = 0 : i64, scratch_operands = 1 : i64, tpu.core_type = #tpu.core_type<tc>, window_params = [{transform_indices = @transform_0, window_bounds = array<i64: 32, 256>}, {transform_indices = @transform_1, window_bounds = array<i64: 256, 256>}, {transform_indices = @transform_2, window_bounds = array<i64: 1, 256>}, {transform_indices = @transform_3, window_bounds = array<i64: 32, 256>}, {transform_indices = @transform_4, window_bounds = array<i64: 32, 256>}]} {
    %c0_i32 = arith.constant 0 : i32
    %0 = arith.cmpi eq, %arg2, %c0_i32 : i32
    %1 = arith.extui %0 : i1 to i32
    %c0_i32_0 = arith.constant 0 : i32
    %2 = arith.cmpi ne, %1, %c0_i32_0 : i32
    scf.if %2 {
      %cst_10 = arith.constant 0.000000e+00 : f32
      %12 = vector.broadcast %cst_10 : f32 to vector<32x256xf32>
      %c0_11 = arith.constant 0 : index
      %c0_12 = arith.constant 0 : index
      %13 = vector.load %arg8[%c0_11, %c0_12] : memref<32x256xf32, #tpu.memory_space<vmem>>, vector<32x256xf32>
      tpu.vector_store %arg8[%c0_11, %c0_12], %12 {strides = array<i32>} : memref<32x256xf32, #tpu.memory_space<vmem>>, vector<32x256xf32>,
    } else {
    }
    %c0 = arith.constant 0 : index
    %c0_1 = arith.constant 0 : index
    %3 = vector.load %arg3[%c0, %c0_1] : memref<32x256xf32, #tpu.memory_space<vmem>>, vector<32x256xf32>
    %c0_2 = arith.constant 0 : index
    %c0_3 = arith.constant 0 : index
    %4 = vector.load %arg8[%c0_2, %c0_3] : memref<32x256xf32, #tpu.memory_space<vmem>>, vector<32x256xf32>
    %c0_4 = arith.constant 0 : index
    %c0_5 = arith.constant 0 : index
    %5 = vector.load %arg4[%c0_4, %c0_5] : memref<256x256xf32, #tpu.memory_space<vmem>>, vector<256x256xf32>
    %cst = arith.constant dense<0.000000e+00> : vector<32x256xf32>
    %6 = tpu.matmul %3, %5, %cst {dimension_numbers = #tpu.dot_dimension_numbers<[1], [0], [0], [1], [0, 0, 1, 1], [], []>} : vector<32x256xf32>, vector<256x256xf32>, vector<32x256xf32> -> vector<32x256xf32>
    %7 = arith.addf %4, %6 : vector<32x256xf32>
    %c0_6 = arith.constant 0 : index
    %c0_7 = arith.constant 0 : index
    %8 = vector.load %arg8[%c0_6, %c0_7] : memref<32x256xf32, #tpu.memory_space<vmem>>, vector<32x256xf32>
    tpu.vector_store %arg8[%c0_6, %c0_7], %7 {strides = array<i32>} : memref<32x256xf32, #tpu.memory_space<vmem>>, vector<32x256xf32>,
    %c0_i32_8 = arith.constant 0 : i32
    %9 = arith.cmpi eq, %arg2, %c0_i32_8 : i32
    %10 = arith.extui %9 : i1 to i32
    %c0_i32_9 = arith.constant 0 : i32
    %11 = arith.cmpi ne, %10, %c0_i32_9 : i32
    scf.if %11 {
      %c0_10 = arith.constant 0 : index
      %c0_11 = arith.constant 0 : index
      %12 = vector.load %arg8[%c0_10, %c0_11] : memref<32x256xf32, #tpu.memory_space<vmem>>, vector<32x256xf32>
      %c0_12 = arith.constant 0 : index
      %c0_13 = arith.constant 0 : index
      %13 = vector.load %arg5[%c0_12, %c0_13] : memref<1x256xf32, #tpu.memory_space<vmem>>, vector<1x256xf32>
      %14 = vector.broadcast %13 : vector<1x256xf32> to vector<32x256xf32>
      %15 = arith.addf %12, %14 : vector<32x256xf32>
      %c0_14 = arith.constant 0 : index
      %c0_15 = arith.constant 0 : index
      %16 = vector.load %arg6[%c0_14, %c0_15] : memref<32x256xf32, #tpu.memory_space<vmem>>, vector<32x256xf32>
      %17 = arith.addf %15, %16 : vector<32x256xf32>
      %c0_16 = arith.constant 0 : index
      %c0_17 = arith.constant 0 : index
      %18 = vector.load %arg7[%c0_16, %c0_17] : memref<32x256xf32, #tpu.memory_space<vmem>>, vector<32x256xf32>
      tpu.vector_store %arg7[%c0_16, %c0_17], %17 {strides = array<i32>} : memref<32x256xf32, #tpu.memory_space<vmem>>, vector<32x256xf32>,
    } else {
    }
    return
  }
  func.func @transform_0(%arg0: i32, %arg1: i32, %arg2: i32) -> (i32, i32) {
    %c0_i32 = arith.constant 0 : i32
    return %arg0, %arg2 : i32, i32
  }
  func.func @transform_1(%arg0: i32, %arg1: i32, %arg2: i32) -> (i32, i32) {
    %c0_i32 = arith.constant 0 : i32
    return %arg2, %arg1 : i32, i32
  }
  func.func @transform_2(%arg0: i32, %arg1: i32, %arg2: i32) -> (i32, i32) {
    %c0_i32 = arith.constant 0 : i32
    %c0_i32_0 = arith.constant 0 : i32
    return %c0_i32, %arg1 : i32, i32
  }
  func.func @transform_3(%arg0: i32, %arg1: i32, %arg2: i32) -> (i32, i32) {
    %c0_i32 = arith.constant 0 : i32
    return %arg0, %arg1 : i32, i32
  }
  func.func @transform_4(%arg0: i32, %arg1: i32, %arg2: i32) -> (i32, i32) {
    %c0_i32 = arith.constant 0 : i32
    return %arg0, %arg1 : i32, i32
  }
}

module attributes {stable_mosaic.version = 11 : i64} {
  func.func @_mlp_kernel(%arg0: i32, %arg1: i32, %arg2: memref<32x256xf32, #tpu.memory_space<vmem>>, %arg3: memref<256x512xf32, #tpu.memory_space<vmem>>, %arg4: memref<1x512xf32, #tpu.memory_space<vmem>>, %arg5: memref<512x256xf32, #tpu.memory_space<vmem>>, %arg6: memref<1x256xf32, #tpu.memory_space<vmem>>, %arg7: memref<1x256xf32, #tpu.memory_space<vmem>>, %arg8: memref<1x256xf32, #tpu.memory_space<vmem>>, %arg9: memref<32x256xf32, #tpu.memory_space<vmem>>, %arg10: memref<32x256xf32, #tpu.memory_space<vmem>>, %arg11: memref<32x256xf32, #tpu.memory_space<vmem>>) attributes {dimension_semantics = [#tpu.dimension_semantics<parallel>, #tpu.dimension_semantics<arbitrary>], iteration_bounds = array<i64: 1, 2>, scalar_prefetch = 0 : i64, scratch_operands = 2 : i64, tpu.core_type = #tpu.core_type<tc>, window_params = [{transform_indices = @transform_0, window_bounds = array<i64: 32, 256>}, {transform_indices = @transform_1, window_bounds = array<i64: 256, 512>}, {transform_indices = @transform_2, window_bounds = array<i64: 1, 512>}, {transform_indices = @transform_3, window_bounds = array<i64: 512, 256>}, {pipeline_mode = #tpu.pipeline_mode<synchronous>, transform_indices = @transform_4, window_bounds = array<i64: 1, 256>}, {pipeline_mode = #tpu.pipeline_mode<synchronous>, transform_indices = @transform_5, window_bounds = array<i64: 1, 256>}, {pipeline_mode = #tpu.pipeline_mode<synchronous>, transform_indices = @transform_6, window_bounds = array<i64: 1, 256>}, {transform_indices = @transform_7, window_bounds = array<i64: 32, 256>}]} {
    %c0_i32 = arith.constant 0 : i32
    %0 = arith.cmpi eq, %arg1, %c0_i32 : i32
    %1 = arith.extui %0 : i1 to i32
    %c0_i32_0 = arith.constant 0 : i32
    %2 = arith.cmpi ne, %1, %c0_i32_0 : i32
    scf.if %2 {
      %c0_17 = arith.constant 0 : index
      %c0_18 = arith.constant 0 : index
      %25 = vector.load %arg2[%c0_17, %c0_18] : memref<32x256xf32, #tpu.memory_space<vmem>>, vector<32x256xf32>
      %cst_19 = arith.constant dense<0.000000e+00> : vector<32xf32>
      %26 = vector.multi_reduction <add>, %25, %cst_19 [1] : vector<32x256xf32> to vector<32xf32>
      %27 = vector.shape_cast %26 : vector<32xf32> to vector<32x1xf32>
      %cst_20 = arith.constant 2.560000e+02 : f32
      %28 = vector.broadcast %cst_20 : f32 to vector<32x1xf32>
      %29 = arith.divf %27, %28 : vector<32x1xf32>
      %30 = vector.broadcast %29 : vector<32x1xf32> to vector<32x256xf32>
      %31 = arith.subf %25, %30 : vector<32x256xf32>
      %32 = arith.mulf %31, %31 : vector<32x256xf32>
      %cst_21 = arith.constant dense<0.000000e+00> : vector<32xf32>
      %33 = vector.multi_reduction <add>, %32, %cst_21 [1] : vector<32x256xf32> to vector<32xf32>
      %34 = vector.shape_cast %33 : vector<32xf32> to vector<32x1xf32>
      %cst_22 = arith.constant 2.560000e+02 : f32
      %35 = vector.broadcast %cst_22 : f32 to vector<32x1xf32>
      %36 = arith.divf %34, %35 : vector<32x1xf32>
      %37 = vector.broadcast %29 : vector<32x1xf32> to vector<32x256xf32>
      %38 = arith.subf %25, %37 : vector<32x256xf32>
      %cst_23 = arith.constant 9.99999974E-6 : f32
      %39 = vector.broadcast %cst_23 : f32 to vector<32x1xf32>
      %40 = arith.addf %36, %39 : vector<32x1xf32>
      %41 = math.rsqrt %40 : vector<32x1xf32>
      %42 = vector.broadcast %41 : vector<32x1xf32> to vector<32x256xf32>
      %43 = arith.mulf %38, %42 : vector<32x256xf32>
      %c0_24 = arith.constant 0 : index
      %c0_25 = arith.constant 0 : index
      %44 = vector.load %arg7[%c0_24, %c0_25] : memref<1x256xf32, #tpu.memory_space<vmem>>, vector<1x256xf32>
      %45 = vector.broadcast %44 : vector<1x256xf32> to vector<32x256xf32>
      %46 = arith.mulf %43, %45 : vector<32x256xf32>
      %c0_26 = arith.constant 0 : index
      %c0_27 = arith.constant 0 : index
      %47 = vector.load %arg8[%c0_26, %c0_27] : memref<1x256xf32, #tpu.memory_space<vmem>>, vector<1x256xf32>
      %48 = vector.broadcast %47 : vector<1x256xf32> to vector<32x256xf32>
      %49 = arith.addf %46, %48 : vector<32x256xf32>
      %c0_28 = arith.constant 0 : index
      %c0_29 = arith.constant 0 : index
      %50 = vector.load %arg11[%c0_28, %c0_29] : memref<32x256xf32, #tpu.memory_space<vmem>>, vector<32x256xf32>
      tpu.vector_store %arg11[%c0_28, %c0_29], %49 {strides = array<i32>} : memref<32x256xf32, #tpu.memory_space<vmem>>, vector<32x256xf32>,
      %cst_30 = arith.constant 0.000000e+00 : f32
      %51 = vector.broadcast %cst_30 : f32 to vector<32x256xf32>
      %c0_31 = arith.constant 0 : index
      %c0_32 = arith.constant 0 : index
      %52 = vector.load %arg10[%c0_31, %c0_32] : memref<32x256xf32, #tpu.memory_space<vmem>>, vector<32x256xf32>
      tpu.vector_store %arg10[%c0_31, %c0_32], %51 {strides = array<i32>} : memref<32x256xf32, #tpu.memory_space<vmem>>, vector<32x256xf32>,
    } else {
    }
    %c0 = arith.constant 0 : index
    %c0_1 = arith.constant 0 : index
    %3 = vector.load %arg11[%c0, %c0_1] : memref<32x256xf32, #tpu.memory_space<vmem>>, vector<32x256xf32>
    %c0_2 = arith.constant 0 : index
    %c0_3 = arith.constant 0 : index
    %4 = vector.load %arg3[%c0_2, %c0_3] : memref<256x512xf32, #tpu.memory_space<vmem>>, vector<256x512xf32>
    %cst = arith.constant dense<0.000000e+00> : vector<32x512xf32>
    %5 = tpu.matmul %3, %4, %cst {dimension_numbers = #tpu.dot_dimension_numbers<[1], [0], [0], [1], [0, 0, 1, 1], [], []>} : vector<32x256xf32>, vector<256x512xf32>, vector<32x512xf32> -> vector<32x512xf32>
    %c0_4 = arith.constant 0 : index
    %c0_5 = arith.constant 0 : index
    %6 = vector.load %arg4[%c0_4, %c0_5] : memref<1x512xf32, #tpu.memory_space<vmem>>, vector<1x512xf32>
    %7 = vector.broadcast %6 : vector<1x512xf32> to vector<32x512xf32>
    %8 = arith.addf %5, %7 : vector<32x512xf32>
    %cst_6 = arith.constant 5.000000e-01 : f32
    %9 = vector.broadcast %cst_6 : f32 to vector<32x512xf32>
    %10 = arith.mulf %9, %8 : vector<32x512xf32>
    %cst_7 = arith.constant 0.707106769 : f32
    %11 = vector.broadcast %cst_7 : f32 to vector<32x512xf32>
    %12 = arith.mulf %8, %11 : vector<32x512xf32>
    %13 = math.erf %12 : vector<32x512xf32>
    %cst_8 = arith.constant 1.000000e+00 : f32
    %14 = vector.broadcast %cst_8 : f32 to vector<32x512xf32>
    %15 = arith.addf %14, %13 : vector<32x512xf32>
    %16 = arith.mulf %10, %15 : vector<32x512xf32>
    %c0_9 = arith.constant 0 : index
    %c0_10 = arith.constant 0 : index
    %17 = vector.load %arg10[%c0_9, %c0_10] : memref<32x256xf32, #tpu.memory_space<vmem>>, vector<32x256xf32>
    %c0_11 = arith.constant 0 : index
    %c0_12 = arith.constant 0 : index
    %18 = vector.load %arg5[%c0_11, %c0_12] : memref<512x256xf32, #tpu.memory_space<vmem>>, vector<512x256xf32>
    %cst_13 = arith.constant dense<0.000000e+00> : vector<32x256xf32>
    %19 = tpu.matmul %16, %18, %cst_13 {dimension_numbers = #tpu.dot_dimension_numbers<[1], [0], [0], [1], [0, 0, 1, 1], [], []>} : vector<32x512xf32>, vector<512x256xf32>, vector<32x256xf32> -> vector<32x256xf32>
    %20 = arith.addf %17, %19 : vector<32x256xf32>
    %c0_14 = arith.constant 0 : index
    %c0_15 = arith.constant 0 : index
    %21 = vector.load %arg10[%c0_14, %c0_15] : memref<32x256xf32, #tpu.memory_space<vmem>>, vector<32x256xf32>
    tpu.vector_store %arg10[%c0_14, %c0_15], %20 {strides = array<i32>} : memref<32x256xf32, #tpu.memory_space<vmem>>, vector<32x256xf32>,
    %c1_i32 = arith.constant 1 : i32
    %22 = arith.cmpi eq, %arg1, %c1_i32 : i32
    %23 = arith.extui %22 : i1 to i32
    %c0_i32_16 = arith.constant 0 : i32
    %24 = arith.cmpi ne, %23, %c0_i32_16 : i32
    scf.if %24 {
      %c0_17 = arith.constant 0 : index
      %c0_18 = arith.constant 0 : index
      %25 = vector.load %arg10[%c0_17, %c0_18] : memref<32x256xf32, #tpu.memory_space<vmem>>, vector<32x256xf32>
      %c0_19 = arith.constant 0 : index
      %c0_20 = arith.constant 0 : index
      %26 = vector.load %arg6[%c0_19, %c0_20] : memref<1x256xf32, #tpu.memory_space<vmem>>, vector<1x256xf32>
      %27 = vector.broadcast %26 : vector<1x256xf32> to vector<32x256xf32>
      %28 = arith.addf %25, %27 : vector<32x256xf32>
      %c0_21 = arith.constant 0 : index
      %c0_22 = arith.constant 0 : index
      %29 = vector.load %arg2[%c0_21, %c0_22] : memref<32x256xf32, #tpu.memory_space<vmem>>, vector<32x256xf32>
      %30 = arith.addf %28, %29 : vector<32x256xf32>
      %c0_23 = arith.constant 0 : index
      %c0_24 = arith.constant 0 : index
      %31 = vector.load %arg9[%c0_23, %c0_24] : memref<32x256xf32, #tpu.memory_space<vmem>>, vector<32x256xf32>
      tpu.vector_store %arg9[%c0_23, %c0_24], %30 {strides = array<i32>} : memref<32x256xf32, #tpu.memory_space<vmem>>, vector<32x256xf32>,
    } else {
    }
    return
  }
  func.func @transform_0(%arg0: i32, %arg1: i32) -> (i32, i32) {
    %c0_i32 = arith.constant 0 : i32
    %c0_i32_0 = arith.constant 0 : i32
    return %arg0, %c0_i32 : i32, i32
  }
  func.func @transform_1(%arg0: i32, %arg1: i32) -> (i32, i32) {
    %c0_i32 = arith.constant 0 : i32
    %c0_i32_0 = arith.constant 0 : i32
    return %c0_i32, %arg1 : i32, i32
  }
  func.func @transform_2(%arg0: i32, %arg1: i32) -> (i32, i32) {
    %c0_i32 = arith.constant 0 : i32
    %c0_i32_0 = arith.constant 0 : i32
    return %c0_i32, %arg1 : i32, i32
  }
  func.func @transform_3(%arg0: i32, %arg1: i32) -> (i32, i32) {
    %c0_i32 = arith.constant 0 : i32
    %c0_i32_0 = arith.constant 0 : i32
    return %arg1, %c0_i32 : i32, i32
  }
  func.func @transform_4(%arg0: i32, %arg1: i32) -> (i32, i32) {
    %c0_i32 = arith.constant 0 : i32
    %c0_i32_0 = arith.constant 0 : i32
    %c0_i32_1 = arith.constant 0 : i32
    return %c0_i32, %c0_i32_0 : i32, i32
  }
  func.func @transform_5(%arg0: i32, %arg1: i32) -> (i32, i32) {
    %c0_i32 = arith.constant 0 : i32
    %c0_i32_0 = arith.constant 0 : i32
    %c0_i32_1 = arith.constant 0 : i32
    return %c0_i32, %c0_i32_0 : i32, i32
  }
  func.func @transform_6(%arg0: i32, %arg1: i32) -> (i32, i32) {
    %c0_i32 = arith.constant 0 : i32
    %c0_i32_0 = arith.constant 0 : i32
    %c0_i32_1 = arith.constant 0 : i32
    return %c0_i32, %c0_i32_0 : i32, i32
  }
  func.func @transform_7(%arg0: i32, %arg1: i32) -> (i32, i32) {
    %c0_i32 = arith.constant 0 : i32
    %c0_i32_0 = arith.constant 0 : i32
    return %arg0, %c0_i32 : i32, i32
  }
}

module attributes {stable_mosaic.version = 11 : i64} {
  func.func @_attention_kernel(%arg0: i32, %arg1: i32, %arg2: i32, %arg3: memref<1x8x256xf32, #tpu.memory_space<vmem>>, %arg4: memref<1x8x256xf32, #tpu.memory_space<vmem>>, %arg5: memref<1x8x256xf32, #tpu.memory_space<vmem>>, %arg6: memref<1x8x256xf32, #tpu.memory_space<vmem>>, %arg7: memref<2x8x1xf32, #tpu.memory_space<vmem>>, %arg8: memref<2x8x1xf32, #tpu.memory_space<vmem>>, %arg9: memref<2x8x128xf32, #tpu.memory_space<vmem>>) attributes {dimension_semantics = [#tpu.dimension_semantics<parallel>, #tpu.dimension_semantics<parallel>, #tpu.dimension_semantics<arbitrary>], iteration_bounds = array<i64: 2, 2, 2>, scalar_prefetch = 0 : i64, scratch_operands = 3 : i64, tpu.core_type = #tpu.core_type<tc>, window_params = [{transform_indices = @transform_0, window_bounds = array<i64: 1, 8, 256>}, {transform_indices = @transform_1, window_bounds = array<i64: 1, 8, 256>}, {transform_indices = @transform_2, window_bounds = array<i64: 1, 8, 256>}, {transform_indices = @transform_3, window_bounds = array<i64: 1, 8, 256>}]} {
    %c0_i32 = arith.constant 0 : i32
    %0 = arith.cmpi eq, %arg2, %c0_i32 : i32
    %1 = arith.extui %0 : i1 to i32
    %c0_i32_0 = arith.constant 0 : i32
    %2 = arith.cmpi ne, %1, %c0_i32_0 : i32
    scf.if %2 {
      %cst = arith.constant -1.000000e+30 : f32
      %11 = vector.broadcast %cst : f32 to vector<2x8x1xf32>
      %c0 = arith.constant 0 : index
      %c0_5 = arith.constant 0 : index
      %c0_6 = arith.constant 0 : index
      %12 = vector.load %arg7[%c0, %c0_5, %c0_6] : memref<2x8x1xf32, #tpu.memory_space<vmem>>, vector<2x8x1xf32>
      tpu.vector_store %arg7[%c0, %c0_5, %c0_6], %11 {strides = array<i32>} : memref<2x8x1xf32, #tpu.memory_space<vmem>>, vector<2x8x1xf32>,
      %cst_7 = arith.constant 0.000000e+00 : f32
      %13 = vector.broadcast %cst_7 : f32 to vector<2x8x1xf32>
      %c0_8 = arith.constant 0 : index
      %c0_9 = arith.constant 0 : index
      %c0_10 = arith.constant 0 : index
      %14 = vector.load %arg8[%c0_8, %c0_9, %c0_10] : memref<2x8x1xf32, #tpu.memory_space<vmem>>, vector<2x8x1xf32>
      tpu.vector_store %arg8[%c0_8, %c0_9, %c0_10], %13 {strides = array<i32>} : memref<2x8x1xf32, #tpu.memory_space<vmem>>, vector<2x8x1xf32>,
      %cst_11 = arith.constant 0.000000e+00 : f32
      %15 = vector.broadcast %cst_11 : f32 to vector<2x8x128xf32>
      %c0_12 = arith.constant 0 : index
      %c0_13 = arith.constant 0 : index
      %c0_14 = arith.constant 0 : index
      %16 = vector.load %arg9[%c0_12, %c0_13, %c0_14] : memref<2x8x128xf32, #tpu.memory_space<vmem>>, vector<2x8x128xf32>
      tpu.vector_store %arg9[%c0_12, %c0_13, %c0_14], %15 {strides = array<i32>} : memref<2x8x128xf32, #tpu.memory_space<vmem>>, vector<2x8x128xf32>,
    } else {
    }
    %c1_i32 = arith.constant 1 : i32
    %3 = arith.subi %arg1, %c1_i32 : i32
    %4 = arith.addi %3, %arg2 : i32
    %c0_i32_1 = arith.constant 0 : i32
    %5 = arith.cmpi sge, %4, %c0_i32_1 : i32
    %6 = arith.extui %5 : i1 to i32
    %c0_i32_2 = arith.constant 0 : i32
    %7 = arith.cmpi ne, %6, %c0_i32_2 : i32
    scf.if %7 {
      %c8_i32 = arith.constant 8 : i32
      %11 = arith.muli %arg1, %c8_i32 : i32
      %12 = tpu.iota {dimensions = array<i32: 0>} : vector<8x8xi32>
      %13 = vector.broadcast %11 : i32 to vector<8x8xi32>
      %14 = arith.addi %13, %12 : vector<8x8xi32>
      %c8_i32_5 = arith.constant 8 : i32
      %15 = arith.muli %4, %c8_i32_5 : i32
      %16 = tpu.iota {dimensions = array<i32: 1>} : vector<8x8xi32>
      %17 = vector.broadcast %15 : i32 to vector<8x8xi32>
      %18 = arith.addi %17, %16 : vector<8x8xi32>
      %19 = arith.cmpi sle, %18, %14 : vector<8x8xi32>
      %c4_i32 = arith.constant 4 : i32
      %20 = vector.broadcast %c4_i32 : i32 to vector<8x8xi32>
      %21 = arith.subi %14, %20 : vector<8x8xi32>
      %22 = arith.cmpi sgt, %18, %21 : vector<8x8xi32>
      %23 = arith.andi %19, %22 : vector<8x8xi1>
      %24 = arith.extui %23 : vector<8x8xi1> to vector<8x8xi32>
      %25 = arith.sitofp %24 : vector<8x8xi32> to vector<8x8xf32>
      %c0 = arith.constant 0 : index
      %c0_6 = arith.constant 0 : index
      %c0_7 = arith.constant 0 : index
      %26 = vector.load %arg3[%c0, %c0_6, %c0_7] : memref<1x8x256xf32, #tpu.memory_space<vmem>>, vector<1x8x128xf32>
      %27 = vector.shape_cast %26 : vector<1x8x128xf32> to vector<8x128xf32>
      %c0_8 = arith.constant 0 : index
      %c0_9 = arith.constant 0 : index
      %c0_10 = arith.constant 0 : index
      %28 = vector.load %arg4[%c0_8, %c0_9, %c0_10] : memref<1x8x256xf32, #tpu.memory_space<vmem>>, vector<1x8x128xf32>
      %29 = vector.shape_cast %28 : vector<1x8x128xf32> to vector<8x128xf32>
      %c0_11 = arith.constant 0 : index
      %c0_12 = arith.constant 0 : index
      %c0_13 = arith.constant 0 : index
      %30 = vector.load %arg5[%c0_11, %c0_12, %c0_13] : memref<1x8x256xf32, #tpu.memory_space<vmem>>, vector<1x8x128xf32>
      %31 = vector.shape_cast %30 : vector<1x8x128xf32> to vector<8x128xf32>
      %cst = arith.constant dense<0.000000e+00> : vector<8x8xf32>
      %32 = tpu.matmul %27, %29, %cst {dimension_numbers = #tpu.dot_dimension_numbers<[1], [1], [0], [0], [0, 0, 1, 0], [], []>} : vector<8x128xf32>, vector<8x128xf32>, vector<8x8xf32> -> vector<8x8xf32>
      %cst_14 = arith.constant -1.000000e+30 : f32
      %33 = vector.broadcast %cst_14 : f32 to vector<8x8xf32>
      %34 = arith.select %23, %32, %33 : vector<8x8xi1>, vector<8x8xf32>
      %c0_15 = arith.constant 0 : index
      %c0_16 = arith.constant 0 : index
      %c0_17 = arith.constant 0 : index
      %35 = vector.load %arg7[%c0_15, %c0_16, %c0_17] : memref<2x8x1xf32, #tpu.memory_space<vmem>>, vector<1x8x1xf32>
      %36 = vector.shape_cast %35 : vector<1x8x1xf32> to vector<8x1xf32>
      %cst_18 = arith.constant dense<0xFF800000> : vector<8xf32>
      %37 = vector.multi_reduction <maximumf>, %34, %cst_18 [1] : vector<8x8xf32> to vector<8xf32>
      %38 = vector.shape_cast %37 : vector<8xf32> to vector<8x1xf32>
      %39 = arith.maximumf %36, %38 : vector<8x1xf32>
      %40 = arith.subf %36, %39 : vector<8x1xf32>
      %41 = math.exp %40 : vector<8x1xf32>
      %42 = vector.broadcast %39 : vector<8x1xf32> to vector<8x8xf32>
      %43 = arith.subf %34, %42 : vector<8x8xf32>
      %44 = math.exp %43 : vector<8x8xf32>
      %45 = arith.mulf %44, %25 : vector<8x8xf32>
      %c0_19 = arith.constant 0 : index
      %c0_20 = arith.constant 0 : index
      %c0_21 = arith.constant 0 : index
      %46 = vector.load %arg8[%c0_19, %c0_20, %c0_21] : memref<2x8x1xf32, #tpu.memory_space<vmem>>, vector<1x8x1xf32>
      %47 = vector.shape_cast %46 : vector<1x8x1xf32> to vector<8x1xf32>
      %48 = arith.mulf %41, %47 : vector<8x1xf32>
      %cst_22 = arith.constant dense<0.000000e+00> : vector<8xf32>
      %49 = vector.multi_reduction <add>, %45, %cst_22 [1] : vector<8x8xf32> to vector<8xf32>
      %50 = vector.shape_cast %49 : vector<8xf32> to vector<8x1xf32>
      %51 = arith.addf %48, %50 : vector<8x1xf32>
      %c0_23 = arith.constant 0 : index
      %c0_24 = arith.constant 0 : index
      %c0_25 = arith.constant 0 : index
      %52 = vector.load %arg8[%c0_23, %c0_24, %c0_25] : memref<2x8x1xf32, #tpu.memory_space<vmem>>, vector<1x8x1xf32>
      %53 = vector.shape_cast %52 : vector<1x8x1xf32> to vector<8x1xf32>
      %54 = vector.shape_cast %51 : vector<8x1xf32> to vector<1x8x1xf32>
      tpu.vector_store %arg8[%c0_23, %c0_24, %c0_25], %54 {strides = array<i32>} : memref<2x8x1xf32, #tpu.memory_space<vmem>>, vector<1x8x1xf32>,
      %c0_26 = arith.constant 0 : index
      %c0_27 = arith.constant 0 : index
      %c0_28 = arith.constant 0 : index
      %55 = vector.load %arg9[%c0_26, %c0_27, %c0_28] : memref<2x8x128xf32, #tpu.memory_space<vmem>>, vector<1x8x128xf32>
      %56 = vector.shape_cast %55 : vector<1x8x128xf32> to vector<8x128xf32>
      %57 = vector.broadcast %41 : vector<8x1xf32> to vector<8x128xf32>
      %58 = arith.mulf %57, %56 : vector<8x128xf32>
      %cst_29 = arith.constant dense<0.000000e+00> : vector<8x128xf32>
      %59 = tpu.matmul %45, %31, %cst_29 {dimension_numbers = #tpu.dot_dimension_numbers<[1], [0], [0], [1], [0, 0, 1, 1], [], []>} : vector<8x8xf32>, vector<8x128xf32>, vector<8x128xf32> -> vector<8x128xf32>
      %60 = arith.addf %58, %59 : vector<8x128xf32>
      %c0_30 = arith.constant 0 : index
      %c0_31 = arith.constant 0 : index
      %c0_32 = arith.constant 0 : index
      %61 = vector.load %arg9[%c0_30, %c0_31, %c0_32] : memref<2x8x128xf32, #tpu.memory_space<vmem>>, vector<1x8x128xf32>
      %62 = vector.shape_cast %61 : vector<1x8x128xf32> to vector<8x128xf32>
      %63 = vector.shape_cast %60 : vector<8x128xf32> to vector<1x8x128xf32>
      tpu.vector_store %arg9[%c0_30, %c0_31, %c0_32], %63 {strides = array<i32>} : memref<2x8x128xf32, #tpu.memory_space<vmem>>, vector<1x8x128xf32>,
      %c0_33 = arith.constant 0 : index
      %c0_34 = arith.constant 0 : index
      %c0_35 = arith.constant 0 : index
      %64 = vector.load %arg7[%c0_33, %c0_34, %c0_35] : memref<2x8x1xf32, #tpu.memory_space<vmem>>, vector<1x8x1xf32>
      %65 = vector.shape_cast %64 : vector<1x8x1xf32> to vector<8x1xf32>
      %66 = vector.shape_cast %39 : vector<8x1xf32> to vector<1x8x1xf32>
      tpu.vector_store %arg7[%c0_33, %c0_34, %c0_35], %66 {strides = array<i32>} : memref<2x8x1xf32, #tpu.memory_space<vmem>>, vector<1x8x1xf32>,
      %c0_36 = arith.constant 0 : index
      %c0_37 = arith.constant 0 : index
      %c128 = arith.constant 128 : index
      %67 = vector.load %arg3[%c0_36, %c0_37, %c128] : memref<1x8x256xf32, #tpu.memory_space<vmem>>, vector<1x8x128xf32>
      %68 = vector.shape_cast %67 : vector<1x8x128xf32> to vector<8x128xf32>
      %c0_38 = arith.constant 0 : index
      %c0_39 = arith.constant 0 : index
      %c128_40 = arith.constant 128 : index
      %69 = vector.load %arg4[%c0_38, %c0_39, %c128_40] : memref<1x8x256xf32, #tpu.memory_space<vmem>>, vector<1x8x128xf32>
      %70 = vector.shape_cast %69 : vector<1x8x128xf32> to vector<8x128xf32>
      %c0_41 = arith.constant 0 : index
      %c0_42 = arith.constant 0 : index
      %c128_43 = arith.constant 128 : index
      %71 = vector.load %arg5[%c0_41, %c0_42, %c128_43] : memref<1x8x256xf32, #tpu.memory_space<vmem>>, vector<1x8x128xf32>
      %72 = vector.shape_cast %71 : vector<1x8x128xf32> to vector<8x128xf32>
      %cst_44 = arith.constant dense<0.000000e+00> : vector<8x8xf32>
      %73 = tpu.matmul %68, %70, %cst_44 {dimension_numbers = #tpu.dot_dimension_numbers<[1], [1], [0], [0], [0, 0, 1, 0], [], []>} : vector<8x128xf32>, vector<8x128xf32>, vector<8x8xf32> -> vector<8x8xf32>
      %cst_45 = arith.constant -1.000000e+30 : f32
      %74 = vector.broadcast %cst_45 : f32 to vector<8x8xf32>
      %75 = arith.select %23, %73, %74 : vector<8x8xi1>, vector<8x8xf32>
      %c1 = arith.constant 1 : index
      %c0_46 = arith.constant 0 : index
      %c0_47 = arith.constant 0 : index
      %76 = vector.load %arg7[%c1, %c0_46, %c0_47] : memref<2x8x1xf32, #tpu.memory_space<vmem>>, vector<1x8x1xf32>
      %77 = vector.shape_cast %76 : vector<1x8x1xf32> to vector<8x1xf32>
      %cst_48 = arith.constant dense<0xFF800000> : vector<8xf32>
      %78 = vector.multi_reduction <maximumf>, %75, %cst_48 [1] : vector<8x8xf32> to vector<8xf32>
      %79 = vector.shape_cast %78 : vector<8xf32> to vector<8x1xf32>
      %80 = arith.maximumf %77, %79 : vector<8x1xf32>
      %81 = arith.subf %77, %80 : vector<8x1xf32>
      %82 = math.exp %81 : vector<8x1xf32>
      %83 = vector.broadcast %80 : vector<8x1xf32> to vector<8x8xf32>
      %84 = arith.subf %75, %83 : vector<8x8xf32>
      %85 = math.exp %84 : vector<8x8xf32>
      %86 = arith.mulf %85, %25 : vector<8x8xf32>
      %c1_49 = arith.constant 1 : index
      %c0_50 = arith.constant 0 : index
      %c0_51 = arith.constant 0 : index
      %87 = vector.load %arg8[%c1_49, %c0_50, %c0_51] : memref<2x8x1xf32, #tpu.memory_space<vmem>>, vector<1x8x1xf32>
      %88 = vector.shape_cast %87 : vector<1x8x1xf32> to vector<8x1xf32>
      %89 = arith.mulf %82, %88 : vector<8x1xf32>
      %cst_52 = arith.constant dense<0.000000e+00> : vector<8xf32>
      %90 = vector.multi_reduction <add>, %86, %cst_52 [1] : vector<8x8xf32> to vector<8xf32>
      %91 = vector.shape_cast %90 : vector<8xf32> to vector<8x1xf32>
      %92 = arith.addf %89, %91 : vector<8x1xf32>
      %c1_53 = arith.constant 1 : index
      %c0_54 = arith.constant 0 : index
      %c0_55 = arith.constant 0 : index
      %93 = vector.load %arg8[%c1_53, %c0_54, %c0_55] : memref<2x8x1xf32, #tpu.memory_space<vmem>>, vector<1x8x1xf32>
      %94 = vector.shape_cast %93 : vector<1x8x1xf32> to vector<8x1xf32>
      %95 = vector.shape_cast %92 : vector<8x1xf32> to vector<1x8x1xf32>
      tpu.vector_store %arg8[%c1_53, %c0_54, %c0_55], %95 {strides = array<i32>} : memref<2x8x1xf32, #tpu.memory_space<vmem>>, vector<1x8x1xf32>,
      %c1_56 = arith.constant 1 : index
      %c0_57 = arith.constant 0 : index
      %c0_58 = arith.constant 0 : index
      %96 = vector.load %arg9[%c1_56, %c0_57, %c0_58] : memref<2x8x128xf32, #tpu.memory_space<vmem>>, vector<1x8x128xf32>
      %97 = vector.shape_cast %96 : vector<1x8x128xf32> to vector<8x128xf32>
      %98 = vector.broadcast %82 : vector<8x1xf32> to vector<8x128xf32>
      %99 = arith.mulf %98, %97 : vector<8x128xf32>
      %cst_59 = arith.constant dense<0.000000e+00> : vector<8x128xf32>
      %100 = tpu.matmul %86, %72, %cst_59 {dimension_numbers = #tpu.dot_dimension_numbers<[1], [0], [0], [1], [0, 0, 1, 1], [], []>} : vector<8x8xf32>, vector<8x128xf32>, vector<8x128xf32> -> vector<8x128xf32>
      %101 = arith.addf %99, %100 : vector<8x128xf32>
      %c1_60 = arith.constant 1 : index
      %c0_61 = arith.constant 0 : index
      %c0_62 = arith.constant 0 : index
      %102 = vector.load %arg9[%c1_60, %c0_61, %c0_62] : memref<2x8x128xf32, #tpu.memory_space<vmem>>, vector<1x8x128xf32>
      %103 = vector.shape_cast %102 : vector<1x8x128xf32> to vector<8x128xf32>
      %104 = vector.shape_cast %101 : vector<8x128xf32> to vector<1x8x128xf32>
      tpu.vector_store %arg9[%c1_60, %c0_61, %c0_62], %104 {strides = array<i32>} : memref<2x8x128xf32, #tpu.memory_space<vmem>>, vector<1x8x128xf32>,
      %c1_63 = arith.constant 1 : index
      %c0_64 = arith.constant 0 : index
      %c0_65 = arith.constant 0 : index
      %105 = vector.load %arg7[%c1_63, %c0_64, %c0_65] : memref<2x8x1xf32, #tpu.memory_space<vmem>>, vector<1x8x1xf32>
      %106 = vector.shape_cast %105 : vector<1x8x1xf32> to vector<8x1xf32>
      %107 = vector.shape_cast %80 : vector<8x1xf32> to vector<1x8x1xf32>
      tpu.vector_store %arg7[%c1_63, %c0_64, %c0_65], %107 {strides = array<i32>} : memref<2x8x1xf32, #tpu.memory_space<vmem>>, vector<1x8x1xf32>,
    } else {
    }
    %c1_i32_3 = arith.constant 1 : i32
    %8 = arith.cmpi eq, %arg2, %c1_i32_3 : i32
    %9 = arith.extui %8 : i1 to i32
    %c0_i32_4 = arith.constant 0 : i32
    %10 = arith.cmpi ne, %9, %c0_i32_4 : i32
    scf.if %10 {
      %c0 = arith.constant 0 : index
      %c0_5 = arith.constant 0 : index
      %c0_6 = arith.constant 0 : index
      %11 = vector.load %arg8[%c0, %c0_5, %c0_6] : memref<2x8x1xf32, #tpu.memory_space<vmem>>, vector<1x8x1xf32>
      %12 = vector.shape_cast %11 : vector<1x8x1xf32> to vector<8x1xf32>
      %cst = arith.constant 1.000000e+00 : f32
      %13 = vector.broadcast %cst : f32 to vector<8x1xf32>
      %14 = arith.divf %13, %12 : vector<8x1xf32>
      %c0_7 = arith.constant 0 : index
      %c0_8 = arith.constant 0 : index
      %c0_9 = arith.constant 0 : index
      %15 = vector.load %arg9[%c0_7, %c0_8, %c0_9] : memref<2x8x128xf32, #tpu.memory_space<vmem>>, vector<1x8x128xf32>
      %16 = vector.shape_cast %15 : vector<1x8x128xf32> to vector<8x128xf32>
      %17 = vector.broadcast %14 : vector<8x1xf32> to vector<8x128xf32>
      %18 = arith.mulf %16, %17 : vector<8x128xf32>
      %c0_10 = arith.constant 0 : index
      %c0_11 = arith.constant 0 : index
      %c0_12 = arith.constant 0 : index
      %19 = vector.load %arg6[%c0_10, %c0_11, %c0_12] : memref<1x8x256xf32, #tpu.memory_space<vmem>>, vector<1x8x128xf32>
      %20 = vector.shape_cast %19 : vector<1x8x128xf32> to vector<8x128xf32>
      %21 = vector.shape_cast %18 : vector<8x128xf32> to vector<1x8x128xf32>
      tpu.vector_store %arg6[%c0_10, %c0_11, %c0_12], %21 {strides = array<i32>} : memref<1x8x256xf32, #tpu.memory_space<vmem>>, vector<1x8x128xf32>,
      %c1 = arith.constant 1 : index
      %c0_13 = arith.constant 0 : index
      %c0_14 = arith.constant 0 : index
      %22 = vector.load %arg8[%c1, %c0_13, %c0_14] : memref<2x8x1xf32, #tpu.memory_space<vmem>>, vector<1x8x1xf32>
      %23 = vector.shape_cast %22 : vector<1x8x1xf32> to vector<8x1xf32>
      %cst_15 = arith.constant 1.000000e+00 : f32
      %24 = vector.broadcast %cst_15 : f32 to vector<8x1xf32>
      %25 = arith.divf %24, %23 : vector<8x1xf32>
      %c1_16 = arith.constant 1 : index
      %c0_17 = arith.constant 0 : index
      %c0_18 = arith.constant 0 : index
      %26 = vector.load %arg9[%c1_16, %c0_17, %c0_18] : memref<2x8x128xf32, #tpu.memory_space<vmem>>, vector<1x8x128xf32>
      %27 = vector.shape_cast %26 : vector<1x8x128xf32> to vector<8x128xf32>
      %28 = vector.broadcast %25 : vector<8x1xf32> to vector<8x128xf32>
      %29 = arith.mulf %27, %28 : vector<8x128xf32>
      %c0_19 = arith.constant 0 : index
      %c0_20 = arith.constant 0 : index
      %c128 = arith.constant 128 : index
      %30 = vector.load %arg6[%c0_19, %c0_20, %c128] : memref<1x8x256xf32, #tpu.memory_space<vmem>>, vector<1x8x128xf32>
      %31 = vector.shape_cast %30 : vector<1x8x128xf32> to vector<8x128xf32>
      %32 = vector.shape_cast %29 : vector<8x128xf32> to vector<1x8x128xf32>
      tpu.vector_store %arg6[%c0_19, %c0_20, %c128], %32 {strides = array<i32>} : memref<1x8x256xf32, #tpu.memory_space<vmem>>, vector<1x8x128xf32>,
    } else {
    }
    return
  }
  func.func @transform_0(%arg0: i32, %arg1: i32, %arg2: i32) -> (i32, i32, i32) {
    %c0_i32 = arith.constant 0 : i32
    %c0_i32_0 = arith.constant 0 : i32
    return %arg0, %arg1, %c0_i32 : i32, i32, i32
  }
  func.func @transform_1(%arg0: i32, %arg1: i32, %arg2: i32) -> (i32, i32, i32) {
    %c1_i32 = arith.constant 1 : i32
    %0 = arith.subi %arg1, %c1_i32 : i32
    %1 = arith.addi %0, %arg2 : i32
    %c0_i32 = arith.constant 0 : i32
    %2 = arith.maxsi %1, %c0_i32 : i32
    %c1_i32_0 = arith.constant 1 : i32
    %c0_i32_1 = arith.constant 0 : i32
    return %arg0, %2, %c1_i32_0 : i32, i32, i32
  }
  func.func @transform_2(%arg0: i32, %arg1: i32, %arg2: i32) -> (i32, i32, i32) {
    %c1_i32 = arith.constant 1 : i32
    %0 = arith.subi %arg1, %c1_i32 : i32
    %1 = arith.addi %0, %arg2 : i32
    %c0_i32 = arith.constant 0 : i32
    %2 = arith.maxsi %1, %c0_i32 : i32
    %c2_i32 = arith.constant 2 : i32
    %c0_i32_0 = arith.constant 0 : i32
    return %arg0, %2, %c2_i32 : i32, i32, i32
  }
  func.func @transform_3(%arg0: i32, %arg1: i32, %arg2: i32) -> (i32, i32, i32) {
    %c0_i32 = arith.constant 0 : i32
    %c0_i32_0 = arith.constant 0 : i32
    return %arg0, %arg1, %c0_i32 : i32, i32, i32
  }
}

module attributes {stable_mosaic.version = 11 : i64} {
  func.func @_linear_kernel(%arg0: i32, %arg1: i32, %arg2: i32, %arg3: memref<32x256xf32, #tpu.memory_space<vmem>>, %arg4: memref<256x384xf32, #tpu.memory_space<vmem>>, %arg5: memref<1x384xf32, #tpu.memory_space<vmem>>, %arg6: memref<1x256xf32, #tpu.memory_space<vmem>>, %arg7: memref<1x256xf32, #tpu.memory_space<vmem>>, %arg8: memref<32x384xf32, #tpu.memory_space<vmem>>, %arg9: memref<32x384xf32, #tpu.memory_space<vmem>>, %arg10: memref<32x256xf32, #tpu.memory_space<vmem>>) attributes {dimension_semantics = [#tpu.dimension_semantics<parallel>, #tpu.dimension_semantics<arbitrary>, #tpu.dimension_semantics<arbitrary>], iteration_bounds = array<i64: 1, 2, 1>, scalar_prefetch = 0 : i64, scratch_operands = 2 : i64, tpu.core_type = #tpu.core_type<tc>, window_params = [{transform_indices = @transform_0, window_bounds = array<i64: 32, 256>}, {transform_indices = @transform_1, window_bounds = array<i64: 256, 384>}, {transform_indices = @transform_2, window_bounds = array<i64: 1, 384>}, {pipeline_mode = #tpu.pipeline_mode<synchronous>, transform_indices = @transform_3, window_bounds = array<i64: 1, 256>}, {pipeline_mode = #tpu.pipeline_mode<synchronous>, transform_indices = @transform_4, window_bounds = array<i64: 1, 256>}, {transform_indices = @transform_5, window_bounds = array<i64: 32, 384>}]} {
    %c0_i32 = arith.constant 0 : i32
    %0 = arith.cmpi eq, %arg2, %c0_i32 : i32
    %1 = arith.extui %0 : i1 to i32
    %c0_i32_0 = arith.constant 0 : i32
    %2 = arith.cmpi ne, %1, %c0_i32_0 : i32
    scf.if %2 {
      %cst_12 = arith.constant 0.000000e+00 : f32
      %15 = vector.broadcast %cst_12 : f32 to vector<32x384xf32>
      %c0_13 = arith.constant 0 : index
      %c0_14 = arith.constant 0 : index
      %16 = vector.load %arg9[%c0_13, %c0_14] : memref<32x384xf32, #tpu.memory_space<vmem>>, vector<32x384xf32>
      tpu.vector_store %arg9[%c0_13, %c0_14], %15 {strides = array<i32>} : memref<32x384xf32, #tpu.memory_space<vmem>>, vector<32x384xf32>,
    } else {
    }
    %c0_i32_1 = arith.constant 0 : i32
    %3 = arith.cmpi eq, %arg1, %c0_i32_1 : i32
    %4 = arith.extui %3 : i1 to i32
    %c0_i32_2 = arith.constant 0 : i32
    %5 = arith.cmpi ne, %4, %c0_i32_2 : i32
    scf.if %5 {
      %c0_12 = arith.constant 0 : index
      %c0_13 = arith.constant 0 : index
      %15 = vector.load %arg3[%c0_12, %c0_13] : memref<32x256xf32, #tpu.memory_space<vmem>>, vector<32x256xf32>
      %cst_14 = arith.constant dense<0.000000e+00> : vector<32xf32>
      %16 = vector.multi_reduction <add>, %15, %cst_14 [1] : vector<32x256xf32> to vector<32xf32>
      %17 = vector.shape_cast %16 : vector<32xf32> to vector<32x1xf32>
      %cst_15 = arith.constant 2.560000e+02 : f32
      %18 = vector.broadcast %cst_15 : f32 to vector<32x1xf32>
      %19 = arith.divf %17, %18 : vector<32x1xf32>
      %20 = vector.broadcast %19 : vector<32x1xf32> to vector<32x256xf32>
      %21 = arith.subf %15, %20 : vector<32x256xf32>
      %22 = arith.mulf %21, %21 : vector<32x256xf32>
      %cst_16 = arith.constant dense<0.000000e+00> : vector<32xf32>
      %23 = vector.multi_reduction <add>, %22, %cst_16 [1] : vector<32x256xf32> to vector<32xf32>
      %24 = vector.shape_cast %23 : vector<32xf32> to vector<32x1xf32>
      %cst_17 = arith.constant 2.560000e+02 : f32
      %25 = vector.broadcast %cst_17 : f32 to vector<32x1xf32>
      %26 = arith.divf %24, %25 : vector<32x1xf32>
      %27 = vector.broadcast %19 : vector<32x1xf32> to vector<32x256xf32>
      %28 = arith.subf %15, %27 : vector<32x256xf32>
      %cst_18 = arith.constant 9.99999974E-6 : f32
      %29 = vector.broadcast %cst_18 : f32 to vector<32x1xf32>
      %30 = arith.addf %26, %29 : vector<32x1xf32>
      %31 = math.rsqrt %30 : vector<32x1xf32>
      %32 = vector.broadcast %31 : vector<32x1xf32> to vector<32x256xf32>
      %33 = arith.mulf %28, %32 : vector<32x256xf32>
      %c0_19 = arith.constant 0 : index
      %c0_20 = arith.constant 0 : index
      %34 = vector.load %arg6[%c0_19, %c0_20] : memref<1x256xf32, #tpu.memory_space<vmem>>, vector<1x256xf32>
      %35 = vector.broadcast %34 : vector<1x256xf32> to vector<32x256xf32>
      %36 = arith.mulf %33, %35 : vector<32x256xf32>
      %c0_21 = arith.constant 0 : index
      %c0_22 = arith.constant 0 : index
      %37 = vector.load %arg7[%c0_21, %c0_22] : memref<1x256xf32, #tpu.memory_space<vmem>>, vector<1x256xf32>
      %38 = vector.broadcast %37 : vector<1x256xf32> to vector<32x256xf32>
      %39 = arith.addf %36, %38 : vector<32x256xf32>
      %c0_23 = arith.constant 0 : index
      %c0_24 = arith.constant 0 : index
      %40 = vector.load %arg10[%c0_23, %c0_24] : memref<32x256xf32, #tpu.memory_space<vmem>>, vector<32x256xf32>
      tpu.vector_store %arg10[%c0_23, %c0_24], %39 {strides = array<i32>} : memref<32x256xf32, #tpu.memory_space<vmem>>, vector<32x256xf32>,
    } else {
    }
    %c0 = arith.constant 0 : index
    %c0_3 = arith.constant 0 : index
    %6 = vector.load %arg10[%c0, %c0_3] : memref<32x256xf32, #tpu.memory_space<vmem>>, vector<32x256xf32>
    %c0_4 = arith.constant 0 : index
    %c0_5 = arith.constant 0 : index
    %7 = vector.load %arg9[%c0_4, %c0_5] : memref<32x384xf32, #tpu.memory_space<vmem>>, vector<32x384xf32>
    %c0_6 = arith.constant 0 : index
    %c0_7 = arith.constant 0 : index
    %8 = vector.load %arg4[%c0_6, %c0_7] : memref<256x384xf32, #tpu.memory_space<vmem>>, vector<256x384xf32>
    %cst = arith.constant dense<0.000000e+00> : vector<32x384xf32>
    %9 = tpu.matmul %6, %8, %cst {dimension_numbers = #tpu.dot_dimension_numbers<[1], [0], [0], [1], [0, 0, 1, 1], [], []>} : vector<32x256xf32>, vector<256x384xf32>, vector<32x384xf32> -> vector<32x384xf32>
    %10 = arith.addf %7, %9 : vector<32x384xf32>
    %c0_8 = arith.constant 0 : index
    %c0_9 = arith.constant 0 : index
    %11 = vector.load %arg9[%c0_8, %c0_9] : memref<32x384xf32, #tpu.memory_space<vmem>>, vector<32x384xf32>
    tpu.vector_store %arg9[%c0_8, %c0_9], %10 {strides = array<i32>} : memref<32x384xf32, #tpu.memory_space<vmem>>, vector<32x384xf32>,
    %c0_i32_10 = arith.constant 0 : i32
    %12 = arith.cmpi eq, %arg2, %c0_i32_10 : i32
    %13 = arith.extui %12 : i1 to i32
    %c0_i32_11 = arith.constant 0 : i32
    %14 = arith.cmpi ne, %13, %c0_i32_11 : i32
    scf.if %14 {
      %c0_12 = arith.constant 0 : index
      %c0_13 = arith.constant 0 : index
      %15 = vector.load %arg9[%c0_12, %c0_13] : memref<32x384xf32, #tpu.memory_space<vmem>>, vector<32x384xf32>
      %c0_14 = arith.constant 0 : index
      %c0_15 = arith.constant 0 : index
      %16 = vector.load %arg5[%c0_14, %c0_15] : memref<1x384xf32, #tpu.memory_space<vmem>>, vector<1x384xf32>
      %17 = vector.broadcast %16 : vector<1x384xf32> to vector<32x384xf32>
      %18 = arith.addf %15, %17 : vector<32x384xf32>
      %c0_16 = arith.constant 0 : index
      %c0_17 = arith.constant 0 : index
      %19 = vector.load %arg8[%c0_16, %c0_17] : memref<32x384xf32, #tpu.memory_space<vmem>>, vector<32x384xf32>
      tpu.vector_store %arg8[%c0_16, %c0_17], %18 {strides = array<i32>} : memref<32x384xf32, #tpu.memory_space<vmem>>, vector<32x384xf32>,
    } else {
    }
    return
  }
  func.func @transform_0(%arg0: i32, %arg1: i32, %arg2: i32) -> (i32, i32) {
    %c0_i32 = arith.constant 0 : i32
    return %arg0, %arg2 : i32, i32
  }
  func.func @transform_1(%arg0: i32, %arg1: i32, %arg2: i32) -> (i32, i32) {
    %c0_i32 = arith.constant 0 : i32
    return %arg2, %arg1 : i32, i32
  }
  func.func @transform_2(%arg0: i32, %arg1: i32, %arg2: i32) -> (i32, i32) {
    %c0_i32 = arith.constant 0 : i32
    %c0_i32_0 = arith.constant 0 : i32
    return %c0_i32, %arg1 : i32, i32
  }
  func.func @transform_3(%arg0: i32, %arg1: i32, %arg2: i32) -> (i32, i32) {
    %c0_i32 = arith.constant 0 : i32
    %c0_i32_0 = arith.constant 0 : i32
    %c0_i32_1 = arith.constant 0 : i32
    return %c0_i32, %c0_i32_0 : i32, i32
  }
  func.func @transform_4(%arg0: i32, %arg1: i32, %arg2: i32) -> (i32, i32) {
    %c0_i32 = arith.constant 0 : i32
    %c0_i32_0 = arith.constant 0 : i32
    %c0_i32_1 = arith.constant 0 : i32
    return %c0_i32, %c0_i32_0 : i32, i32
  }
  func.func @transform_5(%arg0: i32, %arg1: i32, %arg2: i32) -> (i32, i32) {
    %c0_i32 = arith.constant 0 : i32
    return %arg0, %arg1 : i32, i32
  }
}

module attributes {stable_mosaic.version = 11 : i64} {
  func.func @_linear_kernel(%arg0: i32, %arg1: i32, %arg2: i32, %arg3: memref<2x256xf32, #tpu.memory_space<vmem>>, %arg4: memref<256x256xf32, #tpu.memory_space<vmem>>, %arg5: memref<1x256xf32, #tpu.memory_space<vmem>>, %arg6: memref<1x256xf32, #tpu.memory_space<vmem>>, %arg7: memref<2x256xf32, #tpu.memory_space<vmem>>, %arg8: memref<2x256xf32, #tpu.memory_space<vmem>>) attributes {dimension_semantics = [#tpu.dimension_semantics<parallel>, #tpu.dimension_semantics<parallel>, #tpu.dimension_semantics<arbitrary>], iteration_bounds = array<i64: 1, 1, 1>, scalar_prefetch = 0 : i64, scratch_operands = 1 : i64, tpu.core_type = #tpu.core_type<tc>, window_params = [{transform_indices = @transform_0, window_bounds = array<i64: 2, 256>}, {transform_indices = @transform_1, window_bounds = array<i64: 256, 256>}, {pipeline_mode = #tpu.pipeline_mode<synchronous>, transform_indices = @transform_2, window_bounds = array<i64: 1, 256>}, {pipeline_mode = #tpu.pipeline_mode<synchronous>, transform_indices = @transform_3, window_bounds = array<i64: 1, 256>}, {transform_indices = @transform_4, window_bounds = array<i64: 2, 256>}]} {
    %c0_i32 = arith.constant 0 : i32
    %0 = arith.cmpi eq, %arg2, %c0_i32 : i32
    %1 = arith.extui %0 : i1 to i32
    %c0_i32_0 = arith.constant 0 : i32
    %2 = arith.cmpi ne, %1, %c0_i32_0 : i32
    scf.if %2 {
      %cst_19 = arith.constant 0.000000e+00 : f32
      %36 = vector.broadcast %cst_19 : f32 to vector<2x256xf32>
      %c0_20 = arith.constant 0 : index
      %c0_21 = arith.constant 0 : index
      %37 = vector.load %arg8[%c0_20, %c0_21] : memref<2x256xf32, #tpu.memory_space<vmem>>, vector<2x256xf32>
      tpu.vector_store %arg8[%c0_20, %c0_21], %36 {strides = array<i32>} : memref<2x256xf32, #tpu.memory_space<vmem>>, vector<2x256xf32>,
    } else {
    }
    %c0 = arith.constant 0 : index
    %c0_1 = arith.constant 0 : index
    %3 = vector.load %arg3[%c0, %c0_1] : memref<2x256xf32, #tpu.memory_space<vmem>>, vector<2x256xf32>
    %cst = arith.constant dense<0.000000e+00> : vector<2xf32>
    %4 = vector.multi_reduction <add>, %3, %cst [1] : vector<2x256xf32> to vector<2xf32>
    %5 = vector.shape_cast %4 : vector<2xf32> to vector<2x1xf32>
    %cst_2 = arith.constant 2.560000e+02 : f32
    %6 = vector.broadcast %cst_2 : f32 to vector<2x1xf32>
    %7 = arith.divf %5, %6 : vector<2x1xf32>
    %8 = vector.broadcast %7 : vector<2x1xf32> to vector<2x256xf32>
    %9 = arith.subf %3, %8 : vector<2x256xf32>
    %10 = arith.mulf %9, %9 : vector<2x256xf32>
    %cst_3 = arith.constant dense<0.000000e+00> : vector<2xf32>
    %11 = vector.multi_reduction <add>, %10, %cst_3 [1] : vector<2x256xf32> to vector<2xf32>
    %12 = vector.shape_cast %11 : vector<2xf32> to vector<2x1xf32>
    %cst_4 = arith.constant 2.560000e+02 : f32
    %13 = vector.broadcast %cst_4 : f32 to vector<2x1xf32>
    %14 = arith.divf %12, %13 : vector<2x1xf32>
    %15 = vector.broadcast %7 : vector<2x1xf32> to vector<2x256xf32>
    %16 = arith.subf %3, %15 : vector<2x256xf32>
    %cst_5 = arith.constant 9.99999974E-6 : f32
    %17 = vector.broadcast %cst_5 : f32 to vector<2x1xf32>
    %18 = arith.addf %14, %17 : vector<2x1xf32>
    %19 = math.rsqrt %18 : vector<2x1xf32>
    %20 = vector.broadcast %19 : vector<2x1xf32> to vector<2x256xf32>
    %21 = arith.mulf %16, %20 : vector<2x256xf32>
    %c0_6 = arith.constant 0 : index
    %c0_7 = arith.constant 0 : index
    %22 = vector.load %arg5[%c0_6, %c0_7] : memref<1x256xf32, #tpu.memory_space<vmem>>, vector<1x256xf32>
    %23 = vector.broadcast %22 : vector<1x256xf32> to vector<2x256xf32>
    %24 = arith.mulf %21, %23 : vector<2x256xf32>
    %c0_8 = arith.constant 0 : index
    %c0_9 = arith.constant 0 : index
    %25 = vector.load %arg6[%c0_8, %c0_9] : memref<1x256xf32, #tpu.memory_space<vmem>>, vector<1x256xf32>
    %26 = vector.broadcast %25 : vector<1x256xf32> to vector<2x256xf32>
    %27 = arith.addf %24, %26 : vector<2x256xf32>
    %c0_10 = arith.constant 0 : index
    %c0_11 = arith.constant 0 : index
    %28 = vector.load %arg8[%c0_10, %c0_11] : memref<2x256xf32, #tpu.memory_space<vmem>>, vector<2x256xf32>
    %c0_12 = arith.constant 0 : index
    %c0_13 = arith.constant 0 : index
    %29 = vector.load %arg4[%c0_12, %c0_13] : memref<256x256xf32, #tpu.memory_space<vmem>>, vector<256x256xf32>
    %cst_14 = arith.constant dense<0.000000e+00> : vector<2x256xf32>
    %30 = tpu.matmul %27, %29, %cst_14 {dimension_numbers = #tpu.dot_dimension_numbers<[1], [0], [0], [1], [0, 0, 1, 1], [], []>} : vector<2x256xf32>, vector<256x256xf32>, vector<2x256xf32> -> vector<2x256xf32>
    %31 = arith.addf %28, %30 : vector<2x256xf32>
    %c0_15 = arith.constant 0 : index
    %c0_16 = arith.constant 0 : index
    %32 = vector.load %arg8[%c0_15, %c0_16] : memref<2x256xf32, #tpu.memory_space<vmem>>, vector<2x256xf32>
    tpu.vector_store %arg8[%c0_15, %c0_16], %31 {strides = array<i32>} : memref<2x256xf32, #tpu.memory_space<vmem>>, vector<2x256xf32>,
    %c0_i32_17 = arith.constant 0 : i32
    %33 = arith.cmpi eq, %arg2, %c0_i32_17 : i32
    %34 = arith.extui %33 : i1 to i32
    %c0_i32_18 = arith.constant 0 : i32
    %35 = arith.cmpi ne, %34, %c0_i32_18 : i32
    scf.if %35 {
      %c0_19 = arith.constant 0 : index
      %c0_20 = arith.constant 0 : index
      %36 = vector.load %arg8[%c0_19, %c0_20] : memref<2x256xf32, #tpu.memory_space<vmem>>, vector<2x256xf32>
      %c0_21 = arith.constant 0 : index
      %c0_22 = arith.constant 0 : index
      %37 = vector.load %arg7[%c0_21, %c0_22] : memref<2x256xf32, #tpu.memory_space<vmem>>, vector<2x256xf32>
      tpu.vector_store %arg7[%c0_21, %c0_22], %36 {strides = array<i32>} : memref<2x256xf32, #tpu.memory_space<vmem>>, vector<2x256xf32>,
    } else {
    }
    return
  }
  func.func @transform_0(%arg0: i32, %arg1: i32, %arg2: i32) -> (i32, i32) {
    %c0_i32 = arith.constant 0 : i32
    return %arg0, %arg2 : i32, i32
  }
  func.func @transform_1(%arg0: i32, %arg1: i32, %arg2: i32) -> (i32, i32) {
    %c0_i32 = arith.constant 0 : i32
    return %arg2, %arg1 : i32, i32
  }
  func.func @transform_2(%arg0: i32, %arg1: i32, %arg2: i32) -> (i32, i32) {
    %c0_i32 = arith.constant 0 : i32
    %c0_i32_0 = arith.constant 0 : i32
    %c0_i32_1 = arith.constant 0 : i32
    return %c0_i32, %c0_i32_0 : i32, i32
  }
  func.func @transform_3(%arg0: i32, %arg1: i32, %arg2: i32) -> (i32, i32) {
    %c0_i32 = arith.constant 0 : i32
    %c0_i32_0 = arith.constant 0 : i32
    %c0_i32_1 = arith.constant 0 : i32
    return %c0_i32, %c0_i32_0 : i32, i32
  }
  func.func @transform_4(%arg0: i32, %arg1: i32, %arg2: i32) -> (i32, i32) {
    %c0_i32 = arith.constant 0 : i32
    return %arg0, %arg1 : i32, i32
  }
}

</mosaic_0001>

<bundles_post_ra>
// kernel: gpt_forward.11
= control target key start
LH: loop header
LB: loop body
LE: loop exit
PB: predicated region body
PF: predicated region fallthrough
CT: control target
= control target key end

     0   :  { %9 = vsyncpa [#allocation4], 0  ;;  %s681_s0 = inlined_call_operand.hbm [shape: f32[32,256], index: 0, kind: input, shape index: {}]   ;;  %s682_s1 = inlined_call_operand.hbm [shape: f32[256,256], index: 1, kind: input, shape index: {}]   ;;  %s683_s2 = inlined_call_operand.hbm [shape: f32[1,256], index: 2, kind: input, shape index: {}]   ;;  %s684_s3 = inlined_call_operand.hbm [shape: f32[32,256], index: 3, kind: input, shape index: {}]   ;;  %s685_s4 = inlined_call_operand.hbm [shape: f32[32,256], index: 4, kind: output, shape index: {}]  }
   0x1   :  { %10 = vsyncpa [#allocation7], 0 }
   0x2   :  { %11 = vsyncpa [#allocation10], 0 }
   0x3   :  { %12 = vsyncpa [#allocation5], 0  ;;  %s563_s15 = smov [#allocation6]   ;;  %s564_s17 = smov [#allocation3]  }
   0x4   :  { %s30_s16 = sshll.u32 %s563_s15, 4  ;;  %s18_s18 = sshll.u32 %s564_s17, 4  ;;  %s31_s16 = int_to_ptr.vmem [resolvable:$true] %s30_s16  ;;  %s595_s18 = int_to_ptr.vmem [resolvable:$true] %s18_s18 }
   0x5   :  { %s445_s21 = scalar_lea.hbm %s682_s1, 8192 }
   0x6   :  { %p446_p0 = scmp.ne.s32.totalorder %s682_s1, %s445_s21  ;;  %p449_p1 = scmp.lt.u32.totalorder %s445_s21, %s682_s1 }
   0x8   :  { %p451_p2 = pnand %p449_p1, %p446_p0 }
   0xa   :  { %454 = shalt.err (!%p451_p2)
}
   0xb   :  { %s455_s26 = scalar_lea.vmem %s31_s16, 8192  ;;  %p460_p4 = scmp.lt.s32.totalorder %s31_s16, %s31_s16 }
   0xc   :  { %p456_p3 = scmp.ne.s32.totalorder %s31_s16, %s455_s26  ;;  %p461_p5 = scmp.lt.s32.totalorder %s455_s26, %s455_s26 }
   0xe   :  { %p462_p6 = por %p461_p5, %p460_p4 }
  0x10   :  { %p463_p7 = pnand %p462_p6, %p456_p3 }
  0x12   :  { %466 = shalt.err (!%p463_p7)
}
  0x13   :  { %s565_s27 = smov 256   ;;  %s566_s28 = smov 16  }
  0x14   :  { %36 = dma.hbm_to_vmem [thread:$0]  %s682_s1, 8192, %s31_s16, [#allocation7], %s565_s27, %s565_s27, %s566_s28  }
  0x15   :  { %s467_s7 = scalar_lea.hbm %s681_s0, 1024 }
  0x16   :  { %p468_p8 = scmp.ne.s32.totalorder %s681_s0, %s467_s7  ;;  %p471_p9 = scmp.lt.u32.totalorder %s467_s7, %s681_s0 }
  0x18   :  { %p473_p10 = pnand %p471_p9, %p468_p8 }
  0x1a   :  { %476 = shalt.err (!%p473_p10)
}
  0x1b   :  { %s477_s12 = scalar_lea.vmem %s595_s18, 1024  ;;  %p482_p12 = scmp.lt.s32.totalorder %s595_s18, %s595_s18 }
  0x1c   :  { %p478_p11 = scmp.ne.s32.totalorder %s595_s18, %s477_s12  ;;  %p483_p13 = scmp.lt.s32.totalorder %s477_s12, %s477_s12 }
  0x1e   :  { %p484_p0 = por %p483_p13, %p482_p12 }
  0x20   :  { %p485_p1 = pnand %p484_p0, %p478_p11 }
  0x22   :  { %488 = shalt.err (!%p485_p1)
}
  0x23   :  { %24 = dma.hbm_to_vmem [thread:$0]  %s681_s0, 1024, %s595_s18, [#allocation4], %s565_s27, %s565_s27, %s566_s28  }
  0x24   :  { %s567_s14 = smov [#allocation8]   ;;  %s568_s16 = smov [#allocation9]  }
  0x25   :  { %s43_s15 = sshll.u32 %s567_s14, 4  ;;  %s52_s17 = sshll.u32 %s568_s16, 4  ;;  %s44_s15 = int_to_ptr.vmem [resolvable:$true] %s43_s15  ;;  %s632_s17 = int_to_ptr.vmem [resolvable:$true] %s52_s17 }
  0x26   :  { %s489_s21 = scalar_lea.hbm %s683_s2, 32 }
  0x27   :  { %p490_p2 = scmp.ne.s32.totalorder %s683_s2, %s489_s21  ;;  %p493_p3 = scmp.lt.u32.totalorder %s489_s21, %s683_s2 }
  0x29   :  { %p495_p4 = pnand %p493_p3, %p490_p2 }
  0x2b   :  { %498 = shalt.err (!%p495_p4)
}
  0x2c   :  { %s499_s0 = scalar_lea.vmem %s44_s15, 32  ;;  %p504_p6 = scmp.lt.s32.totalorder %s44_s15, %s44_s15 }
  0x2d   :  { %p500_p5 = scmp.ne.s32.totalorder %s44_s15, %s499_s0  ;;  %p505_p7 = scmp.lt.s32.totalorder %s499_s0, %s499_s0 }
  0x2f   :  { %p506_p8 = por %p505_p7, %p504_p6 }
  0x31   :  { %p507_p9 = pnand %p506_p8, %p500_p5 }
  0x33   :  { %510 = shalt.err (!%p507_p9)
}
  0x34   :  { %46 = dma.hbm_to_vmem [thread:$0]  %s683_s2, 32, %s44_s15, [#allocation7]  }
  0x35   :  { %s511_s5 = scalar_lea.hbm %s684_s3, 1024 }
  0x36   :  { %p512_p10 = scmp.ne.s32.totalorder %s684_s3, %s511_s5  ;;  %p515_p11 = scmp.lt.u32.totalorder %s511_s5, %s684_s3 }
  0x38   :  { %p517_p12 = pnand %p515_p11, %p512_p10 }
  0x3a   :  { %520 = shalt.err (!%p517_p12)
}
  0x3b   :  { %s521_s10 = scalar_lea.vmem %s632_s17, 1024  ;;  %p526_p0 = scmp.lt.s32.totalorder %s632_s17, %s632_s17 }
  0x3c   :  { %p522_p13 = scmp.ne.s32.totalorder %s632_s17, %s521_s10  ;;  %p527_p1 = scmp.lt.s32.totalorder %s521_s10, %s521_s10 }
  0x3e   :  { %p528_p2 = por %p527_p1, %p526_p0 }
  0x40   :  { %p529_p3 = pnand %p528_p2, %p522_p13 }
  0x42   :  { %532 = shalt.err (!%p529_p3)
}
  0x43   :  { %58 = dma.hbm_to_vmem [thread:$0]  %s684_s3, 1024, %s632_s17, [#allocation10], %s565_s27, %s565_s27, %s566_s28  }
  0x44   :  { %555 = dma.done.wait [#allocation4], 1024  }
  0x45   :  { %556 = vsyncadd [#allocation4], 4294966272 }
  0x46   :  { %557 = dma.done.wait [#allocation7], 8224  }
  0x47   :  { %558 = vsyncadd [#allocation7], 4294959072 }
  0x48   :  { %559 = dma.done.wait [#allocation10], 1024  }
  0x49   :  { %560 = vsyncadd [#allocation10], 4294966272  ;;  %v100_v0 = vld [vmem:[#allocation6 + $0x8] sm:$0xff]  ;;  %v102_v1 = vld [vmem:[#allocation6 + $0x18] sm:$0xff]  ;;  %s569_s3 = smov [#allocation11]  }
  0x4a   :  { %v99_v2 = vld [vmem:[#allocation6] sm:$0xff]  ;;  %v342_v3 = vpack.c.bf16 %v102_v1, %v100_v0  ;;  %v101_v4 = vld [vmem:[#allocation6 + $0x10] sm:$0xff]  ;;  %v104_v5 = vld [vmem:[#allocation6 + $0x28] sm:$0xff]  ;;  %s328_s12 = sshll.u32 %s569_s3, 4  ;;  %s329_s12 = int_to_ptr.vmem [resolvable:$true] %s328_s12 }
  0x4b   :  { %v106_v6 = vld [vmem:[#allocation6 + $0x38] sm:$0xff]  ;;  %v344_v7 = vpack.c.bf16 %v101_v4, %v99_v2  ;;  %v103_v9 = vld [vmem:[#allocation6 + $0x20] sm:$0xff]  ;;  %v105_v10 = vld [vmem:[#allocation6 + $0x30] sm:$0xff]  ;;  %s533_s1 = scalar_lea.vmem %s329_s12, 1024  ;;  %p538_p5 = scmp.lt.s32.totalorder %s329_s12, %s329_s12 }
  0x4c   :  { %v346_v8 = vpack.c.bf16 %v106_v6, %v104_v5  ;;  %v108_v11 = vld [vmem:[#allocation6 + $0x48] sm:$0xff]  ;;  %343 = vmatprep.subr.bf16.mxu0 %v342_v3  ;;  %406 = vmatprep.subr.bf16.mxu1 %v342_v3  ;;  %v110_v12 = vld [vmem:[#allocation6 + $0x58] sm:$0xff]  ;;  %v348_v13 = vpack.c.bf16 %v105_v10, %v103_v9  ;;  %v107_v15 = vld [vmem:[#allocation6 + $0x40] sm:$0xff]  ;;  %p534_p4 = scmp.ne.s32.totalorder %s329_s12, %s533_s1  ;;  %p539_p6 = scmp.lt.s32.totalorder %s533_s1, %s533_s1 }
  0x4d   :  { %345 = vmatpush1.bf16.msra.mxu0 %v344_v7  ;;  %422 = vmatpush1.bf16.msra.mxu1 %v344_v7  ;;  %v350_v14 = vpack.c.bf16 %v110_v12, %v108_v11  ;;  %v109_v16 = vld [vmem:[#allocation6 + $0x50] sm:$0xff]  ;;  %v112_v17 = vld [vmem:[#allocation6 + $0x68] sm:$0xff]  ;;  %v114_v18 = vld [vmem:[#allocation6 + $0x78] sm:$0xff] }
  0x4e   :  { %347 = vmatprep.subr.bf16.mxu0 %v346_v8  ;;  %407 = vmatprep.subr.bf16.mxu1 %v346_v8  ;;  %v352_v19 = vpack.c.bf16 %v109_v16, %v107_v15  ;;  %v354_v20 = vpack.c.bf16 %v114_v18, %v112_v17  ;;  %v111_v21 = vld [vmem:[#allocation6 + $0x60] sm:$0xff]  ;;  %v113_v22 = vld [vmem:[#allocation6 + $0x70] sm:$0xff]  ;;  %v116_v23 = vld [vmem:[#allocation6 + $0x88] sm:$0xff]  ;;  %p540_p7 = por %p539_p6, %p538_p5 }
  0x4f   :  { %v118_v24 = vld [vmem:[#allocation6 + $0x98] sm:$0xff]  ;;  %v356_v25 = vpack.c.bf16 %v113_v22, %v111_v21  ;;  %v115_v27 = vld [vmem:[#allocation6 + $0x80] sm:$0xff]  ;;  %v117_v28 = vld [vmem:[#allocation6 + $0x90] sm:$0xff] }
  0x50   :  { %v358_v26 = vpack.c.bf16 %v118_v24, %v116_v23  ;;  %v120_v29 = vld [vmem:[#allocation6 + $0xa8] sm:$0xff]  ;;  %v122_v30 = vld [vmem:[#allocation6 + $0xb8] sm:$0xff]  ;;  %v360_v31 = vpack.c.bf16 %v117_v28, %v115_v27  ;;  %v119_v33 = vld [vmem:[#allocation6 + $0xa0] sm:$0xff]  ;;  %p541_p8 = pnand %p540_p7, %p534_p4 }
  0x51   :  { %349 = vmatpush1.bf16.msra.mxu0 %v348_v13  ;;  %423 = vmatpush1.bf16.msra.mxu1 %v348_v13  ;;  %v362_v32 = vpack.c.bf16 %v122_v30, %v120_v29  ;;  %v121_v34 = vld [vmem:[#allocation6 + $0xb0] sm:$0xff]  ;;  %v124_v35 = vld [vmem:[#allocation6 + $0xc8] sm:$0xff]  ;;  %v126_v36 = vld [vmem:[#allocation6 + $0xd8] sm:$0xff] }
  0x52   :  { %351 = vmatprep.subr.bf16.mxu0 %v350_v14  ;;  %408 = vmatprep.subr.bf16.mxu1 %v350_v14  ;;  %v364_v37 = vpack.c.bf16 %v121_v34, %v119_v33  ;;  %v123_v38 = vld [vmem:[#allocation6 + $0xc0] sm:$0xff]  ;;  %v366_v39 = vpack.c.bf16 %v126_v36, %v124_v35  ;;  %v125_v40 = vld [vmem:[#allocation6 + $0xd0] sm:$0xff]  ;;  %v84_v41 = vld [vmem:[#allocation3 + $0x8] sm:$0xff] }
  0x53   :  { %v88_v42 = vld [vmem:[#allocation3 + $0x28] sm:$0xff]  ;;  %v130_v44 = vld [vmem:[#allocation6 + $0xf8] sm:$0xff]  ;;  %227 = vmatprep.mubr.f32.mxu0 %v84_v41  ;;  %v368_v45 = vpack.c.bf16 %v125_v40, %v123_v38  ;;  %v127_v47 = vld [vmem:[#allocation6 + $0xe0] sm:$0xff]  ;;  %v281_v40 = vlaneseq }
  0x54   :  { %v128_v43 = vld [vmem:[#allocation6 + $0xe8] sm:$0xff]  ;;  %239 = vmatprep.mubr.f32.mxu1 %v88_v42  ;;  %v129_v48 = vld [vmem:[#allocation6 + $0xf0] sm:$0xff]  ;;  %v134_v50 = vld [vmem:[#allocation6 + $0x118] sm:$0xff] }
  0x55   :  { %353 = vmatpush1.bf16.msra.mxu0 %v352_v19  ;;  %424 = vmatpush1.bf16.msra.mxu1 %v352_v19  ;;  %v370_v46 = vpack.c.bf16 %v130_v44, %v128_v43  ;;  %v132_v49 = vld [vmem:[#allocation6 + $0x108] sm:$0xff]  ;;  %v372_v51 = vpack.c.bf16 %v129_v48, %v127_v47  ;;  %v131_v53 = vld [vmem:[#allocation6 + $0x100] sm:$0xff]  ;;  %v133_v54 = vld [vmem:[#allocation6 + $0x110] sm:$0xff]  ;;  %v282_v41 = vshrl.u32 %v281_v40, 7 }
  0x56   :  { %355 = vmatprep.subr.bf16.mxu0 %v354_v20  ;;  %409 = vmatprep.subr.bf16.mxu1 %v354_v20  ;;  %v374_v52 = vpack.c.bf16 %v134_v50, %v132_v49  ;;  %v136_v55 = vld [vmem:[#allocation6 + $0x128] sm:$0xff]  ;;  %v138_v56 = vld [vmem:[#allocation6 + $0x138] sm:$0xff]  ;;  %v376_v57 = vpack.c.bf16 %v133_v54, %v131_v53  ;;  %v135_v59 = vld [vmem:[#allocation6 + $0x120] sm:$0xff] }
  0x57   :  { %v378_v58 = vpack.c.bf16 %v138_v56, %v136_v55  ;;  %v137_v60 = vld [vmem:[#allocation6 + $0x130] sm:$0xff]  ;;  %v140_v61 = vld [vmem:[#allocation6 + $0x148] sm:$0xff]  ;;  %v142_v62 = vld [vmem:[#allocation6 + $0x158] sm:$0xff]  ;;  %v283_v42 = vsub.s32 0, %v282_v41  ;;  %v287_v44 = vsub.s32 1, %v282_v41 }
  0x58   :  { %v380_v63 = vpack.c.bf16 %v137_v60, %v135_v59  ;;  %v382_v0 = vpack.c.bf16 %v142_v62, %v140_v61  ;;  %v139_v1 = vld [vmem:[#allocation6 + $0x140] sm:$0xff]  ;;  %v141_v2 = vld [vmem:[#allocation6 + $0x150] sm:$0xff]  ;;  %v144_v3 = vld [vmem:[#allocation6 + $0x168] sm:$0xff] }
  0x59   :  { %357 = vmatpush1.bf16.msra.mxu0 %v356_v25  ;;  %425 = vmatpush1.bf16.msra.mxu1 %v356_v25  ;;  %v146_v4 = vld [vmem:[#allocation6 + $0x178] sm:$0xff]  ;;  %v384_v5 = vpack.c.bf16 %v141_v2, %v139_v1  ;;  %v143_v7 = vld [vmem:[#allocation6 + $0x160] sm:$0xff]  ;;  %v145_v8 = vld [vmem:[#allocation6 + $0x170] sm:$0xff] }
  0x5a   :  { %359 = vmatprep.subr.bf16.mxu0 %v358_v26  ;;  %410 = vmatprep.subr.bf16.mxu1 %v358_v26  ;;  %v386_v6 = vpack.c.bf16 %v146_v4, %v144_v3  ;;  %v148_v9 = vld [vmem:[#allocation6 + $0x188] sm:$0xff]  ;;  %v150_v10 = vld [vmem:[#allocation6 + $0x198] sm:$0xff]  ;;  %v388_v11 = vpack.c.bf16 %v145_v8, %v143_v7  ;;  %v147_v13 = vld [vmem:[#allocation6 + $0x180] sm:$0xff] }
  0x5b   :  { %v390_v12 = vpack.c.bf16 %v150_v10, %v148_v9  ;;  %v149_v14 = vld [vmem:[#allocation6 + $0x190] sm:$0xff]  ;;  %v152_v15 = vld [vmem:[#allocation6 + $0x1a8] sm:$0xff]  ;;  %v154_v16 = vld [vmem:[#allocation6 + $0x1b8] sm:$0xff] }
  0x5c   :  { %v392_v17 = vpack.c.bf16 %v149_v14, %v147_v13  ;;  %v394_v18 = vpack.c.bf16 %v154_v16, %v152_v15  ;;  %v151_v19 = vld [vmem:[#allocation6 + $0x1a0] sm:$0xff]  ;;  %v153_v20 = vld [vmem:[#allocation6 + $0x1b0] sm:$0xff]  ;;  %v156_v21 = vld [vmem:[#allocation6 + $0x1c8] sm:$0xff] }
  0x5d   :  { %361 = vmatpush1.bf16.msra.mxu0 %v360_v31  ;;  %426 = vmatpush1.bf16.msra.mxu1 %v360_v31  ;;  %v158_v22 = vld [vmem:[#allocation6 + $0x1d8] sm:$0xff]  ;;  %v396_v23 = vpack.c.bf16 %v153_v20, %v151_v19  ;;  %v155_v25 = vld [vmem:[#allocation6 + $0x1c0] sm:$0xff]  ;;  %v157_v26 = vld [vmem:[#allocation6 + $0x1d0] sm:$0xff] }
  0x5e   :  { %363 = vmatprep.subr.bf16.mxu0 %v362_v32  ;;  %411 = vmatprep.subr.bf16.mxu1 %v362_v32  ;;  %v398_v24 = vpack.c.bf16 %v158_v22, %v156_v21  ;;  %v160_v27 = vld [vmem:[#allocation6 + $0x1e8] sm:$0xff]  ;;  %v162_v28 = vld [vmem:[#allocation6 + $0x1f8] sm:$0xff]  ;;  %v400_v29 = vpack.c.bf16 %v157_v26, %v155_v25  ;;  %v159_v31 = vld [vmem:[#allocation6 + $0x1e0] sm:$0xff] }
  0x5f   :  { %v402_v30 = vpack.c.bf16 %v162_v28, %v160_v27  ;;  %v161_v32 = vld [vmem:[#allocation6 + $0x1f0] sm:$0xff]  ;;  %v83_v34 = vld [vmem:[#allocation3] sm:$0xff]  ;;  %v86_v36 = vld [vmem:[#allocation3 + $0x18] sm:$0xff] }
  0x60   :  { %v404_v33 = vpack.c.bf16 %v161_v32, %v159_v31  ;;  %v87_v35 = vld [vmem:[#allocation3 + $0x20] sm:$0xff]  ;;  %v85_v38 = vld [vmem:[#allocation3 + $0x10] sm:$0xff] }
  0x61   :  { %365 = vmatpush1.bf16.msra.mxu0 %v364_v37  ;;  %427 = vmatpush1.bf16.msra.mxu1 %v364_v37  ;;  %v90_v37 = vld [vmem:[#allocation3 + $0x38] sm:$0xff]  ;;  %v279_v43 = vld [vmem:[#allocation8] sm:$0x3]  ;;  %v299_v48 = vld [vmem:[#allocation9] sm:$0xff] }
  0x62   :  { %367 = vmatprep.subr.bf16.mxu0 %v366_v39  ;;  %412 = vmatprep.subr.bf16.mxu1 %v366_v39  ;;  %v89_v39 = vld [vmem:[#allocation3 + $0x30] sm:$0xff]  ;;  %v303_v50 = vld [vmem:[#allocation9 + $0x20] sm:$0xff]  ;;  %v306_v8 = vld [vmem:[#allocation9 + $0x38] sm:$0xff] }
  0x63   :  { %v300_v54 = vld [vmem:[#allocation9 + $0x8] sm:$0xff]  ;;  %v305_v2 = vld [vmem:[#allocation9 + $0x30] sm:$0xff] }
  0x64   :  { %v304_v56 = vld [vmem:[#allocation9 + $0x28] sm:$0xff] }
  0x65   :  { %369 = vmatpush1.bf16.msra.mxu0 %v368_v45  ;;  %428 = vmatpush1.bf16.msra.mxu1 %v368_v45  ;;  %v284_v45 = vrot.slane %v279_v43, %v283_v42 }
  0x66   :  { %371 = vmatprep.subr.bf16.mxu0 %v370_v46  ;;  %413 = vmatprep.subr.bf16.mxu1 %v370_v46  ;;  %v288_v46 = vrot.slane %v279_v43, %v287_v44 }
  0x69   :  { %373 = vmatpush1.bf16.msra.mxu0 %v372_v51  ;;  %429 = vmatpush1.bf16.msra.mxu1 %v372_v51 }
  0x6a   :  { %375 = vmatprep.subr.bf16.mxu0 %v374_v52  ;;  %414 = vmatprep.subr.bf16.mxu1 %v374_v52 }
  0x6d   :  { %377 = vmatpush1.bf16.msra.mxu0 %v376_v57  ;;  %430 = vmatpush1.bf16.msra.mxu1 %v376_v57 }
  0x6e   :  { %379 = vmatprep.subr.bf16.mxu0 %v378_v58  ;;  %415 = vmatprep.subr.bf16.mxu1 %v378_v58 }
  0x71   :  { %381 = vmatpush1.bf16.msra.mxu0 %v380_v63  ;;  %431 = vmatpush1.bf16.msra.mxu1 %v380_v63 }
  0x72   :  { %383 = vmatprep.subr.bf16.mxu0 %v382_v0  ;;  %416 = vmatprep.subr.bf16.mxu1 %v382_v0  ;;  %v301_v0 = vld [vmem:[#allocation9 + $0x10] sm:$0xff] }
  0x75   :  { %385 = vmatpush1.bf16.msra.mxu0 %v384_v5  ;;  %432 = vmatpush1.bf16.msra.mxu1 %v384_v5 }
  0x76   :  { %387 = vmatprep.subr.bf16.mxu0 %v386_v6  ;;  %417 = vmatprep.subr.bf16.mxu1 %v386_v6  ;;  %v302_v6 = vld [vmem:[#allocation9 + $0x18] sm:$0xff] }
  0x79   :  { %389 = vmatpush1.bf16.msra.mxu0 %v388_v11  ;;  %433 = vmatpush1.bf16.msra.mxu1 %v388_v11 }
  0x7a   :  { %391 = vmatprep.subr.bf16.mxu0 %v390_v12  ;;  %418 = vmatprep.subr.bf16.mxu1 %v390_v12 }
  0x7d   :  { %393 = vmatpush1.bf16.msra.mxu0 %v392_v17  ;;  %434 = vmatpush1.bf16.msra.mxu1 %v392_v17 }
  0x7e   :  { %395 = vmatprep.subr.bf16.mxu0 %v394_v18  ;;  %419 = vmatprep.subr.bf16.mxu1 %v394_v18 }
  0x81   :  { %397 = vmatpush1.bf16.msra.mxu0 %v396_v23  ;;  %435 = vmatpush1.bf16.msra.mxu1 %v396_v23 }
  0x82   :  { %399 = vmatprep.subr.bf16.mxu0 %v398_v24  ;;  %420 = vmatprep.subr.bf16.mxu1 %v398_v24 }
  0x85   :  { %401 = vmatpush1.bf16.msra.mxu0 %v400_v29  ;;  %436 = vmatpush1.bf16.msra.mxu1 %v400_v29 }
  0x86   :  { %403 = vmatprep.subr.bf16.mxu0 %v402_v30  ;;  %421 = vmatprep.subr.bf16.mxu1 %v402_v30 }
  0x89   :  { %405 = vmatpush1.bf16.msra.mxu0 %v404_v33  ;;  %437 = vmatpush1.bf16.msra.mxu1 %v404_v33 }
  0x8c   :  { %228 = vmatmul.mubr.f32.vlgmr.msra.gmra.mrb[0].mxu0 %v83_v34  ;;  %240 = vmatmul.mubr.f32.vlgmr.msra.gmra.mrb[0].mxu1 %v87_v35 }
  0x8d   :  { %233 = vmatprep.mubr.f32.mxu0 %v86_v36  ;;  %245 = vmatprep.mubr.f32.mxu1 %v90_v37 }
  0x90   :  { %234 = vmatmul.mubr.f32.gmra.mrb[2].mxu0 %v85_v38  ;;  %246 = vmatmul.mubr.f32.gmra.mrb[2].mxu1 %v89_v39 }
 0x15f   :  { %v229_v47 = vpop.f32.mrb[0].mxu0  ;;  %v241_v49 = vpop.f32.mrb[0].mxu1 }
 0x160   :  { %v291_v51 = vadd.f32 %v284_v45, %v229_v47  ;;  %v295_v52 = vadd.f32 %v284_v45, %v241_v49  ;;  %v231_v53 = vpop.f32.mrb[1].mxu0  ;;  %v243_v55 = vpop.f32.mrb[1].mxu1 }
 0x161   :  { %v292_v57 = vadd.f32 %v288_v46, %v231_v53  ;;  %v296_v58 = vadd.f32 %v288_v46, %v243_v55 }
 0x162   :  { %v307_v59 = vadd.f32 %v299_v48, %v291_v51  ;;  %v311_v60 = vadd.f32 %v303_v50, %v295_v52 }
 0x163   :  { %v308_v61 = vadd.f32 %v300_v54, %v292_v57  ;;  %v312_v62 = vadd.f32 %v304_v56, %v296_v58  ;;  %v235_v63 = vpop.f32.mrb[2].mxu0  ;;  %v247_v1 = vpop.f32.mrb[2].mxu1 }
 0x164   :  { %315 = vst [vmem:[#allocation11] sm:$0xff] %v307_v59  ;;  %319 = vst [vmem:[#allocation11 + $0x20] sm:$0xff] %v311_v60  ;;  %v293_v3 = vadd.f32 %v284_v45, %v235_v63  ;;  %v297_v4 = vadd.f32 %v284_v45, %v247_v1  ;;  %v237_v5 = vpop.f32.mrb[3].mxu0  ;;  %v249_v7 = vpop.f32.mrb[3].mxu1 }
 0x165   :  { %316 = vst [vmem:[#allocation11 + $0x8] sm:$0xff] %v308_v61  ;;  %320 = vst [vmem:[#allocation11 + $0x28] sm:$0xff] %v312_v62  ;;  %v294_v9 = vadd.f32 %v288_v46, %v237_v5  ;;  %v298_v10 = vadd.f32 %v288_v46, %v249_v7 }
 0x166   :  { %v309_v11 = vadd.f32 %v301_v0, %v293_v3  ;;  %v313_v12 = vadd.f32 %v305_v2, %v297_v4 }
 0x167   :  { %v310_v13 = vadd.f32 %v302_v6, %v294_v9  ;;  %v314_v14 = vadd.f32 %v306_v8, %v298_v10 }
 0x168   :  { %317 = vst [vmem:[#allocation11 + $0x10] sm:$0xff] %v309_v11  ;;  %321 = vst [vmem:[#allocation11 + $0x30] sm:$0xff] %v313_v12 }
 0x169   :  { %318 = vst [vmem:[#allocation11 + $0x18] sm:$0xff] %v310_v13  ;;  %322 = vst [vmem:[#allocation11 + $0x38] sm:$0xff] %v314_v14 }
 0x16a   :  { %544 = shalt.err (!%p541_p8)
}
 0x16b   :  { %s545_s15 = scalar_lea.hbm %s685_s4, 1024 }
 0x16c   :  { %p546_p9 = scmp.ne.s32.totalorder %s685_s4, %s545_s15  ;;  %p549_p10 = scmp.lt.u32.totalorder %s545_s15, %s685_s4 }
 0x16e   :  { %p551_p11 = pnand %p549_p10, %p546_p9 }
 0x170   :  { %554 = shalt.err (!%p551_p11)
}
 0x171   :  { %334 = dma.vmem_to_hbm [thread:$0]  %s329_s12, 1024, %s685_s4, [#allocation5], %s565_s27, %s565_s27, %s566_s28  }
 0x172   :  { %561 = dma.done.wait [#allocation5], 1024  }
 0x173   :  { %562 = vsyncadd [#allocation5], 4294966272 }
 0x174   :  { %338 = vsyncpa [#allocation4], 1 }
 0x175   :  { %339 = vsyncpa [#allocation7], 1 }
 0x176   :  { %340 = vsyncpa [#allocation10], 1 }
 0x177   :  { %341 = vsyncpa [#allocation5], 1 }

// kernel: gpt_forward.10
= control target key start
LH: loop header
LB: loop body
LE: loop exit
PB: predicated region body
PF: predicated region fallthrough
CT: control target
= control target key end

     0   :  { %s1810_s0 = inlined_call_operand.hbm [shape: f32[2,16,768], index: 0, kind: input, shape index: {}, may-alias: {0,1,2}]   ;;  %s1811_s1 = inlined_call_operand.hbm [shape: f32[2,16,768], index: 1, kind: input, shape index: {}, may-alias: {0,1,2}]   ;;  %s1812_s2 = inlined_call_operand.hbm [shape: f32[2,16,768], index: 2, kind: input, shape index: {}, may-alias: {0,1,2}]   ;;  %s1813_s3 = inlined_call_operand.hbm [shape: f32[2,16,256], index: 3, kind: output, shape index: {}]  }
   0x1   :  { %1830 = sst [smem:[#allocation26_spill]] %s1811_s1 }
   0x2   :  { %1831 = sst [smem:[#allocation27_spill]] %s1813_s3 }
   0x3   :  { %8 = vsyncpa [#allocation6], 0 }
   0x4   :  { %10 = vsyncpa [#allocation6 + $0x1], 0 }
   0x5   :  { %11 = vsyncpa [#allocation9], 0 }
   0x6   :  { %13 = vsyncpa [#allocation9 + $0x1], 0 }
   0x7   :  { %14 = vsyncpa [#allocation7], 0 }
   0x8   :  { %16 = vsyncpa [#allocation7 + $0x1], 0  ;;  %s1398_s12 = smov 0   ;;  %s1400_s13 = smov 0  }
   0x9   :  { %s1402_s14 = smov 0   ;;  %s1404_s15 = smov 0  }
   0xa   :  { %s1406_s16 = smov 0   ;;  %s1408_s17 = smov 0  }
   0xb   :  { %s1410_s18 = smov 0   ;;  %s1412_s19 = smov 0  }
   0xc   :  { %s1414_s20 = smov 0   ;;  %s1416_s21 = smov 0  }
   0xd   :  { %s1418_s22 = smov 0   ;;  %s1420_s23 = smov 0  }
   0xe   :  { %s1422_s24 = smov 0  }
   0xf LB: > { %1832 = sst [smem:[#allocation15_spill]] %s1338_s17  ;;  %s1464_s25 = sadd.s32 4294967295, %s1366_s24   ;;  %s1366_s24 = sphi %s1422_s24, %s22_s24   ;;  %s1362_s23 = sphi %s1420_s23, %s1890_s23   ;;  %s1358_s22 = sphi %s1418_s22, %s1882_s22   ;;  %s1354_s21 = sphi %s1416_s21, %s1881_s21   ;;  %s1350_s20 = sphi %s1414_s20, %s1889_s20   ;;  %s1346_s19 = sphi %s1412_s19, %s1880_s19   ;;  %s1342_s18 = sphi %s1410_s18, %s1879_s18   ;;  %s1338_s17 = sphi %s1408_s17, %s1878_s17   ;;  %s1334_s16 = sphi %s1406_s16, %s1888_s16   ;;  %s1330_s15 = sphi %s1404_s15, %s1887_s15   ;;  %s1326_s14 = sphi %s1402_s14, %s1886_s14   ;;  %s1322_s13 = sphi %s1400_s13, %s1885_s13   ;;  %s1318_s12 = sphi %s1398_s12, %s1884_s12  }
  0x10   : > { %1833 = sst [smem:[#allocation16_spill]] %s1342_s18  ;;  %s34_s26 = sadd.s32 1, %s1354_s21 }
  0x11   : > { %1834 = sst [smem:[#allocation17_spill]] %s1346_s19  ;;  %p35_p0 = scmp.ge.s32.totalorder %s34_s26, 2 }
  0x12   : > { %1835 = sst [smem:[#allocation18_spill]] %s1350_s20  ;;  %s37_s27 = sadd.s32 1, %s1358_s22 }
  0x13   : > { %1836 = sst [smem:[#allocation19_spill]] %s1354_s21  ;;  %s41_s28 = sadd.s32 1, %s1362_s23 }
  0x14   : > { %1837 = sst [smem:[#allocation20_spill]] %s1358_s22  ;;  %p1823_p1 = scmp.eq.s32.totalorder %s1366_s24, 0 }
  0x15   : > { %s1892_s26 = smov (%p35_p0, %s34_s26), 0  ;;  %s1894_s27 = smov (!%p35_p0, %s37_s27), %s1358_s22 }
  0x16   : > { %1838 = sst [smem:[#allocation21_spill]] %s1892_s26  ;;  %p1822_p2 = scmp.eq.s32.totalorder %s1464_s25, 0 }
  0x17   : > { %s918_s29 = sadd.s32 4294967295, %s1358_s22  ;;  %p39_p3 = scmp.ge.s32.totalorder %s1894_s27, 2 }
  0x18   : > { %s74_s30 = sadd.s32 %s1354_s21, %s918_s29  ;;  %s86_s4 = sadd.s32 1, %s1326_s14 }
  0x19   : > { %p75_p4 = scmp.gt.s32.totalorder %s74_s30, 0  ;;  %s1896_s27 = smov (%p39_p3, %s1894_s27), 0 }
  0x1a   : > { %1839 = sst [smem:[#allocation22_spill]] %s1896_s27  ;;  %s1898_s28 = smov (!%p39_p3, %s41_s28), %s1362_s23 }
  0x1b   : > { %s46_s5 = ssub.s32 %s1358_s22, %s1896_s27  ;;  %s919_s6 = sadd.s32 4294967295, %s1896_s27 }
  0x1c   : > { %p43_p5 = scmp.ge.s32.totalorder %s1898_s28, 2  ;;  %s78_s7 = sadd.s32 %s919_s6, %s1892_s26 }
  0x1d   : > { %s1900_s30 = smov (!%p75_p4, %s74_s30), 0  ;;  %p79_p6 = scmp.gt.s32.totalorder %s78_s7, 0 }
  0x1e   : > { %s1902_s28 = smov (%p43_p5, %s1898_s28), 0  ;;  %p93_p7 = scmp.ne.s32.totalorder %s1326_s14, %s1322_s13 }
  0x1f   : > { %1840 = sst [smem:[#allocation23_spill]] %s1902_s28  ;;  %s45_s8 = ssub.s32 %s1362_s23, %s1902_s28 }
  0x20   : > { %p99_p8 = scmp.ne.s32.totalorder %s1322_s13, %s1318_s12  ;;  %s1492_s9 = sor.u32 %s46_s5, %s45_s8 }
  0x21   : > { %p1496_p9 = por %p93_p7, %p1823_p1  ;;  %s1904_s7 = smov (!%p79_p6, %s78_s7), 0 }
  0x22   : > { %p1503_p11 = por %p99_p8, %p1822_p2  ;;  %p1821_p12 = scmp.lt.s32.totalorder %s1366_s24, 8 }
  0x23   : > { %s82_s29 = ssub.s32 %s1900_s30, %s1904_s7  ;;  %s982_s12 = smul.u32 12, %s1362_s23 }
  0x24   : > { %s1842_s11 = scalar_select %p1503_p11, 1, 0 }
  0x25   : > { %s83_s5 = sor.u32 %s82_s29, %s45_s8  ;;  %s208_s6 = sand.u32 1, %s1366_s24  }
  0x26   : > { %1843 = sst [smem:[#allocation24_spill]] %s1842_s11  ;;  %p84_p13 = scmp.eq.s32.totalorder %s83_s5, 0 }
  0x27   : > { %s210_s28 = sand.u32 1, %s1326_s14   ;;  %s810_s27 = smul.u32 6, %s1900_s30 }
  0x28   : > { %s1512_s26 = scalar_select %p84_p13, %s1326_s14, %s86_s4  }
  0x29   : > { %s1514_s21 = sshll.u32 %s210_s28, 4  ;;  %s812_s3 = sadd.s32 %s982_s12, %s810_s27 }
  0x2a   : > { %s928_s20 = sshll.u32 %s812_s3, 7  ;;  %s1844_s1 = sld [smem:[#allocation26_spill]] }
  0x2b   : > { %s212_s11 = scalar_lea.vmem [#allocation8], %s1514_s21  ;;  %p1530_p0 = pnand %p1821_p12, %p1496_p9 }
  0x2c   : > { %s227_s8 = sshll.u32 %s212_s11, 4  ;;  %s1537_s19 = scalar_lea.hbm %s1812_s2, %s928_s20  ;;  %s1524_s8 = int_to_ptr.vmem [resolvable:$true] %s227_s8 }
  0x2d   : > { %s1541_s30 = scalar_lea.sflag [#allocation9], %s208_s6  ;;  %p1824_p6 = pneg %p1530_p0 }
  0x30   : > { %s814_s18 = scalar_lea.hbm %s1844_s1, %s928_s20  ;;  %s1137_s5 = scalar_lea.hbm %s1844_s1, 3072 }
  0x31   : > { %s1522_s29 = scalar_lea.hbm %s814_s18, 256  ;;  %s1162_s4 = scalar_lea.hbm %s814_s18, 512 }
  0x32   : > { %p1133_p5 = scmp.ne.s32.totalorder %s1522_s29, %s1162_s4  ;;  %p1138_p9 = scmp.lt.u32.totalorder %s1522_s29, %s1844_s1 }
  0x33   : > { %p1139_p13 = scmp.lt.u32.totalorder %s1137_s5, %s1162_s4  ;;  %p1141_p2 = scmp.lt.u32.totalorder %s1162_s4, %s1522_s29 }
  0x34   : > { %p1135_p7 = pnand %p1824_p6, %p1133_p5 }
  0x35   : > { %p1140_p12 = por %p1139_p13, %p1138_p9 }
  0x36   : > { %p1136_p8 = pneg %p1135_p7 }
  0x37   : > { %p1142_p1 = por %p1141_p2, %p1140_p12 }
  0x39   : > { %p1143_p10 = pnand %p1142_p1, %p1136_p8 }
  0x3b   : > { %1146 = shalt.err (!%p1143_p10)
}
  0x3c   : > { %s1147_s18 = scalar_lea.vmem %s1524_s8, 256  ;;  %s1368_s20 = smov [#allocation8]  }
  0x3d   : > { %p1148_p5 = scmp.ne.s32.totalorder %s1524_s8, %s1147_s18  ;;  %s1152_s6 = sshll.u32 %s1368_s20, 4  ;;  %s1153_s6 = int_to_ptr.vmem [resolvable:$false] %s1152_s6 }
  0x3e   : > { %s1154_s27 = scalar_lea.vmem %s1153_s6, 512  ;;  %p1155_p4 = scmp.lt.s32.totalorder %s1524_s8, %s1153_s6 }
  0x3f   : > { %p1150_p7 = pnand %p1148_p5, %p1824_p6  ;;  %p1156_p9 = scmp.lt.s32.totalorder %s1154_s27, %s1147_s18 }
  0x41   : > { %p1151_p3 = pneg %p1150_p7  ;;  %p1157_p13 = por %p1156_p9, %p1155_p4 }
  0x43   : > { %p1158_p2 = pnand %p1157_p13, %p1151_p3 }
  0x45   : > { %1161 = shalt.err (!%p1158_p2)
}
  0x46   : > { %997 = dma.hbm_to_vmem [thread:$0]  (!%p1530_p0), %s1522_s29, 256, %s1524_s8, %s1541_s30  }
  0x47   : > { %p1846_p1 = scmp.lt.s32.totalorder %s1366_s24, 9  ;;  %p1847_p10 = scmp.ge.s32.totalorder %s1366_s24, 1 }
  0x48   : > { %s917_s10 = sadd.s32 4294967294, %s1366_s24   ;;  %s50_s11 = sadd.s32 1, %s1338_s17 }
  0x49   : > { %p1572_p12 = pnand %p1847_p10, %p1846_p1  ;;  %p57_p3 = scmp.ne.s32.totalorder %s1338_s17, %s1334_s16 }
  0x4a   : > { %p1849_p4 = scmp.eq.s32.totalorder %s1492_s9, 0  ;;  %p1851_p8 = scmp.eq.s32.totalorder %s1366_s24, 0 }
  0x4b   : > { %s1848_s4 = scalar_select %p1572_p12, 1, 0 }
  0x4c   : > { %s1583_s5 = scalar_select %p1849_p4, %s1338_s17, %s50_s11  }
  0x4d   : > { %p59_p5 = por %p1851_p8, %p57_p3  ;;  %p63_p7 = scmp.ne.s32.totalorder %s1334_s16, %s1330_s15 }
  0x4e   : > { %1850 = sst [smem:[#allocation25_spill]] %s1583_s5  ;;  %p161_p9 = scmp.eq.s32.totalorder %s1464_s25, 7 }
  0x4f   : > { %p167_p13 = scmp.eq.s32.totalorder %s917_s10, 7  ;;  %p1852_p2 = scmp.eq.s32.totalorder %s1464_s25, 0 }
  0x50   : > { %s187_s29 = sand.u32 1, %s1338_s17   ;;  %p1597_p1 = por %p161_p9, %p57_p3 }
  0x51   : > { %p1592_p6 = por %p1852_p2, %p63_p7  ;;  %p1601_p10 = por %p167_p13, %p63_p7 }
  0x52   : > { %s1854_s7 = scalar_select %p1597_p1, 1, 0 }
  0x53   : > { %s1853_s8 = scalar_select %p1592_p6, 1, 0 }
  0x54   : > { %s1855_s9 = scalar_select %p1601_p10, 1, 0 }
  0x55   : > { %s924_s3 = sshll.u32 %s187_s29, 4  ;;  %s981_s18 = smul.u32 6, %s1358_s22 }
  0x56   : > { %s191_s20 = scalar_lea.vmem [#allocation5], %s924_s3  ;;  %p1856_p4 = scmp.lt.s32.totalorder %s1366_s24, 8 }
  0x57   : > { %s201_s6 = sshll.u32 %s191_s20, 4  ;;  %s197_s10 = sadd.s32 %s982_s12, %s981_s18  ;;  %s1614_s6 = int_to_ptr.vmem [resolvable:$true] %s201_s6 }
  0x58   : > { %p1608_p8 = pnand %p1856_p4, %p59_p5  ;;  %s925_s11 = sshll.u32 %s197_s10, 7 }
  0x59   : > { %s1619_s17 = scalar_lea.hbm %s1810_s0, %s925_s11  ;;  %s1622_s3 = scalar_lea.hbm %s1537_s19, 512 }
  0x5a   : > { %s188_s20 = scalar_lea.sflag [#allocation6], %s187_s29  ;;  %s1163_s22 = scalar_lea.hbm %s1619_s17, 256 }
  0x5b   : > { %p1164_p3 = scmp.ne.s32.totalorder %s1619_s17, %s1163_s22  ;;  %p1165_p5 = pneg %p1608_p8 }
  0x5c   : > { %s1168_s1 = scalar_lea.hbm %s1810_s0, 3072  ;;  %p1169_p13 = scmp.lt.u32.totalorder %s1619_s17, %s1810_s0 }
  0x5d   : > { %p1166_p7 = pnand %p1165_p5, %p1164_p3  ;;  %p1170_p2 = scmp.lt.u32.totalorder %s1168_s1, %s1163_s22 }
  0x5e   : > { %p1172_p10 = scmp.lt.u32.totalorder %s1163_s22, %s1619_s17 }
  0x5f   : > { %p1167_p9 = pneg %p1166_p7  ;;  %p1171_p4 = por %p1170_p2, %p1169_p13 }
  0x61   : > { %p1173_p1 = por %p1172_p10, %p1171_p4 }
  0x63   : > { %p1174_p11 = pnand %p1173_p1, %p1167_p9 }
  0x65   : > { %1177 = shalt.err (!%p1174_p11)
}
  0x66   : > { %s1178_s29 = scalar_lea.vmem %s1614_s6, 256  ;;  %s1369_s11 = smov [#allocation5]  }
  0x67   : > { %p1179_p3 = scmp.ne.s32.totalorder %s1614_s6, %s1178_s29  ;;  %s1183_s12 = sshll.u32 %s1369_s11, 4  ;;  %s1184_s12 = int_to_ptr.vmem [resolvable:$false] %s1183_s12 }
  0x68   : > { %s1185_s18 = scalar_lea.vmem %s1184_s12, 512  ;;  %p1186_p12 = scmp.lt.s32.totalorder %s1614_s6, %s1184_s12 }
  0x69   : > { %p1181_p7 = pnand %p1179_p3, %p1165_p5  ;;  %p1187_p13 = scmp.lt.s32.totalorder %s1185_s18, %s1178_s29 }
  0x6b   : > { %p1182_p6 = pneg %p1181_p7  ;;  %p1188_p2 = por %p1187_p13, %p1186_p12 }
  0x6d   : > { %p1189_p10 = pnand %p1188_p2, %p1182_p6 }
  0x6f   : > { %1192 = shalt.err (!%p1189_p10)
}
  0x70   : > { %994 = dma.hbm_to_vmem [thread:$0]  (!%p1608_p8), %s1619_s17, 256, %s1614_s6, %s188_s20  }
  0x71   : > { %s238_s22 = scalar_lea.vmem [#allocation10], %s1514_s21  ;;  %s1223_s5 = scalar_lea.hbm %s1537_s19, 768 }
  0x72   : > { %s253_s1 = sshll.u32 %s238_s22, 4  ;;  %p1194_p11 = scmp.ne.s32.totalorder %s1622_s3, %s1223_s5  ;;  %s254_s1 = int_to_ptr.vmem [resolvable:$true] %s253_s1 }
  0x73   : > { %p1858_p12 = pneg %p1530_p0  ;;  %s1198_s29 = scalar_lea.hbm %s1812_s2, 3072 }
  0x74   : > { %p1199_p5 = scmp.lt.u32.totalorder %s1622_s3, %s1812_s2  ;;  %p1200_p9 = scmp.lt.u32.totalorder %s1198_s29, %s1223_s5 }
  0x75   : > { %p1196_p6 = pnand %p1194_p11, %p1858_p12  ;;  %p1202_p8 = scmp.lt.u32.totalorder %s1223_s5, %s1622_s3 }
  0x76   : > { %p1201_p4 = por %p1200_p9, %p1199_p5 }
  0x77   : > { %p1197_p1 = pneg %p1196_p6 }
  0x78   : > { %p1203_p3 = por %p1202_p8, %p1201_p4 }
  0x7a   : > { %p1204_p7 = pnand %p1203_p3, %p1197_p1 }
  0x7c   : > { %1207 = shalt.err (!%p1204_p7)
}
  0x7d   : > { %s1208_s17 = scalar_lea.vmem %s254_s1, 256  ;;  %p1859_p2 = pmov %p1858_p12 }
  0x7e   : > { %p1209_p13 = scmp.ne.s32.totalorder %s254_s1, %s1208_s17  ;;  %s1370_s21 = smov [#allocation10]  }
  0x7f   : > { %s1213_s19 = sshll.u32 %s1370_s21, 4  ;;  %s1214_s19 = int_to_ptr.vmem [resolvable:$false] %s1213_s19 }
  0x80   : > { %p1211_p10 = pnand %p1209_p13, %p1859_p2  ;;  %s1215_s6 = scalar_lea.vmem %s1214_s19, 512 }
  0x81   : > { %p1216_p12 = scmp.lt.s32.totalorder %s254_s1, %s1214_s19  ;;  %p1217_p6 = scmp.lt.s32.totalorder %s1215_s6, %s1208_s17 }
  0x82   : > { %p1212_p11 = pneg %p1211_p10 }
  0x83   : > { %p1218_p5 = por %p1217_p6, %p1216_p12 }
  0x85   : > { %p1219_p9 = pnand %p1218_p5, %p1212_p11 }
  0x87   : > { %1222 = shalt.err (!%p1219_p9)
}
  0x88   : > { %1000 = dma.hbm_to_vmem [thread:$0]  (!%p1530_p0), %s1622_s3, 256, %s254_s1, %s1541_s30  }
  0x89   : > { %p1860_p1 = scmp.ne.s32.totalorder %s1848_s4, 0 }
  0x8a   : > { %s1673_s20 = sand.u32 (!%p1860_p1), 1, %s1334_s16   ;;  %p1861_p4 = scmp.ne.s32.totalorder (!%p1860_p1), %s1853_s8, 0 }
  0x8b   : > { %262 = sbr.rel (%p1860_p1) target bundleno = 1594 (0x63a), region = 32  ;;  %s933_s18 = sshll.u32 (!%p1860_p1), %s1673_s20, 4 }
  0x8c   : > { %s265_s22 = scalar_lea.sflag (!%p1860_p1), [#allocation6], %s1673_s20  ;;  %s1677_s5 = scalar_lea.vmem (!%p1860_p1), [#allocation5], %s933_s18 }
  0x92   : > { %1305 = dma.done.wait (%p1861_p4), %s265_s22, 256  }
  0x93   : > { %1307 = vsyncadd (%p1861_p4), %s265_s22, 4294967040  ;;  %s1862_s28 = sld [smem:[#allocation24_spill]]  ;;  %s273_s30 = sand.u32 1, %s1464_s25  }
  0x94   : > { %s275_s4 = sand.u32 1, %s1322_s13   ;;  %s274_s1 = scalar_lea.sflag [#allocation9], %s273_s30 }
  0x95   : > { %s1685_s3 = sshll.u32 %s275_s4, 4 }
  0x96   : > { %s277_s10 = scalar_lea.vmem [#allocation8], %s1685_s3 }
  0x99   : > { %p1863_p0 = scmp.ne.s32.totalorder %s1862_s28, 0 }
  0x9b   : > { %1309 = dma.done.wait (%p1863_p0), %s274_s1, 512  }
  0x9c   : > { %1311 = vsyncadd (%p1863_p0), %s274_s1, 4294966784  ;;  %s286_s27 = scalar_lea.vmem [#allocation10], %s1685_s3  ;;  %s1693_s29 = scalar_lea.vmem [#allocation11], %s933_s18 }
  0x9d   : > { %s1864_s8 = sld [smem:[#allocation16_spill]] }
  0xa3   : > { %p937_p8 = scmp.ne.s32.totalorder %s1864_s8, 0 }
  0xa4   : > { %vm331_vm0 = vcmask (!%p937_p8), 7168   ;;  %v1371_v0 = vmov (!%p937_p8), -1e+30   ;;  %v1372_v1 = vmov (!%p937_p8), 0.0  }
  0xa5   : > { %330 = sbr.rel (%p937_p8) target bundleno = 172 (0xac), region = 48  ;;  %332 = vst.msk [vmem:[#allocation2] sm:$0xff] (!%p937_p8), %vm331_vm0, %v1371_v0  ;;  %333 = vst.msk [vmem:[#allocation2 + $0x8] sm:$0xff] (!%p937_p8), %vm331_vm0, %v1371_v0 }
  0xa6   : > { %334 = vst.msk [vmem:[#allocation3] sm:$0xff] (!%p937_p8), %vm331_vm0, %v1372_v1  ;;  %335 = vst.msk [vmem:[#allocation3 + $0x8] sm:$0xff] (!%p937_p8), %vm331_vm0, %v1372_v1 }
  0xa7   : > { %336 = vst [vmem:[#allocation4] sm:$0xff] (!%p937_p8), %v1372_v1  ;;  %337 = vst [vmem:[#allocation4 + $0x8] sm:$0xff] (!%p937_p8), %v1372_v1 }
  0xac PF: > { %s1865_s25 = sld [smem:[#allocation17_spill]]  ;;  %s1866_s11 = sld [smem:[#allocation16_spill]] }
  0xb2   : > { %s938_s12 = sadd.s32 4294967295, %s1865_s25 }
  0xb3   : > { %s339_s17 = sadd.s32 %s1866_s11, %s938_s12 }
  0xb4   : > { %p939_p3 = scmp.lt.s32.totalorder %s339_s17, 0 }
  0xb5   : > { %s1867_s21 = sld [smem:[#allocation17_spill]] (!%p939_p3)  ;;  %v361_v2 = vld [vmem:[%s277_s10] sm:$0xff] (!%p939_p3)  ;;  %v1373_v3 = vmov (!%p939_p3), 0.0   ;;  %vm1374_vm1 = vmmov (!%p939_p3), 0   ;;  %v345_v5 = vlaneseq (!%p939_p3)  ;;  %s941_s6 = sshll.u32 (!%p939_p3), %s339_s17, 3  ;;  %vm435_vm5 = vcmask (!%p939_p3), 64512  }
  0xb6   : > { %343 = sbr.rel (%p939_p3) target bundleno = 1411 (0x583), region = 52  ;;  %961 = vmatprep.subr.mxu0 (!%p939_p3), %v1373_v3  ;;  %963 = vmatprep.mubr.msk.f32.mxu0 (!%p939_p3), %vm1374_vm1, %v1373_v3  ;;  %v360_v4 = vld [vmem:[%s1677_s5] sm:$0xff] (!%p939_p3)  ;;  %v352_v10 = vstv (!%p939_p3), %s941_s6  ;;  %v1375_v18 = vmov (!%p939_p3), 0   ;;  %vm458_vm6 = vcmask (!%p939_p3), 7168   ;;  %v544_v30 = vld [vmem:[%s277_s10 + $0x8] sm:$0xff] (!%p939_p3) }
  0xb7   : > { %962 = vmatpush3.xpose.msra.mxu0 (!%p939_p3), %v361_v2  ;;  %966 = vmatprep.subr.mxu1 (!%p939_p3), %v1373_v3  ;;  %v346_v6 = vshrl.u32 (!%p939_p3), %v345_v5, 7  ;;  %v351_v9 = vand.u32 (!%p939_p3), 127, %v345_v5  ;;  %v434_v19 = vld [vmem:[#allocation2] sm:$0xff] (!%p939_p3)  ;;  %v543_v31 = vld [vmem:[%s1677_s5 + $0x8] sm:$0xff] (!%p939_p3)  ;;  %v452_v54 = vld [vmem:[#allocation3] sm:$0xff] (!%p939_p3) }
  0xb8   : > { %968 = vmatprep.mubr.msk.f32.mxu1 (!%p939_p3), %vm1374_vm1, %v1373_v3  ;;  %976 = vmatprep.subr.mxu0 (!%p939_p3), %v1373_v3  ;;  %v362_v23 = vld [vmem:[%s286_s27] sm:$0xff] (!%p939_p3)  ;;  %v618_v38 = vld [vmem:[#allocation2 + $0x8] sm:$0xff] (!%p939_p3)  ;;  %v636_v62 = vld [vmem:[#allocation3 + $0x8] sm:$0xff] (!%p939_p3) }
  0xb9   : > { %v353_v11 = vadd.s32 (!%p939_p3), %v352_v10, %v351_v9  ;;  %1117 = vset.pattern.permute.xlu0 (!%p939_p3), %v1375_v18  ;;  %1118 = vset.pattern.permute.xlu1 (!%p939_p3), %v1375_v18  ;;  %v545_v41 = vld [vmem:[%s286_s27 + $0x8] sm:$0xff] (!%p939_p3)  ;;  %v460_v58 = vld [vmem:[#allocation4] sm:$0xff] (!%p939_p3) }
  0xba   : > { %964 = vmatmul.mubr.f32.vlgmr.msra.gmra.mrb[0].mxu0 (!%p939_p3), %v360_v4  ;;  %967 = vmatpush3.msra.mxu1 (!%p939_p3), %v362_v23  ;;  %v644_v2 = vld [vmem:[#allocation4 + $0x8] sm:$0xff] (!%p939_p3) }
  0xbb   : > { %978 = vmatprep.mubr.msk.f32.mxu0 (!%p939_p3), %vm1374_vm1, %v1373_v3  ;;  %s940_s19 = sshll.u32 (!%p939_p3), %s1867_s21, 3  ;;  %971 = vmatprep.subr.mxu1 (!%p939_p3), %v1373_v3 }
  0xbc   : > { %v347_v7 = vstv (!%p939_p3), %s940_s19  ;;  %977 = vmatpush3.msra.mxu0 (!%p939_p3), %v545_v41 }
  0xbd   : > { %v348_v8 = vadd.s32 %v347_v7, %v346_v6 }
  0xbf   : > { %v942_v12 = vadd.s32 4294967292, %v348_v8  ;;  %vm354_vm2 = vcmp.le.s32.totalorder %v353_v11, %v348_v8 }
  0xc1   : > { %vm356_vm3 = vcmp.gt.s32.totalorder %v353_v11, %v942_v12 }
  0xc2   : > { %vm1705_vm4 = vmand %vm354_vm2, %vm356_vm3 }
  0xc3   : > { %v943_v27 = vsel %vm1705_vm4, 1.0, %v1373_v3 }
 0x18d   : > { %v429_v14 = vpop.f32.mrb[0].mxu0 }
 0x18e   : > { %v433_v15 = vsel %vm1705_vm4, %v429_v14, -1e+30  ;;  %v965_v16 = vpop.f32.mrb[1].mxu0 }
 0x18f   : > { %v436_v17 = vsel %vm435_vm5, %v433_v15, -inf }
 0x190   : > { %437 = vmax.xlane.f32.xlu0 %v436_v17 }
 0x21d   : > { %v438_v20 = vpop.xlane.xlu0 %437 }
 0x21e   : > { %v439_v21 = vmax.f32 %v434_v19, %v438_v20 }
 0x220   : > { %v440_v22 = vsub.f32 %v434_v19, %v439_v21  ;;  %542 = vst.msk [vmem:[#allocation2] sm:$0xff] %vm458_vm6, %v439_v21  ;;  %445 = vperm.xlu0 %1117, %v439_v21  }
 0x222   : > { %v441_v43 = vmul.f32 1.442695, %v440_v22 }
 0x29f   : > { %v446_v24 = vpop.permute.xlu0 %445 }
 0x2a0   : > { %v448_v25 = vsub.f32 %v433_v15, %v446_v24 }
 0x2a2   : > { %v449_v26 = vmul.f32 1.442695, %v448_v25 }
 0x2a4   : > { %1119 = vpow2.f32 %v449_v26 }
 0x2a5   : > { %1121 = vpow2.f32 %v441_v43 }
 0x2ae   : > { %v1120_v28 = vpop.eup %1119 }
 0x2af   : > { %v451_v29 = vmul.f32 %v1120_v28, %v943_v27  ;;  %v1122_v46 = vpop.eup %1121 }
 0x2b0   : > { %v453_v55 = vmul.f32 %v1122_v46, %v452_v54 }
 0x2b1   : > { %969 = vmatmul.mubr.msk.f32.vlgmr.msra.gmra.mrb[0].mxu1 %vm435_vm5, %v451_v29  ;;  %v454_v42 = vsel %vm435_vm5, %v451_v29, 0.0 }
 0x2b2   : > { %972 = vmatpush3.xpose.msra.mxu1 %v544_v30  ;;  %973 = vmatprep.mubr.msk.f32.mxu1 %vm1374_vm1, %v1373_v3 }
 0x2b5   : > { %974 = vmatmul.mubr.f32.vlgmr.msra.gmra.mrb[2].mxu1 %v543_v31 }
 0x384   : > { %v536_v32 = vpop.f32.mrb[0].mxu1 }
 0x385   : > { %v970_v33 = vpop.f32.mrb[1].mxu1 }
 0x388   : > { %v612_v34 = vpop.f32.mrb[2].mxu1 }
 0x389   : > { %v616_v35 = vsel %vm1705_vm4, %v612_v34, -1e+30  ;;  %v975_v36 = vpop.f32.mrb[3].mxu1 }
 0x38a   : > { %v619_v37 = vsel %vm435_vm5, %v616_v35, -inf }
 0x38b   : > { %620 = vmax.xlane.f32.xlu1 %v619_v37 }
 0x418   : > { %v621_v39 = vpop.xlane.xlu1 %620 }
 0x419   : > { %v622_v40 = vmax.f32 %v618_v38, %v621_v39 }
 0x41b   : > { %726 = vst.msk [vmem:[#allocation2 + $0x8] sm:$0xff] %vm458_vm6, %v622_v40  ;;  %628 = vperm.xlu1 %1118, %v622_v40   ;;  %v623_v44 = vsub.f32 %v618_v38, %v622_v40 }
 0x41d   : > { %v624_v45 = vmul.f32 1.442695, %v623_v44 }
 0x41f   : > { %1123 = vpow2.f32 %v624_v45 }
 0x429   : > { %v1124_v47 = vpop.eup %1123 }
 0x42a   : > { %v637_v63 = vmul.f32 %v1124_v47, %v636_v62 }
 0x43f   : > { %455 = vadd.xlane.f32.xlu1 %v454_v42 }
 0x450   : > { %463 = vperm.xlu1 %1118, %v1122_v46  }
 0x454   : > { %647 = vperm.xlu1 %1118, %v1124_v47  }
 0x49a   : > { %v629_v48 = vpop.permute.xlu1 %628 }
 0x49b   : > { %v631_v49 = vsub.f32 %v616_v35, %v629_v48 }
 0x49d   : > { %v632_v50 = vmul.f32 1.442695, %v631_v49 }
 0x49f   : > { %1125 = vpow2.f32 %v632_v50 }
 0x4a9   : > { %v1126_v51 = vpop.eup %1125 }
 0x4aa   : > { %v634_v52 = vmul.f32 %v1126_v51, %v943_v27 }
 0x4ac   : > { %979 = vmatmul.mubr.msk.f32.vlgmr.msra.gmra.mrb[2].mxu0 %vm435_vm5, %v634_v52  ;;  %v638_v53 = vsel %vm435_vm5, %v634_v52, 0.0 }
 0x4ad   : > { %639 = vadd.xlane.f32.xlu0 %v638_v53 }
 0x4cc   : > { %v456_v56 = vpop.xlane.xlu1 %455 }
 0x4cd   : > { %v457_v57 = vadd.f32 %v456_v56, %v453_v55 }
 0x4cf   : > { %459 = vst.msk [vmem:[#allocation3] sm:$0xff] %vm458_vm6, %v457_v57 }
 0x4d0   : > { %v464_v59 = vpop.permute.xlu1 %463 }
 0x4d1   : > { %v466_v60 = vmul.f32 %v464_v59, %v460_v58 }
 0x4d3   : > { %v540_v61 = vadd.f32 %v536_v32, %v466_v60 }
 0x4d4   : > { %v648_v3 = vpop.permute.xlu1 %647 }
 0x4d5   : > { %541 = vst [vmem:[#allocation4] sm:$0xff] %v540_v61  ;;  %v650_v4 = vmul.f32 %v648_v3, %v644_v2 }
 0x53a   : > { %v640_v0 = vpop.xlane.xlu0 %639 }
 0x53b   : > { %v641_v1 = vadd.f32 %v640_v0, %v637_v63 }
 0x53d   : > { %642 = vst.msk [vmem:[#allocation3 + $0x8] sm:$0xff] %vm458_vm6, %v641_v1 }
 0x57f   : > { %v720_v5 = vpop.f32.mrb[2].mxu0 }
 0x580   : > { %v724_v6 = vadd.f32 %v720_v5, %v650_v4  ;;  %v980_v7 = vpop.f32.mrb[3].mxu0 }
 0x582   : > { %725 = vst [vmem:[#allocation4 + $0x8] sm:$0xff] %v724_v6 }
 0x583 PF: > { %s1870_s18 = sld [smem:[#allocation16_spill]] }
 0x589   : > { %p946_p7 = scmp.ne.s32.totalorder %s1870_s18, 1 }
 0x58a   : > { %v731_v8 = vld [vmem:[#allocation3] sm:$0xff] (!%p946_p7)  ;;  %v743_v9 = vld [vmem:[#allocation3 + $0x8] sm:$0xff] (!%p946_p7)  ;;  %v1376_v10 = vmov (!%p946_p7), 0   ;;  %v734_v13 = vld [vmem:[#allocation4] sm:$0xff] (!%p946_p7) }
 0x58b   : > { %730 = sbr.rel (%p946_p7) target bundleno = 1565 (0x61d), region = 56  ;;  %1127 = vset.pattern.permute.xlu0 (!%p946_p7), %v1376_v10  ;;  %1128 = vrcp.f32 (!%p946_p7), %v731_v8  ;;  %v747_v16 = vld [vmem:[#allocation4 + $0x8] sm:$0xff] (!%p946_p7) }
 0x58c   : > { %1130 = vrcp.f32 (!%p946_p7), %v743_v9 }
 0x595   : > { %v1129_v11 = vpop.eup %1128 }
 0x596   : > { %737 = vperm.xlu0 %1127, %v1129_v11   ;;  %v1131_v12 = vpop.eup %1130 }
 0x59a   : > { %750 = vperm.xlu0 %1127, %v1131_v12  }
 0x615   : > { %v738_v14 = vpop.permute.xlu0 %737 }
 0x616   : > { %v740_v15 = vmul.f32 %v738_v14, %v734_v13 }
 0x618   : > { %741 = vst [vmem:[%s1693_s29] sm:$0xff] %v740_v15 }
 0x619   : > { %v751_v17 = vpop.permute.xlu0 %750 }
 0x61a   : > { %v753_v18 = vmul.f32 %v751_v17, %v747_v16 }
 0x61c   : > { %754 = vst [vmem:[%s1693_s29 + $0x8] sm:$0xff] %v753_v18 }
 0x61d PF: > { %s1871_s22 = sld [smem:[#allocation17_spill]]  ;;  %s1872_s5 = sld [smem:[#allocation18_spill]] }
 0x61e   : > { %s772_s4 = sshll.u32 %s1693_s29, 4  ;;  %s1873_s8 = sld [smem:[#allocation27_spill]]  ;;  %s1739_s4 = int_to_ptr.vmem [resolvable:$true] %s772_s4 }
 0x61f   : > { %s756_s11 = scalar_lea.sflag [#allocation7], %s1673_s20  ;;  %s1224_s12 = scalar_lea.vmem %s1739_s4, 256 }
 0x620   : > { %p1225_p13 = scmp.ne.s32.totalorder %s1739_s4, %s1224_s12  ;;  %p1874_p2 = scmp.ne.s32.totalorder %s1854_s7, 0 }
 0x621   : > { %s1377_s17 = smov [#allocation11]  }
 0x622   : > { %p1226_p10 = pnand %p1225_p13, %p1874_p2  ;;  %s1228_s21 = sshll.u32 %s1377_s17, 4  ;;  %s1229_s21 = int_to_ptr.vmem [resolvable:$false] %s1228_s21 }
 0x623   : > { %s948_s28 = sshll.u32 %s1871_s22, 1  ;;  %s949_s30 = sshll.u32 %s1872_s5, 2 }
 0x624   : > { %s768_s3 = sadd.s32 %s949_s30, %s948_s28  ;;  %p1227_p11 = pneg %p1226_p10 }
 0x625   : > { %s950_s1 = sshll.u32 %s768_s3, 7  ;;  %s1230_s29 = scalar_lea.vmem %s1229_s21, 512 }
 0x626   : > { %s770_s25 = scalar_lea.hbm %s1873_s8, %s950_s1  ;;  %p1231_p12 = scmp.lt.s32.totalorder %s1739_s4, %s1229_s21 }
 0x627   : > { %p1232_p6 = scmp.lt.s32.totalorder %s1230_s29, %s1224_s12 }
 0x629   : > { %p1233_p5 = por %p1232_p6, %p1231_p12 }
 0x62b   : > { %p1234_p9 = pnand %p1233_p5, %p1227_p11 }
 0x62d   : > { %1237 = shalt.err (!%p1234_p9)
}
 0x62e   : > { %s1238_s19 = scalar_lea.hbm %s770_s25, 256  ;;  %s1242_s18 = scalar_lea.hbm %s1873_s8, 1024 }
 0x62f   : > { %p1239_p1 = scmp.ne.s32.totalorder %s770_s25, %s1238_s19  ;;  %p1243_p8 = scmp.lt.u32.totalorder %s770_s25, %s1873_s8 }
 0x630   : > { %p1244_p3 = scmp.lt.u32.totalorder %s1242_s18, %s1238_s19  ;;  %p1246_p13 = scmp.lt.u32.totalorder %s1238_s19, %s770_s25 }
 0x631   : > { %p1240_p4 = pnand %p1239_p1, %p1874_p2 }
 0x632   : > { %p1245_p7 = por %p1244_p3, %p1243_p8 }
 0x633   : > { %p1241_p0 = pneg %p1240_p4 }
 0x634   : > { %p1247_p10 = por %p1246_p13, %p1245_p7 }
 0x636   : > { %p1248_p11 = pnand %p1247_p10, %p1241_p0 }
 0x638   : > { %1251 = shalt.err (!%p1248_p11)
}
 0x639   : > { %989 = dma.vmem_to_hbm [thread:$0]  (%p1874_p2), %s1739_s4, 256, %s770_s25, %s756_s11  }
 0x63a PF: > { %p1006_p12 = scmp.ge.s32.totalorder %s1366_s24, 2  ;;  %s784_s28 = sand.u32 1, %s1330_s15  }
 0x63b   : > { %p1875_p6 = scmp.ne.s32.totalorder %s1855_s9, 0  ;;  %s785_s30 = scalar_lea.sflag [#allocation7], %s784_s28 }
 0x63d   : > { %p1002_p5 = pnand %p1006_p12, %p1875_p6 }
 0x63f   : > { %1313 = dma.done.wait (!%p1002_p5), %s785_s30, 256  }
 0x640   : > { %1315 = vsyncadd (!%p1002_p5), %s785_s30, 4294967040  ;;  %s22_s24 = sadd.s32 1, %s1366_s24   ;;  %s1877_s7 = sld [smem:[#allocation15_spill]] }
 0x641   : > { %p1766_p9 = scmp.ge.s32.totalorder %s22_s24, 10   ;;  %s1878_s17 = sld [smem:[#allocation25_spill]] }
 0x642   : > { %s1879_s18 = sld [smem:[#allocation19_spill]]  ;;  %s1880_s19 = sld [smem:[#allocation20_spill]] }
 0x643   : > { %s1881_s21 = sld [smem:[#allocation21_spill]]  ;;  %s1882_s22 = sld [smem:[#allocation22_spill]] }
 0x644   : > { %s1883_s9 = sld [smem:[#allocation23_spill]]  ;;  %s1884_s12 = smov %s1322_s13 }
 0x645   : > { %s1885_s13 = smov %s1326_s14  ;;  %s1886_s14 = smov %s1512_s26 }
 0x646   : > { %s1887_s15 = smov %s1334_s16  ;;  %s1888_s16 = smov %s1877_s7 }
 0x647   : > { %s1889_s20 = smov %s1362_s23  ;;  %21 = sbr.rel (!%p1766_p9) target bundleno = 15 (0xf), region = 118 }
 0x64a   : > { %s1890_s23 = smov %s1883_s9 }
 0x64e   :  { %790 = vsyncpa [#allocation6], 1 }
 0x64f   :  { %792 = vsyncpa [#allocation6 + $0x1], 1 }
 0x650   :  { %793 = vsyncpa [#allocation9], 1 }
 0x651   :  { %795 = vsyncpa [#allocation9 + $0x1], 1 }
 0x652   :  { %796 = vsyncpa [#allocation7], 1 }
 0x653   :  { %798 = vsyncpa [#allocation7 + $0x1], 1 }

// kernel: gpt_forward.9
= control target key start
LH: loop header
LB: loop body
LE: loop exit
PB: predicated region body
PF: predicated region fallthrough
CT: control target
= control target key end

     0   :  { %s2030_s0 = inlined_call_operand.hbm [shape: f32[32,256], index: 0, kind: input, shape index: {}]   ;;  %s2031_s1 = inlined_call_operand.hbm [shape: f32[256,768], index: 1, kind: input, shape index: {}]   ;;  %s2032_s2 = inlined_call_operand.hbm [shape: f32[1,768], index: 2, kind: input, shape index: {}]   ;;  %s2033_s3 = inlined_call_operand.hbm [shape: f32[1,256], index: 3, kind: input, shape index: {}]   ;;  %s2034_s4 = inlined_call_operand.hbm [shape: f32[1,256], index: 4, kind: input, shape index: {}]   ;;  %s2035_s5 = inlined_call_operand.hbm [shape: f32[32,768], index: 5, kind: output, shape index: {}]  }
   0x1   :  { %2052 = sst [smem:[#allocation23_spill]] %s2031_s1 }
   0x2   :  { %2053 = sst [smem:[#allocation24_spill]] %s2033_s3 }
   0x3   :  { %2054 = sst [smem:[#allocation25_spill]] %s2035_s5 }
   0x4   :  { %10 = vsyncpa [#allocation5], 0 }
   0x5   :  { %11 = vsyncpa [#allocation8], 0 }
   0x6   :  { %13 = vsyncpa [#allocation8 + $0x1], 0 }
   0x7   :  { %14 = vsyncpa [#allocation11], 0 }
   0x8   :  { %15 = vsyncpa [#allocation6], 0 }
   0x9   :  { %17 = vsyncpa [#allocation6 + $0x1], 0  ;;  %s1599_s18 = smov 0   ;;  %s1601_s19 = smov 0  }
   0xa   :  { %s1603_s20 = smov 0   ;;  %s1605_s21 = smov 0  }
   0xb   :  { %s1607_s22 = smov 0   ;;  %s1609_s23 = smov 0  }
   0xc LB: > { %2055 = sst [smem:[#allocation18_spill]] %s1532_s18  ;;  %s1630_s24 = sadd.s32 4294967295, %s1552_s23   ;;  %s1552_s23 = sphi %s1609_s23, %s23_s23   ;;  %s1548_s22 = sphi %s1607_s22, %s2099_s22   ;;  %s1544_s21 = sphi %s1605_s21, %s2098_s21   ;;  %s1540_s20 = sphi %s1603_s20, %s2097_s20   ;;  %s1536_s19 = sphi %s1601_s19, %s2096_s19   ;;  %s1532_s18 = sphi %s1599_s18, %s2095_s18  }
   0xd   : > { %2056 = sst [smem:[#allocation19_spill]] %s1552_s23  ;;  %s1039_s25 = sadd.s32 4294967294, %s1552_s23  }
   0xe   : > { %p86_p0 = scmp.ne.s32.totalorder %s1540_s20, %s1536_s19  ;;  %p87_p1 = scmp.eq.s32.totalorder %s1552_s23, 0 }
   0xf   : > { %p92_p2 = scmp.ne.s32.totalorder %s1536_s19, %s1532_s18  ;;  %p2036_p3 = scmp.eq.s32.totalorder %s1630_s24, 0 }
  0x10   : > { %p186_p4 = scmp.eq.s32.totalorder %s1630_s24, 1  ;;  %p1641_p5 = por %p87_p1, %p86_p0 }
  0x11   : > { %p192_p6 = scmp.eq.s32.totalorder %s1039_s25, 1  ;;  %p1647_p7 = por %p2036_p3, %p92_p2 }
  0x12   : > { %p1651_p8 = por %p186_p4, %p86_p0  ;;  %p1040_p10 = scmp.ge.s32.totalorder %s1552_s23, 1 }
  0x13   : > { %s2058_s28 = scalar_select %p1647_p7, 1, 0 }
  0x14   : > { %s2059_s29 = scalar_select %p1651_p8, 1, 0 }
  0x15   : > { %p1655_p9 = por %p192_p6, %p92_p2  ;;  %p199_p11 = scmp.lt.s32.totalorder %s1552_s23, 3 }
  0x16   : > { %s1554_s7 = smov [#allocation10]   ;;  %p1245_p1 = scmp.lt.s32.totalorder %s1552_s23, 2 }
  0x17   : > { %s2060_s30 = scalar_select %p1655_p9, 1, 0 }
  0x18   : > { %p1662_p13 = pnand %p1040_p10, %p199_p11  ;;  %s231_s8 = sshll.u32 %s1554_s7, 4  ;;  %s232_s8 = int_to_ptr.vmem [resolvable:$true] %s231_s8 }
  0x19   : > { %2061 = sst [smem:[#allocation20_spill]] %s2060_s30  ;;  %p1671_p4 = pnand %p1245_p1, %p1641_p5 }
  0x1a   : > { %s2062_s6 = scalar_select %p1662_p13, 1, 0 }
  0x1b   : > { %p1221_p0 = pneg %p1662_p13  ;;  %s38_s11 = sadd.s32 1, %s1548_s22 }
  0x1c   : > { %s2063_s9 = scalar_select %p1671_p4, 1, 0 }
  0x1d   : > { %p1677_p2 = pnand %p1221_p0, %p2036_p3  ;;  %p1682_p6 = scmp.ge.s32.totalorder %s38_s11, 2 }
  0x1e   : > { %s2066_s3 = sld [smem:[#allocation24_spill]] }
  0x1f   : > { %s2064_s10 = scalar_select %p1677_p2, 1, 0 }
  0x20   : > { %s2065_s12 = scalar_select %p1682_p6, 1, 0 }
  0x21   : > { %p1695_p10 = pneg %p1677_p2 }
  0x24   : > { %s1318_s16 = scalar_lea.hbm %s2066_s3, 32 }
  0x25   : > { %p1319_p5 = scmp.ne.s32.totalorder %s2066_s3, %s1318_s16  ;;  %p1325_p0 = scmp.lt.u32.totalorder %s1318_s16, %s2066_s3 }
  0x27   : > { %p1321_p11 = pnand %p1695_p10, %p1319_p5 }
  0x29   : > { %p1322_p1 = pneg %p1321_p11 }
  0x2b   : > { %p1327_p12 = pnand %p1325_p0, %p1322_p1 }
  0x2d   : > { %1330 = shalt.err (!%p1327_p12)
}
  0x2e   : > { %s1331_s14 = scalar_lea.vmem %s232_s8, 32  ;;  %p1339_p7 = scmp.lt.s32.totalorder %s232_s8, %s232_s8 }
  0x2f   : > { %p1332_p3 = scmp.ne.s32.totalorder %s232_s8, %s1331_s14  ;;  %p1340_p13 = scmp.lt.s32.totalorder %s1331_s14, %s1331_s14 }
  0x31   : > { %p1334_p9 = pnand %p1332_p3, %p1695_p10  ;;  %p1341_p4 = por %p1340_p13, %p1339_p7 }
  0x33   : > { %p1335_p8 = pneg %p1334_p9 }
  0x35   : > { %p1342_p6 = pnand %p1341_p4, %p1335_p8 }
  0x37   : > { %1345 = shalt.err (!%p1342_p6)
}
  0x38   : > { %1227 = dma.hbm_to_vmem [thread:$0]  (!%p1677_p2), %s2066_s3, 32, %s232_s8, [#allocation11]  }
  0x39   : > { %p2068_p3 = scmp.ne.s32.totalorder %s2065_s12, 0  ;;  %s2042_s26 = sand.u32 1, %s1540_s20  }
  0x3a   : > { %s1198_s25 = smul.u32 768, %s2042_s26  ;;  %s2070_s14 = sadd.s32 1, %s1540_s20 }
  0x3b   : > { %s2101_s11 = smov (%p2068_p3, %s38_s11), 0  ;;  %s1055_s7 = smul.u32 384, %s1548_s22 }
  0x3c   : > { %2069 = sst [smem:[#allocation21_spill]] %s2101_s11  ;;  %s75_s16 = ssub.s32 %s1548_s22, %s2101_s11 }
  0x3d   : > { %p77_p7 = scmp.eq.s32.totalorder %s75_s16, 0  ;;  %s2072_s1 = sld [smem:[#allocation23_spill]] }
  0x3e   : > { %s257_s8 = scalar_lea.vmem [#allocation7], %s1198_s25  ;;  %s2073_s3 = sand.u32 1, %s1552_s23  }
  0x3f   : > { %s1724_s15 = scalar_select %p77_p7, %s1540_s20, %s2070_s14  }
  0x40   : > { %s267_s12 = sshll.u32 %s257_s8, 4  ;;  %s1735_s26 = scalar_lea.sflag [#allocation8], %s2073_s3  ;;  %s1731_s12 = int_to_ptr.vmem [resolvable:$true] %s267_s12 }
  0x41   : > { %2071 = sst [smem:[#allocation22_spill]] %s1724_s15  ;;  %p2074_p9 = scmp.ne.s32.totalorder %s2063_s9, 0 }
  0x43   : > { %s1729_s30 = scalar_lea.hbm %s2072_s1, %s1055_s7  ;;  %p2048_p12 = pneg %p2074_p9 }
  0x44   : > { %s1346_s16 = scalar_lea.hbm %s1729_s30, 12288  ;;  %s1351_s14 = scalar_lea.hbm %s2072_s1, 24576 }
  0x45   : > { %p1347_p8 = scmp.ne.s32.totalorder %s1729_s30, %s1346_s16  ;;  %p1352_p6 = scmp.lt.u32.totalorder %s1729_s30, %s2072_s1 }
  0x46   : > { %p1353_p5 = scmp.lt.u32.totalorder %s1351_s14, %s1346_s16  ;;  %p1355_p1 = scmp.lt.u32.totalorder %s1346_s16, %s1729_s30 }
  0x47   : > { %p1349_p13 = pnand %p2048_p12, %p1347_p8 }
  0x48   : > { %p1354_p11 = por %p1353_p5, %p1352_p6 }
  0x49   : > { %p1350_p4 = pneg %p1349_p13 }
  0x4a   : > { %p1356_p0 = por %p1355_p1, %p1354_p11 }
  0x4c   : > { %p1357_p3 = pnand %p1356_p0, %p1350_p4 }
  0x4e   : > { %1360 = shalt.err (!%p1357_p3)
}
  0x4f   : > { %s1361_s3 = scalar_lea.vmem %s1731_s12, 12288  ;;  %s1555_s8 = smov [#allocation7]  }
  0x50   : > { %p1362_p7 = scmp.ne.s32.totalorder %s1731_s12, %s1361_s3  ;;  %s1366_s13 = sshll.u32 %s1555_s8, 4  ;;  %s1367_s13 = int_to_ptr.vmem [resolvable:$false] %s1366_s13 }
  0x51   : > { %s1368_s7 = scalar_lea.vmem %s1367_s13, 24576  ;;  %p1369_p2 = scmp.lt.s32.totalorder %s1731_s12, %s1367_s13 }
  0x52   : > { %p1364_p8 = pnand %p1362_p7, %p2048_p12  ;;  %p1370_p6 = scmp.lt.s32.totalorder %s1368_s7, %s1361_s3 }
  0x54   : > { %p1365_p13 = pneg %p1364_p8  ;;  %p1371_p5 = por %p1370_p6, %p1369_p2 }
  0x56   : > { %p1372_p11 = pnand %p1371_p5, %p1365_p13 }
  0x58   : > { %1375 = shalt.err (!%p1372_p11)
}
  0x59   : > { %s1556_s16 = smov 768   ;;  %s1557_s14 = smov 384  }
  0x5a   : > { %s1558_s17 = smov 24   ;;  %s1559_s25 = smov [#allocation4]  }
  0x5b   : > { %1234 = dma.hbm_to_vmem [thread:$0]  (!%p2074_p9), %s1729_s30, 12288, %s1731_s12, %s1735_s26, %s1556_s16, %s1557_s14, %s1558_s17  }
  0x5c   : > { %s217_s1 = sshll.u32 %s1559_s25, 4  ;;  %s1376_s3 = scalar_lea.hbm %s2030_s0, 1024  ;;  %s218_s1 = int_to_ptr.vmem [resolvable:$true] %s217_s1 }
  0x5d   : > { %p1377_p2 = scmp.ne.s32.totalorder %s2030_s0, %s1376_s3  ;;  %p1383_p0 = scmp.lt.u32.totalorder %s1376_s3, %s2030_s0 }
  0x5f   : > { %p1379_p4 = pnand %p1377_p2, %p1695_p10 }
  0x61   : > { %p1380_p1 = pneg %p1379_p4 }
  0x63   : > { %p1385_p3 = pnand %p1383_p0, %p1380_p1 }
  0x65   : > { %1388 = shalt.err (!%p1385_p3)
}
  0x66   : > { %s1389_s30 = scalar_lea.vmem %s218_s1, 1024  ;;  %p1397_p6 = scmp.lt.s32.totalorder %s218_s1, %s218_s1 }
  0x67   : > { %p1390_p7 = scmp.ne.s32.totalorder %s218_s1, %s1389_s30  ;;  %p1398_p5 = scmp.lt.s32.totalorder %s1389_s30, %s1389_s30 }
  0x69   : > { %p1392_p8 = pnand %p1390_p7, %p1695_p10  ;;  %p1399_p11 = por %p1398_p5, %p1397_p6 }
  0x6b   : > { %p1393_p13 = pneg %p1392_p8 }
  0x6d   : > { %p1400_p12 = pnand %p1399_p11, %p1393_p13 }
  0x6f   : > { %1403 = shalt.err (!%p1400_p12)
}
  0x70   : > { %s1560_s11 = smov 256   ;;  %s1561_s23 = smov 16  }
  0x71   : > { %p2075_p2 = scmp.ne.s32.totalorder %s2064_s10, 0  ;;  %s2076_s16 = sand.u32 1, %s1540_s20  }
  0x72   : > { %s1199_s14 = smul.u32 3, %s2076_s16  ;;  %s1562_s17 = smov [#allocation12]  }
  0x73   : > { %1224 = dma.hbm_to_vmem [thread:$0]  (!%p2075_p2), %s2030_s0, 1024, %s218_s1, [#allocation5], %s1560_s11, %s1560_s11, %s1561_s23  }
  0x74   : > { %s242_s25 = sshll.u32 %s1562_s17, 4  ;;  %s1056_s8 = smul.u32 48, %s1548_s22  ;;  %s243_s25 = int_to_ptr.vmem [resolvable:$true] %s242_s25 }
  0x75   : > { %s1404_s7 = scalar_lea.hbm %s2034_s4, 32 }
  0x76   : > { %p1405_p12 = scmp.ne.s32.totalorder %s2034_s4, %s1404_s7  ;;  %p1411_p0 = scmp.lt.u32.totalorder %s1404_s7, %s2034_s4 }
  0x78   : > { %p1407_p4 = pnand %p1405_p12, %p1695_p10 }
  0x7a   : > { %p1408_p1 = pneg %p1407_p4 }
  0x7c   : > { %p1413_p3 = pnand %p1411_p0, %p1408_p1 }
  0x7e   : > { %1416 = shalt.err (!%p1413_p3)
}
  0x7f   : > { %s1417_s1 = scalar_lea.vmem %s243_s25, 32  ;;  %p1425_p6 = scmp.lt.s32.totalorder %s243_s25, %s243_s25 }
  0x80   : > { %p1418_p7 = scmp.ne.s32.totalorder %s243_s25, %s1417_s1  ;;  %p1426_p5 = scmp.lt.s32.totalorder %s1417_s1, %s1417_s1 }
  0x82   : > { %p1420_p8 = pnand %p1418_p7, %p1695_p10  ;;  %p1427_p11 = por %p1426_p5, %p1425_p6 }
  0x84   : > { %p1421_p13 = pneg %p1420_p8 }
  0x86   : > { %p1428_p9 = pnand %p1427_p11, %p1421_p13 }
  0x88   : > { %1431 = shalt.err (!%p1428_p9)
}
  0x89   : > { %1230 = dma.hbm_to_vmem [thread:$0]  (!%p2075_p2), %s2034_s4, 32, %s243_s25, [#allocation11]  }
  0x8a   : > { %s1805_s12 = scalar_lea.hbm %s2032_s2, %s1056_s8  ;;  %s281_s27 = scalar_lea.vmem [#allocation9], %s1199_s14 }
  0x8b   : > { %s289_s16 = sshll.u32 %s281_s27, 4  ;;  %s1432_s17 = scalar_lea.hbm %s1805_s12, 48  ;;  %s290_s16 = int_to_ptr.vmem [resolvable:$true] %s289_s16 }
  0x8c   : > { %p1433_p10 = scmp.ne.s32.totalorder %s1805_s12, %s1432_s17  ;;  %p2077_p9 = scmp.ne.s32.totalorder %s2063_s9, 0 }
  0x8d   : > { %s1437_s3 = scalar_lea.hbm %s2032_s2, 96  ;;  %p1438_p2 = scmp.lt.u32.totalorder %s1805_s12, %s2032_s2 }
  0x8e   : > { %p2078_p12 = pneg %p2077_p9  ;;  %p1439_p0 = scmp.lt.u32.totalorder %s1437_s3, %s1432_s17 }
  0x8f   : > { %p1441_p7 = scmp.lt.u32.totalorder %s1432_s17, %s1805_s12 }
  0x90   : > { %p1435_p4 = pnand %p1433_p10, %p2078_p12  ;;  %p1440_p3 = por %p1439_p0, %p1438_p2 }
  0x92   : > { %p1436_p1 = pneg %p1435_p4  ;;  %p1442_p8 = por %p1441_p7, %p1440_p3 }
  0x94   : > { %p1443_p13 = pnand %p1442_p8, %p1436_p1 }
  0x96   : > { %1446 = shalt.err (!%p1443_p13)
}
  0x97   : > { %s1447_s14 = scalar_lea.vmem %s290_s16, 48  ;;  %p2079_p5 = pmov %p2078_p12 }
  0x98   : > { %p1448_p6 = scmp.ne.s32.totalorder %s290_s16, %s1447_s14  ;;  %s1563_s7 = smov [#allocation9]  }
  0x99   : > { %s1452_s30 = sshll.u32 %s1563_s7, 4  ;;  %s1453_s30 = int_to_ptr.vmem [resolvable:$false] %s1452_s30 }
  0x9a   : > { %p1450_p11 = pnand %p1448_p6, %p2079_p5  ;;  %s1454_s15 = scalar_lea.vmem %s1453_s30, 96 }
  0x9b   : > { %p1455_p12 = scmp.lt.s32.totalorder %s290_s16, %s1453_s30  ;;  %p1456_p4 = scmp.lt.s32.totalorder %s1454_s15, %s1447_s14 }
  0x9c   : > { %p1451_p10 = pneg %p1450_p11 }
  0x9d   : > { %p1457_p0 = por %p1456_p4, %p1455_p12 }
  0x9f   : > { %p1458_p2 = pnand %p1457_p0, %p1451_p10 }
  0xa1   : > { %1461 = shalt.err (!%p1458_p2)
}
  0xa2   : > { %1237 = dma.hbm_to_vmem [thread:$0]  (!%p2077_p9), %s1805_s12, 48, %s290_s16, %s1735_s26  }
  0xa3   : > { %p2080_p1 = scmp.ne.s32.totalorder %s2062_s6, 0 }
  0xa4   : > { %p2081_p3 = scmp.eq.s32.totalorder (!%p2080_p1), %s1630_s24, 0 }
  0xa5   : > { %298 = sbr.rel (%p2080_p1) target bundleno = 820 (0x334), region = 40 }
  0xac   : > { %1515 = dma.done.wait (%p2081_p3), [#allocation5], 1024   ;;  %p2082_p7 = pmov %p2081_p3 }
  0xad   : > { %s304_s1 = sand.u32 1, %s1630_s24   ;;  %s1835_s18 = sand.u32 1, %s1536_s19  }
  0xae   : > { %1517 = vsyncadd (%p2082_p7), [#allocation5], 4294966272  ;;  %s1200_s9 = smul.u32 768, %s1835_s18  ;;  %s305_s11 = scalar_lea.sflag [#allocation8], %s304_s1 }
  0xaf   : > { %p2083_p9 = scmp.ne.s32.totalorder %s2058_s28, 0 }
  0xb0   : > { %s1838_s5 = scalar_lea.vmem [#allocation7], %s1200_s9 }
  0xb1   : > { %1519 = dma.done.wait (%p2083_p9), %s305_s11, 12336  }
  0xb2   : > { %1521 = vsyncadd (%p2083_p9), %s305_s11, 4294954960  ;;  %s1201_s6 = smul.u32 3, %s1835_s18  ;;  %p2084_p8 = pmov %p2081_p3 }
  0xb4   : > { %s1845_s26 = scalar_lea.vmem [#allocation9], %s1201_s6 }
  0xb5   : > { %1523 = dma.done.wait (%p2084_p8), [#allocation11], 64   ;;  %p2085_p13 = pmov %p2081_p3 }
  0xb6   : > { %s1202_s23 = smul.u32 96, %s1835_s18  ;;  %v1564_v0 = vmov 0.0   ;;  %p1051_p6 = scmp.ne.s32.totalorder %s1544_s21, 0 }
  0xb7   : > { %1525 = vsyncadd (%p2085_p13), [#allocation11], 4294967232  ;;  %368 = vst [vmem:[#allocation2] sm:$0xff] %v1564_v0  ;;  %v384_v1 = vld [vmem:[#allocation4] sm:$0xff] (!%p1051_p6)  ;;  %v385_v2 = vld [vmem:[#allocation4 + $0x8] sm:$0xff] (!%p1051_p6)  ;;  %v459_v43 = vlaneseq (!%p1051_p6) }
  0xb8   : > { %369 = vst [vmem:[#allocation2 + $0x8] sm:$0xff] %v1564_v0  ;;  %370 = vst [vmem:[#allocation2 + $0x10] sm:$0xff] %v1564_v0  ;;  %s1852_s28 = scalar_lea.vmem [#allocation13], %s1202_s23  ;;  %383 = sbr.rel (%p1051_p6) target bundleno = 508 (0x1fc), region = 68  ;;  %v388_v3 = vld [vmem:[#allocation4 + $0x20] sm:$0xff] (!%p1051_p6)  ;;  %v392_v4 = vadd.f32 (!%p1051_p6), %v385_v2, %v384_v1  ;;  %v389_v5 = vld [vmem:[#allocation4 + $0x28] sm:$0xff] (!%p1051_p6) }
  0xb9   : > { %371 = vst [vmem:[#allocation2 + $0x18] sm:$0xff] %v1564_v0  ;;  %372 = vst [vmem:[#allocation2 + $0x20] sm:$0xff] %v1564_v0  ;;  %v386_v6 = vld [vmem:[#allocation4 + $0x10] sm:$0xff] (!%p1051_p6)  ;;  %v387_v7 = vld [vmem:[#allocation4 + $0x18] sm:$0xff] (!%p1051_p6)  ;;  %v398_v8 = vadd.f32 (!%p1051_p6), %v389_v5, %v388_v3  ;;  %v460_v49 = vshrl.u32 (!%p1051_p6), %v459_v43, 7 }
  0xba   : > { %373 = vst [vmem:[#allocation2 + $0x28] sm:$0xff] %v1564_v0  ;;  %374 = vst [vmem:[#allocation2 + $0x30] sm:$0xff] %v1564_v0  ;;  %v390_v9 = vld [vmem:[#allocation4 + $0x30] sm:$0xff] (!%p1051_p6)  ;;  %v391_v10 = vld [vmem:[#allocation4 + $0x38] sm:$0xff] (!%p1051_p6)  ;;  %393 = vadd.xlane.f32.xlu0 (!%p1051_p6), %v392_v4  ;;  %v395_v11 = vadd.f32 (!%p1051_p6), %v387_v7, %v386_v6 }
  0xbb   : > { %375 = vst [vmem:[#allocation2 + $0x38] sm:$0xff] %v1564_v0  ;;  %376 = vst [vmem:[#allocation2 + $0x40] sm:$0xff] %v1564_v0  ;;  %399 = vadd.xlane.f32.xlu1 (!%p1051_p6), %v398_v8  ;;  %v401_v12 = vadd.f32 (!%p1051_p6), %v391_v10, %v390_v9  ;;  %v461_v54 = vsub.s32 (!%p1051_p6), 0, %v460_v49  ;;  %v465_v55 = vsub.s32 (!%p1051_p6), 1, %v460_v49  ;;  %v457_v56 = vld [vmem:[#allocation10] sm:$0x3] (!%p1051_p6) }
  0xbc   : > { %377 = vst [vmem:[#allocation2 + $0x48] sm:$0xff] %v1564_v0  ;;  %378 = vst [vmem:[#allocation2 + $0x50] sm:$0xff] %v1564_v0  ;;  %v477_v58 = vld [vmem:[#allocation12] sm:$0x3] (!%p1051_p6) }
  0xbd   : > { %379 = vst [vmem:[#allocation2 + $0x58] sm:$0xff] %v1564_v0  ;;  %v462_v59 = vrot.slane (!%p1051_p6), %v457_v56, %v461_v54  ;;  %v466_v60 = vrot.slane (!%p1051_p6), %v457_v56, %v465_v55  ;;  %v482_v62 = vrot.slane (!%p1051_p6), %v477_v58, %v461_v54  ;;  %v486_v63 = vrot.slane (!%p1051_p6), %v477_v58, %v465_v55 }
  0xbe   : > { %396 = vadd.xlane.f32.xlu0 (!%p1051_p6), %v395_v11 }
  0xbf   : > { %402 = vadd.xlane.f32.xlu1 %v401_v12 }
 0x147   : > { %v394_v13 = vpop.xlane.xlu0 %393 }
 0x148   : > { %v405_v14 = vmul.f32 0.00390625, %v394_v13  ;;  %v400_v15 = vpop.xlane.xlu1 %399 }
 0x149   : > { %v407_v16 = vmul.f32 0.00390625, %v400_v15 }
 0x14a   : > { %v409_v17 = vsub.f32 %v384_v1, %v405_v14  ;;  %v410_v18 = vsub.f32 %v385_v2, %v405_v14 }
 0x14b   : > { %v1855_v19 = vsub.f32 %v388_v3, %v407_v16  ;;  %v1857_v20 = vsub.f32 %v389_v5, %v407_v16  ;;  %v397_v21 = vpop.xlane.xlu0 %396 }
 0x14c   : > { %v406_v22 = vmul.f32 0.00390625, %v397_v21  ;;  %v403_v23 = vpop.xlane.xlu1 %402  ;;  %v417_v24 = vmul.f32 %v409_v17, %v409_v17  ;;  %v418_v25 = vmul.f32 %v410_v18, %v410_v18 }
 0x14d   : > { %v408_v26 = vmul.f32 0.00390625, %v403_v23  ;;  %v421_v27 = vmul.f32 %v1855_v19, %v1855_v19  ;;  %v422_v28 = vmul.f32 %v1857_v20, %v1857_v20 }
 0x14e   : > { %v411_v29 = vsub.f32 %v386_v6, %v406_v22  ;;  %v412_v30 = vsub.f32 %v387_v7, %v406_v22  ;;  %v425_v31 = vadd.f32 %v418_v25, %v417_v24 }
 0x14f   : > { %v415_v32 = vsub.f32 %v390_v9, %v408_v26  ;;  %v416_v33 = vsub.f32 %v391_v10, %v408_v26  ;;  %v431_v34 = vadd.f32 %v422_v28, %v421_v27 }
 0x150   : > { %426 = vadd.xlane.f32.xlu0 %v425_v31  ;;  %v419_v35 = vmul.f32 %v411_v29, %v411_v29  ;;  %v420_v36 = vmul.f32 %v412_v30, %v412_v30 }
 0x151   : > { %v423_v37 = vmul.f32 %v415_v32, %v415_v32  ;;  %v424_v38 = vmul.f32 %v416_v33, %v416_v33 }
 0x152   : > { %v428_v39 = vadd.f32 %v420_v36, %v419_v35 }
 0x153   : > { %v434_v40 = vadd.f32 %v424_v38, %v423_v37 }
 0x154   : > { %432 = vadd.xlane.f32.xlu0 %v431_v34  ;;  %429 = vadd.xlane.f32.xlu1 %v428_v39 }
 0x158   : > { %435 = vadd.xlane.f32.xlu1 %v434_v40 }
 0x1dd   : > { %v427_v41 = vpop.xlane.xlu0 %426 }
 0x1de   : > { %v437_v42 = vmul.f32 0.00390625, %v427_v41 }
 0x1e0   : > { %v441_v44 = vadd.f32 1e-05, %v437_v42 }
 0x1e1   : > { %v430_v45 = vpop.xlane.xlu1 %429  ;;  %v433_v46 = vpop.xlane.xlu0 %432 }
 0x1e2   : > { %1310 = vrsqrt.f32 %v441_v44  ;;  %v438_v47 = vmul.f32 0.00390625, %v430_v45  ;;  %v439_v48 = vmul.f32 0.00390625, %v433_v46 }
 0x1e4   : > { %v442_v50 = vadd.f32 1e-05, %v438_v47  ;;  %v443_v51 = vadd.f32 1e-05, %v439_v48 }
 0x1e5   : > { %v436_v52 = vpop.xlane.xlu1 %435 }
 0x1e6   : > { %1312 = vrsqrt.f32 %v442_v50  ;;  %v440_v53 = vmul.f32 0.00390625, %v436_v52 }
 0x1e7   : > { %1314 = vrsqrt.f32 %v443_v51 }
 0x1e8   : > { %v444_v57 = vadd.f32 1e-05, %v440_v53 }
 0x1ea   : > { %1316 = vrsqrt.f32 %v444_v57 }
 0x1ec   : > { %v1311_v61 = vpop.eup %1310 }
 0x1ed   : > { %v449_v0 = vmul.f32 %v1311_v61, %v409_v17  ;;  %v450_v1 = vmul.f32 %v1311_v61, %v410_v18 }
 0x1ef   : > { %v469_v2 = vmul.f32 %v462_v59, %v449_v0  ;;  %v470_v3 = vmul.f32 %v466_v60, %v450_v1 }
 0x1f0   : > { %v1313_v4 = vpop.eup %1312 }
 0x1f1   : > { %v1315_v5 = vpop.eup %1314  ;;  %v489_v6 = vadd.f32 %v482_v62, %v469_v2  ;;  %v490_v7 = vadd.f32 %v486_v63, %v470_v3  ;;  %v451_v8 = vmul.f32 %v1313_v4, %v411_v29  ;;  %v452_v9 = vmul.f32 %v1313_v4, %v412_v30 }
 0x1f2   : > { %v453_v10 = vmul.f32 %v1315_v5, %v1855_v19  ;;  %v454_v11 = vmul.f32 %v1315_v5, %v1857_v20 }
 0x1f3   : > { %497 = vst [vmem:[#allocation3] sm:$0xff] %v489_v6  ;;  %498 = vst [vmem:[#allocation3 + $0x8] sm:$0xff] %v490_v7  ;;  %v471_v12 = vmul.f32 %v462_v59, %v451_v8  ;;  %v472_v13 = vmul.f32 %v466_v60, %v452_v9 }
 0x1f4   : > { %v1317_v14 = vpop.eup %1316  ;;  %v473_v15 = vmul.f32 %v462_v59, %v453_v10  ;;  %v474_v16 = vmul.f32 %v466_v60, %v454_v11 }
 0x1f5   : > { %v491_v17 = vadd.f32 %v482_v62, %v471_v12  ;;  %v492_v18 = vadd.f32 %v486_v63, %v472_v13  ;;  %v455_v21 = vmul.f32 %v1317_v14, %v415_v32  ;;  %v456_v22 = vmul.f32 %v1317_v14, %v416_v33 }
 0x1f6   : > { %v493_v23 = vadd.f32 %v482_v62, %v473_v15  ;;  %v494_v24 = vadd.f32 %v486_v63, %v474_v16 }
 0x1f7   : > { %499 = vst [vmem:[#allocation3 + $0x10] sm:$0xff] %v491_v17  ;;  %500 = vst [vmem:[#allocation3 + $0x18] sm:$0xff] %v492_v18  ;;  %v475_v25 = vmul.f32 %v462_v59, %v455_v21  ;;  %v476_v26 = vmul.f32 %v466_v60, %v456_v22 }
 0x1f8   : > { %501 = vst [vmem:[#allocation3 + $0x20] sm:$0xff] %v493_v23  ;;  %502 = vst [vmem:[#allocation3 + $0x28] sm:$0xff] %v494_v24 }
 0x1f9   : > { %v495_v19 = vadd.f32 %v482_v62, %v475_v25  ;;  %v496_v20 = vadd.f32 %v486_v63, %v476_v26 }
 0x1fb   : > { %503 = vst [vmem:[#allocation3 + $0x30] sm:$0xff] %v495_v19  ;;  %504 = vst [vmem:[#allocation3 + $0x38] sm:$0xff] %v496_v20 }
 0x1fc PF: > { %v526_v27 = vld [vmem:[%s1838_s5 + $0x8] sm:$0xff]  ;;  %v529_v28 = vld [vmem:[%s1838_s5 + $0x20] sm:$0xff]  ;;  %v528_v31 = vld [vmem:[%s1838_s5 + $0x18] sm:$0xff]  ;;  %s1057_s24 = smul.u32 384, %s1544_s21  ;;  %s892_s12 = sshll.u32 %s1852_s28, 4  ;;  %s1979_s12 = int_to_ptr.vmem [resolvable:$true] %s892_s12 }
 0x1fd   : > { %v525_v29 = vld [vmem:[%s1838_s5] sm:$0xff]  ;;  %v1102_v30 = vpack.c.bf16 %v529_v28, %v526_v27  ;;  %v532_v32 = vld [vmem:[%s1838_s5 + $0x38] sm:$0xff]  ;;  %v535_v33 = vld [vmem:[%s1838_s5 + $0x50] sm:$0xff]  ;;  %s2086_s17 = sld [smem:[#allocation25_spill]]  ;;  %s876_s10 = scalar_lea.sflag [#allocation6], %s1835_s18 }
 0x1fe   : > { %v1104_v34 = vpack.c.bf16 %v528_v31, %v525_v29  ;;  %v1106_v35 = vpack.c.bf16 %v535_v33, %v532_v32  ;;  %v531_v36 = vld [vmem:[%s1838_s5 + $0x30] sm:$0xff]  ;;  %v534_v37 = vld [vmem:[%s1838_s5 + $0x48] sm:$0xff]  ;;  %v541_v39 = vld [vmem:[%s1838_s5 + $0x80] sm:$0xff]  ;;  %s1462_s25 = scalar_lea.vmem %s1979_s12, 1536  ;;  %p2087_p11 = scmp.ne.s32.totalorder %s2059_s29, 0 }
 0x1ff   : > { %v538_v38 = vld [vmem:[%s1838_s5 + $0x68] sm:$0xff]  ;;  %1103 = vmatprep.subr.bf16.mxu0 %v1102_v30  ;;  %v1108_v40 = vpack.c.bf16 %v534_v37, %v531_v36  ;;  %v537_v42 = vld [vmem:[%s1838_s5 + $0x60] sm:$0xff]  ;;  %v540_v43 = vld [vmem:[%s1838_s5 + $0x78] sm:$0xff]  ;;  %p1463_p5 = scmp.ne.s32.totalorder %s1979_s12, %s1462_s25  ;;  %s1565_s3 = smov [#allocation13]  }
 0x200   : > { %1105 = vmatpush1.bf16.msra.mxu0 %v1104_v34  ;;  %v1110_v41 = vpack.c.bf16 %v541_v39, %v538_v38  ;;  %v544_v44 = vld [vmem:[%s1838_s5 + $0x98] sm:$0xff]  ;;  %v547_v45 = vld [vmem:[%s1838_s5 + $0xb0] sm:$0xff]  ;;  %v1112_v46 = vpack.c.bf16 %v540_v43, %v537_v42  ;;  %v546_v49 = vld [vmem:[%s1838_s5 + $0xa8] sm:$0xff]  ;;  %s1466_s13 = sshll.u32 %s1565_s3, 4  ;;  %s1467_s13 = int_to_ptr.vmem [resolvable:$false] %s1466_s13 }
 0x201   : > { %1107 = vmatprep.subr.bf16.mxu0 %v1106_v35  ;;  %v1114_v47 = vpack.c.bf16 %v547_v45, %v544_v44  ;;  %v543_v48 = vld [vmem:[%s1838_s5 + $0x90] sm:$0xff]  ;;  %v550_v50 = vld [vmem:[%s1838_s5 + $0xc8] sm:$0xff]  ;;  %v553_v51 = vld [vmem:[%s1838_s5 + $0xe0] sm:$0xff]  ;;  %p1464_p10 = pnand %p1463_p5, %p2087_p11  ;;  %s1468_s8 = scalar_lea.vmem %s1467_s13, 3072 }
 0x202   : > { %v575_v52 = vld [vmem:[%s1838_s5 + $0x190] sm:$0xff]  ;;  %v578_v53 = vld [vmem:[%s1838_s5 + $0x1a8] sm:$0xff]  ;;  %v1116_v56 = vpack.c.bf16 %v546_v49, %v543_v48  ;;  %v549_v57 = vld [vmem:[%s1838_s5 + $0xc0] sm:$0xff]  ;;  %v1118_v61 = vpack.c.bf16 %v553_v51, %v550_v50  ;;  %p1469_p4 = scmp.lt.s32.totalorder %s1979_s12, %s1467_s13  ;;  %p1470_p0 = scmp.lt.s32.totalorder %s1468_s8, %s1462_s25 }
 0x203   : > { %v527_v54 = vld [vmem:[%s1838_s5 + $0x10] sm:$0xff]  ;;  %v530_v55 = vld [vmem:[%s1838_s5 + $0x28] sm:$0xff]  ;;  %v552_v58 = vld [vmem:[%s1838_s5 + $0xd8] sm:$0xff]  ;;  %v1166_v59 = vpack.c.bf16 %v578_v53, %v575_v52  ;;  %s1977_s21 = scalar_lea.hbm %s2086_s17, %s1057_s24  ;;  %p1465_p12 = pneg %p1464_p10 }
 0x204   : > { %1109 = vmatpush1.bf16.msra.mxu0 %v1108_v40  ;;  %v1168_v60 = vpack.c.bf16 %v530_v55, %v527_v54  ;;  %v556_v62 = vld [vmem:[%s1838_s5 + $0xf8] sm:$0xff]  ;;  %v581_v63 = vld [vmem:[%s1838_s5 + $0x1c0] sm:$0xff]  ;;  %v559_v1 = vld [vmem:[%s1838_s5 + $0x110] sm:$0xff]  ;;  %v1120_v6 = vpack.c.bf16 %v552_v58, %v549_v57  ;;  %p1471_p2 = por %p1470_p0, %p1469_p4 }
 0x205   : > { %1111 = vmatprep.subr.bf16.mxu0 %v1110_v41  ;;  %v584_v0 = vld [vmem:[%s1838_s5 + $0x1d8] sm:$0xff]  ;;  %1167 = vmatprep.subr.bf16.mxu1 %v1166_v59  ;;  %v533_v3 = vld [vmem:[%s1838_s5 + $0x40] sm:$0xff]  ;;  %v587_v7 = vld [vmem:[%s1838_s5 + $0x1f0] sm:$0xff]  ;;  %v1122_v10 = vpack.c.bf16 %v559_v1, %v556_v62 }
 0x206   : > { %v1170_v2 = vpack.c.bf16 %v584_v0, %v581_v63  ;;  %v536_v4 = vld [vmem:[%s1838_s5 + $0x58] sm:$0xff]  ;;  %1169 = vmatpush3.bf16.msra.mxu1 %v1168_v60  ;;  %v590_v8 = vld [vmem:[%s1838_s5 + $0x208] sm:$0xff]  ;;  %v539_v9 = vld [vmem:[%s1838_s5 + $0x70] sm:$0xff]  ;;  %p1472_p1 = pnand %p1471_p2, %p1465_p12 }
 0x207   : > { %v1172_v5 = vpack.c.bf16 %v536_v4, %v533_v3  ;;  %v555_v11 = vld [vmem:[%s1838_s5 + $0xf0] sm:$0xff]  ;;  %v558_v12 = vld [vmem:[%s1838_s5 + $0x108] sm:$0xff]  ;;  %v1174_v13 = vpack.c.bf16 %v590_v8, %v587_v7  ;;  %v565_v16 = vld [vmem:[%s1838_s5 + $0x140] sm:$0xff] }
 0x208   : > { %1113 = vmatpush1.bf16.msra.mxu0 %v1112_v46  ;;  %1171 = vmatprep.subr.bf16.mxu1 %v1170_v2  ;;  %v542_v14 = vld [vmem:[%s1838_s5 + $0x88] sm:$0xff]  ;;  %v593_v17 = vld [vmem:[%s1838_s5 + $0x220] sm:$0xff]  ;;  %v596_v21 = vld [vmem:[%s1838_s5 + $0x238] sm:$0xff]  ;;  %v1124_v22 = vpack.c.bf16 %v558_v12, %v555_v11 }
 0x209   : > { %1115 = vmatprep.subr.bf16.mxu0 %v1114_v47  ;;  %v562_v15 = vld [vmem:[%s1838_s5 + $0x128] sm:$0xff]  ;;  %v1176_v18 = vpack.c.bf16 %v542_v14, %v539_v9  ;;  %v561_v23 = vld [vmem:[%s1838_s5 + $0x120] sm:$0xff]  ;;  %v1178_v24 = vpack.c.bf16 %v596_v21, %v593_v17  ;;  %v548_v26 = vld [vmem:[%s1838_s5 + $0xb8] sm:$0xff] }
 0x20a   : > { %1173 = vmatpush3.bf16.msra.mxu1 %v1172_v5  ;;  %v545_v25 = vld [vmem:[%s1838_s5 + $0xa0] sm:$0xff]  ;;  %v1126_v19 = vpack.c.bf16 %v565_v16, %v562_v15  ;;  %v564_v20 = vld [vmem:[%s1838_s5 + $0x138] sm:$0xff]  ;;  %v599_v27 = vld [vmem:[%s1838_s5 + $0x250] sm:$0xff] }
 0x20b   : > { %1175 = vmatprep.subr.bf16.mxu1 %v1174_v13  ;;  %v602_v28 = vld [vmem:[%s1838_s5 + $0x268] sm:$0xff]  ;;  %v568_v29 = vld [vmem:[%s1838_s5 + $0x158] sm:$0xff]  ;;  %v571_v30 = vld [vmem:[%s1838_s5 + $0x170] sm:$0xff]  ;;  %v1180_v31 = vpack.c.bf16 %v548_v26, %v545_v25  ;;  %v1128_v32 = vpack.c.bf16 %v564_v20, %v561_v23 }
 0x20c   : > { %1117 = vmatpush1.bf16.msra.mxu0 %v1116_v56  ;;  %v567_v33 = vld [vmem:[%s1838_s5 + $0x150] sm:$0xff]  ;;  %v1182_v34 = vpack.c.bf16 %v602_v28, %v599_v27  ;;  %v554_v36 = vld [vmem:[%s1838_s5 + $0xe8] sm:$0xff]  ;;  %v1130_v37 = vpack.c.bf16 %v571_v30, %v568_v29  ;;  %v605_v39 = vld [vmem:[%s1838_s5 + $0x280] sm:$0xff] }
 0x20d   : > { %1119 = vmatprep.subr.bf16.mxu0 %v1118_v61  ;;  %v551_v35 = vld [vmem:[%s1838_s5 + $0xd0] sm:$0xff]  ;;  %v570_v38 = vld [vmem:[%s1838_s5 + $0x168] sm:$0xff]  ;;  %v608_v40 = vld [vmem:[%s1838_s5 + $0x298] sm:$0xff] }
 0x20e   : > { %1177 = vmatpush3.bf16.msra.mxu1 %v1176_v18  ;;  %v574_v41 = vld [vmem:[%s1838_s5 + $0x188] sm:$0xff]  ;;  %v577_v42 = vld [vmem:[%s1838_s5 + $0x1a0] sm:$0xff]  ;;  %v1184_v43 = vpack.c.bf16 %v554_v36, %v551_v35  ;;  %v1132_v44 = vpack.c.bf16 %v570_v38, %v567_v33  ;;  %v1186_v46 = vpack.c.bf16 %v608_v40, %v605_v39  ;;  %v560_v48 = vld [vmem:[%s1838_s5 + $0x118] sm:$0xff] }
 0x20f   : > { %1179 = vmatprep.subr.bf16.mxu1 %v1178_v24  ;;  %v573_v45 = vld [vmem:[%s1838_s5 + $0x180] sm:$0xff]  ;;  %v1134_v49 = vpack.c.bf16 %v577_v42, %v574_v41  ;;  %v576_v50 = vld [vmem:[%s1838_s5 + $0x198] sm:$0xff]  ;;  %v611_v51 = vld [vmem:[%s1838_s5 + $0x2b0] sm:$0xff] }
 0x210   : > { %1121 = vmatpush1.bf16.msra.mxu0 %v1120_v6  ;;  %v557_v47 = vld [vmem:[%s1838_s5 + $0x100] sm:$0xff]  ;;  %v614_v52 = vld [vmem:[%s1838_s5 + $0x2c8] sm:$0xff]  ;;  %v580_v53 = vld [vmem:[%s1838_s5 + $0x1b8] sm:$0xff]  ;;  %v1136_v57 = vpack.c.bf16 %v576_v50, %v573_v45 }
 0x211   : > { %1123 = vmatprep.subr.bf16.mxu0 %v1122_v10  ;;  %v583_v54 = vld [vmem:[%s1838_s5 + $0x1d0] sm:$0xff]  ;;  %v1188_v55 = vpack.c.bf16 %v560_v48, %v557_v47  ;;  %v506_v56 = vld [vmem:[#allocation3 + $0x8] sm:$0xff]  ;;  %v1190_v59 = vpack.c.bf16 %v614_v52, %v611_v51  ;;  %v617_v0 = vld [vmem:[%s1838_s5 + $0x2e0] sm:$0xff]  ;;  %v836_v51 = vlaneseq }
 0x212   : > { %1181 = vmatpush3.bf16.msra.mxu1 %v1180_v31  ;;  %v579_v58 = vld [vmem:[%s1838_s5 + $0x1b0] sm:$0xff]  ;;  %v566_v61 = vld [vmem:[%s1838_s5 + $0x148] sm:$0xff]  ;;  %v1138_v62 = vpack.c.bf16 %v583_v54, %v580_v53  ;;  %v620_v1 = vld [vmem:[%s1838_s5 + $0x2f8] sm:$0xff]  ;;  %774 = vmatprep.mubr.f32.mxu1 %v506_v56 }
 0x213   : > { %1183 = vmatprep.subr.bf16.mxu1 %v1182_v34  ;;  %v563_v60 = vld [vmem:[%s1838_s5 + $0x130] sm:$0xff]  ;;  %v582_v63 = vld [vmem:[%s1838_s5 + $0x1c8] sm:$0xff]  ;;  %v589_v3 = vld [vmem:[%s1838_s5 + $0x200] sm:$0xff]  ;;  %685 = vmatprep.mubr.f32.mxu0 %v506_v56  ;;  %v1194_v6 = vpack.c.bf16 %v620_v1, %v617_v0  ;;  %v837_v52 = vshrl.u32 %v836_v51, 7 }
 0x214   : > { %1125 = vmatpush1.bf16.msra.mxu0 %v1124_v22  ;;  %v586_v2 = vld [vmem:[%s1838_s5 + $0x1e8] sm:$0xff]  ;;  %v1192_v4 = vpack.c.bf16 %v566_v61, %v563_v60  ;;  %v1140_v5 = vpack.c.bf16 %v582_v63, %v579_v58  ;;  %v569_v7 = vld [vmem:[%s1838_s5 + $0x160] sm:$0xff]  ;;  %v572_v8 = vld [vmem:[%s1838_s5 + $0x178] sm:$0xff] }
 0x215   : > { %1127 = vmatprep.subr.bf16.mxu0 %v1126_v19  ;;  %v1142_v9 = vpack.c.bf16 %v589_v3, %v586_v2  ;;  %v585_v10 = vld [vmem:[%s1838_s5 + $0x1e0] sm:$0xff]  ;;  %v588_v11 = vld [vmem:[%s1838_s5 + $0x1f8] sm:$0xff]  ;;  %v595_v13 = vld [vmem:[%s1838_s5 + $0x230] sm:$0xff]  ;;  %v1196_v14 = vpack.c.bf16 %v572_v8, %v569_v7  ;;  %v846_v53 = vsub.s32 2, %v837_v52 }
 0x216   : > { %1185 = vmatpush3.bf16.msra.mxu1 %v1184_v43  ;;  %v592_v12 = vld [vmem:[%s1838_s5 + $0x218] sm:$0xff]  ;;  %v1144_v15 = vpack.c.bf16 %v588_v11, %v585_v10  ;;  %v591_v17 = vld [vmem:[%s1838_s5 + $0x210] sm:$0xff]  ;;  %v594_v18 = vld [vmem:[%s1838_s5 + $0x228] sm:$0xff] }
 0x217   : > { %1187 = vmatprep.subr.bf16.mxu1 %v1186_v46  ;;  %v1146_v16 = vpack.c.bf16 %v595_v13, %v592_v12  ;;  %v598_v21 = vld [vmem:[%s1838_s5 + $0x248] sm:$0xff]  ;;  %v601_v22 = vld [vmem:[%s1838_s5 + $0x260] sm:$0xff]  ;;  %v1148_v24 = vpack.c.bf16 %v594_v18, %v591_v17  ;;  %v508_v25 = vld [vmem:[#allocation3 + $0x18] sm:$0xff] }
 0x218   : > { %1129 = vmatpush1.bf16.msra.mxu0 %v1128_v32  ;;  %v505_v23 = vld [vmem:[#allocation3] sm:$0xff]  ;;  %v1150_v26 = vpack.c.bf16 %v601_v22, %v598_v21  ;;  %v600_v20 = vld [vmem:[%s1838_s5 + $0x258] sm:$0xff]  ;;  %v607_v28 = vld [vmem:[%s1838_s5 + $0x290] sm:$0xff] }
 0x219   : > { %1131 = vmatprep.subr.bf16.mxu0 %v1130_v37  ;;  %v597_v19 = vld [vmem:[%s1838_s5 + $0x240] sm:$0xff]  ;;  %v604_v27 = vld [vmem:[%s1838_s5 + $0x278] sm:$0xff]  ;;  %v507_v29 = vld [vmem:[#allocation3 + $0x10] sm:$0xff] }
 0x21a   : > { %1189 = vmatpush3.bf16.msra.mxu1 %v1188_v55  ;;  %v1152_v30 = vpack.c.bf16 %v600_v20, %v597_v19  ;;  %v510_v31 = vld [vmem:[#allocation3 + $0x28] sm:$0xff]  ;;  %v1154_v32 = vpack.c.bf16 %v607_v28, %v604_v27  ;;  %v603_v33 = vld [vmem:[%s1838_s5 + $0x270] sm:$0xff]  ;;  %v613_v36 = vld [vmem:[%s1838_s5 + $0x2c0] sm:$0xff] }
 0x21b   : > { %1191 = vmatprep.subr.bf16.mxu1 %v1190_v59  ;;  %v606_v34 = vld [vmem:[%s1838_s5 + $0x288] sm:$0xff]  ;;  %v509_v37 = vld [vmem:[#allocation3 + $0x20] sm:$0xff]  ;;  %v512_v39 = vld [vmem:[#allocation3 + $0x38] sm:$0xff] }
 0x21c   : > { %1133 = vmatpush1.bf16.msra.mxu0 %v1132_v44  ;;  %v610_v35 = vld [vmem:[%s1838_s5 + $0x2a8] sm:$0xff]  ;;  %v1156_v38 = vpack.c.bf16 %v606_v34, %v603_v33  ;;  %v609_v41 = vld [vmem:[%s1838_s5 + $0x2a0] sm:$0xff]  ;;  %v612_v42 = vld [vmem:[%s1838_s5 + $0x2b8] sm:$0xff] }
 0x21d   : > { %1135 = vmatprep.subr.bf16.mxu0 %v1134_v49  ;;  %v1158_v40 = vpack.c.bf16 %v613_v36, %v610_v35  ;;  %v616_v43 = vld [vmem:[%s1838_s5 + $0x2d8] sm:$0xff]  ;;  %v619_v44 = vld [vmem:[%s1838_s5 + $0x2f0] sm:$0xff]  ;;  %v1160_v46 = vpack.c.bf16 %v612_v42, %v609_v41  ;;  %v618_v49 = vld [vmem:[%s1838_s5 + $0x2e8] sm:$0xff] }
 0x21e   : > { %1193 = vmatpush3.bf16.msra.mxu1 %v1192_v4  ;;  %v511_v45 = vld [vmem:[#allocation3 + $0x30] sm:$0xff]  ;;  %v1162_v47 = vpack.c.bf16 %v619_v44, %v616_v43  ;;  %v834_v54 = vld [vmem:[%s1845_s26] sm:$0x7]  ;;  %v524_v10 = vld [vmem:[#allocation2 + $0x58] sm:$0xff] }
 0x21f   : > { %1195 = vmatprep.subr.bf16.mxu1 %v1194_v6  ;;  %v615_v48 = vld [vmem:[%s1838_s5 + $0x2d0] sm:$0xff]  ;;  %v847_v59 = vrot.slane %v834_v54, %v846_v53  ;;  %v521_v4 = vld [vmem:[#allocation2 + $0x40] sm:$0xff]  ;;  %v514_v22 = vld [vmem:[#allocation2 + $0x8] sm:$0xff] }
 0x220   : > { %1137 = vmatpush1.bf16.msra.mxu0 %v1136_v57  ;;  %v1164_v50 = vpack.c.bf16 %v618_v49, %v615_v48  ;;  %v515_v56 = vld [vmem:[#allocation2 + $0x10] sm:$0xff]  ;;  %v513_v18 = vld [vmem:[#allocation2] sm:$0xff]  ;;  %v516_v20 = vld [vmem:[#allocation2 + $0x18] sm:$0xff] }
 0x221   : > { %1139 = vmatprep.subr.bf16.mxu0 %v1138_v62  ;;  %v518_v62 = vld [vmem:[#allocation2 + $0x28] sm:$0xff]  ;;  %v517_v28 = vld [vmem:[#allocation2 + $0x20] sm:$0xff]  ;;  %v519_v34 = vld [vmem:[#allocation2 + $0x30] sm:$0xff] }
 0x222   : > { %1197 = vmatpush3.bf16.msra.mxu1 %v1196_v14  ;;  %v838_v14 = vsub.s32 0, %v837_v52  ;;  %v520_v36 = vld [vmem:[#allocation2 + $0x38] sm:$0xff]  ;;  %v522_v42 = vld [vmem:[#allocation2 + $0x48] sm:$0xff]  ;;  %v523_v44 = vld [vmem:[#allocation2 + $0x50] sm:$0xff] }
 0x224   : > { %1141 = vmatpush1.bf16.msra.mxu0 %v1140_v5  ;;  %v839_v21 = vrot.slane %v834_v54, %v838_v14 }
 0x225   : > { %1143 = vmatprep.subr.bf16.mxu0 %v1142_v9  ;;  %775 = vmatmul.mubr.f32.vlgmr.msra.gmra.mrb[0].mxu1 %v505_v23 }
 0x226   : > { %779 = vmatprep.mubr.f32.mxu1 %v508_v25 }
 0x228   : > { %1145 = vmatpush1.bf16.msra.mxu0 %v1144_v15 }
 0x229   : > { %1147 = vmatprep.subr.bf16.mxu0 %v1146_v16  ;;  %780 = vmatmul.mubr.f32.gmra.mrb[2].mxu1 %v507_v29  ;;  %v842_v16 = vsub.s32 1, %v837_v52 }
 0x22a   : > { %784 = vmatprep.mubr.f32.mxu1 %v510_v31 }
 0x22c   : > { %1149 = vmatpush1.bf16.msra.mxu0 %v1148_v24  ;;  %v843_v24 = vrot.slane %v834_v54, %v842_v16 }
 0x22d   : > { %1151 = vmatprep.subr.bf16.mxu0 %v1150_v26  ;;  %785 = vmatmul.mubr.f32.gmra.mrb[4].mxu1 %v509_v37 }
 0x22e   : > { %789 = vmatprep.mubr.f32.mxu1 %v512_v39 }
 0x230   : > { %1153 = vmatpush1.bf16.msra.mxu0 %v1152_v30 }
 0x231   : > { %1155 = vmatprep.subr.bf16.mxu0 %v1154_v32  ;;  %790 = vmatmul.mubr.f32.gmra.mrb[6].mxu1 %v511_v45 }
 0x234   : > { %1157 = vmatpush1.bf16.msra.mxu0 %v1156_v38 }
 0x235   : > { %1159 = vmatprep.subr.bf16.mxu0 %v1158_v40 }
 0x238   : > { %1161 = vmatpush1.bf16.msra.mxu0 %v1160_v46 }
 0x239   : > { %1163 = vmatprep.subr.bf16.mxu0 %v1162_v47 }
 0x23c   : > { %1165 = vmatpush1.bf16.msra.mxu0 %v1164_v50 }
 0x23f   : > { %686 = vmatmul.mubr.f32.vlgmr.msra.gmra.mrb[0].mxu0 %v505_v23 }
 0x240   : > { %691 = vmatprep.mubr.f32.mxu0 %v508_v25 }
 0x243   : > { %692 = vmatmul.mubr.f32.gmra.mrb[2].mxu0 %v507_v29 }
 0x244   : > { %697 = vmatprep.mubr.f32.mxu0 %v510_v31 }
 0x247   : > { %698 = vmatmul.mubr.f32.gmra.mrb[4].mxu0 %v509_v37 }
 0x248   : > { %703 = vmatprep.mubr.f32.mxu0 %v512_v39 }
 0x24b   : > { %704 = vmatmul.mubr.f32.gmra.mrb[6].mxu0 %v511_v45 }
 0x2f8   : > { %v1090_v55 = vpop.f32.mrb[0].mxu1 }
 0x2f9   : > { %v1091_v57 = vpop.f32.mrb[1].mxu1 }
 0x2fa   : > { %v1092_v58 = vadd.f32 %v1091_v57, %v1090_v55 }
 0x2fc   : > { %v797_v60 = vadd.f32 %v1092_v58, %v515_v56  ;;  %v1093_v61 = vpop.f32.mrb[2].mxu1 }
 0x2fd   : > { %v1094_v63 = vpop.f32.mrb[3].mxu1 }
 0x2fe   : > { %809 = vst [vmem:[#allocation2 + $0x10] sm:$0xff] %v797_v60  ;;  %v853_v0 = vadd.f32 %v847_v59, %v797_v60  ;;  %v1095_v1 = vadd.f32 %v1094_v63, %v1093_v61 }
 0x300   : > { %865 = vst [vmem:[%s1852_s28 + $0x10] sm:$0xff] %v853_v0  ;;  %v800_v2 = vadd.f32 %v1095_v1, %v518_v62  ;;  %v1096_v3 = vpop.f32.mrb[4].mxu1 }
 0x301   : > { %v1097_v5 = vpop.f32.mrb[5].mxu1 }
 0x302   : > { %812 = vst [vmem:[#allocation2 + $0x28] sm:$0xff] %v800_v2  ;;  %v856_v6 = vadd.f32 %v847_v59, %v800_v2  ;;  %v1098_v7 = vadd.f32 %v1097_v5, %v1096_v3 }
 0x304   : > { %868 = vst [vmem:[%s1852_s28 + $0x28] sm:$0xff] %v856_v6  ;;  %v803_v8 = vadd.f32 %v1098_v7, %v521_v4  ;;  %v1099_v9 = vpop.f32.mrb[6].mxu1 }
 0x305   : > { %v1100_v11 = vpop.f32.mrb[7].mxu1 }
 0x306   : > { %815 = vst [vmem:[#allocation2 + $0x40] sm:$0xff] %v803_v8  ;;  %v859_v12 = vadd.f32 %v847_v59, %v803_v8  ;;  %v1101_v13 = vadd.f32 %v1100_v11, %v1099_v9 }
 0x308   : > { %871 = vst [vmem:[%s1852_s28 + $0x40] sm:$0xff] %v859_v12  ;;  %v806_v15 = vadd.f32 %v1101_v13, %v524_v10 }
 0x30a   : > { %818 = vst [vmem:[#allocation2 + $0x58] sm:$0xff] %v806_v15  ;;  %v862_v17 = vadd.f32 %v847_v59, %v806_v15 }
 0x30c   : > { %874 = vst [vmem:[%s1852_s28 + $0x58] sm:$0xff] %v862_v17 }
 0x312   : > { %v687_v23 = vpop.f32.mrb[0].mxu0 }
 0x313   : > { %v795_v25 = vadd.f32 %v687_v23, %v513_v18  ;;  %v689_v26 = vpop.f32.mrb[1].mxu0 }
 0x314   : > { %v796_v19 = vadd.f32 %v689_v26, %v514_v22 }
 0x315   : > { %807 = vst [vmem:[#allocation2] sm:$0xff] %v795_v25  ;;  %v851_v27 = vadd.f32 %v839_v21, %v795_v25 }
 0x316   : > { %808 = vst [vmem:[#allocation2 + $0x8] sm:$0xff] %v796_v19  ;;  %v852_v29 = vadd.f32 %v843_v24, %v796_v19  ;;  %v693_v30 = vpop.f32.mrb[2].mxu0 }
 0x317   : > { %863 = vst [vmem:[%s1852_s28] sm:$0xff] %v851_v27  ;;  %v798_v31 = vadd.f32 %v693_v30, %v516_v20  ;;  %v695_v32 = vpop.f32.mrb[3].mxu0 }
 0x318   : > { %864 = vst [vmem:[%s1852_s28 + $0x8] sm:$0xff] %v852_v29  ;;  %v799_v33 = vadd.f32 %v695_v32, %v517_v28 }
 0x319   : > { %810 = vst [vmem:[#allocation2 + $0x18] sm:$0xff] %v798_v31  ;;  %v854_v35 = vadd.f32 %v839_v21, %v798_v31 }
 0x31a   : > { %811 = vst [vmem:[#allocation2 + $0x20] sm:$0xff] %v799_v33  ;;  %v855_v37 = vadd.f32 %v843_v24, %v799_v33  ;;  %v699_v38 = vpop.f32.mrb[4].mxu0 }
 0x31b   : > { %866 = vst [vmem:[%s1852_s28 + $0x18] sm:$0xff] %v854_v35  ;;  %v801_v39 = vadd.f32 %v699_v38, %v519_v34  ;;  %v701_v40 = vpop.f32.mrb[5].mxu0 }
 0x31c   : > { %867 = vst [vmem:[%s1852_s28 + $0x20] sm:$0xff] %v855_v37  ;;  %v802_v41 = vadd.f32 %v701_v40, %v520_v36 }
 0x31d   : > { %813 = vst [vmem:[#allocation2 + $0x30] sm:$0xff] %v801_v39  ;;  %v857_v43 = vadd.f32 %v839_v21, %v801_v39 }
 0x31e   : > { %814 = vst [vmem:[#allocation2 + $0x38] sm:$0xff] %v802_v41  ;;  %v858_v45 = vadd.f32 %v843_v24, %v802_v41  ;;  %v705_v46 = vpop.f32.mrb[6].mxu0 }
 0x31f   : > { %869 = vst [vmem:[%s1852_s28 + $0x30] sm:$0xff] %v857_v43  ;;  %v804_v47 = vadd.f32 %v705_v46, %v522_v42  ;;  %v707_v48 = vpop.f32.mrb[7].mxu0 }
 0x320   : > { %870 = vst [vmem:[%s1852_s28 + $0x38] sm:$0xff] %v858_v45  ;;  %v805_v49 = vadd.f32 %v707_v48, %v523_v44 }
 0x321   : > { %816 = vst [vmem:[#allocation2 + $0x48] sm:$0xff] %v804_v47  ;;  %v860_v50 = vadd.f32 %v839_v21, %v804_v47 }
 0x322   : > { %817 = vst [vmem:[#allocation2 + $0x50] sm:$0xff] %v805_v49  ;;  %v861_v51 = vadd.f32 %v843_v24, %v805_v49 }
 0x323   : > { %872 = vst [vmem:[%s1852_s28 + $0x48] sm:$0xff] %v860_v50 }
 0x324   : > { %873 = vst [vmem:[%s1852_s28 + $0x50] sm:$0xff] %v861_v51 }
 0x325   : > { %1475 = shalt.err (!%p1472_p1)
}
 0x326   : > { %s1476_s14 = scalar_lea.hbm %s1977_s21, 1536  ;;  %s1480_s15 = scalar_lea.hbm %s2086_s17, 3072 }
 0x327   : > { %p1477_p3 = scmp.ne.s32.totalorder %s1977_s21, %s1476_s14  ;;  %p1481_p8 = scmp.lt.u32.totalorder %s1977_s21, %s2086_s17 }
 0x328   : > { %p1482_p13 = scmp.lt.u32.totalorder %s1480_s15, %s1476_s14  ;;  %p1484_p5 = scmp.lt.u32.totalorder %s1476_s14, %s1977_s21 }
 0x329   : > { %p1478_p7 = pnand %p1477_p3, %p2087_p11 }
 0x32a   : > { %p1483_p6 = por %p1482_p13, %p1481_p8 }
 0x32b   : > { %p1479_p9 = pneg %p1478_p7 }
 0x32c   : > { %p1485_p10 = por %p1484_p5, %p1483_p6 }
 0x32e   : > { %p1486_p12 = pnand %p1485_p10, %p1479_p9 }
 0x330   : > { %1489 = shalt.err (!%p1486_p12)
}
 0x331   : > { %s1566_s11 = smov 384   ;;  %s1567_s5 = smov 768  }
 0x332   : > { %s1568_s6 = smov 24  }
 0x333   : > { %1219 = dma.vmem_to_hbm [thread:$0]  (%p2087_p11), %s1979_s12, 1536, %s1977_s21, %s876_s10, %s1566_s11, %s1567_s5, %s1568_s6  }
 0x334 PF: > { %s2088_s26 = sld [smem:[#allocation18_spill]]  ;;  %s2089_s23 = sld [smem:[#allocation20_spill]] }
 0x335   : > { %s2090_s28 = sld [smem:[#allocation19_spill]] }
 0x33a   : > { %s907_s24 = sand.u32 1, %s2088_s26   ;;  %p2091_p4 = scmp.ne.s32.totalorder %s2089_s23, 0 }
 0x33b   : > { %p2092_p0 = scmp.ge.s32.totalorder %s2090_s28, 2  ;;  %s908_s27 = scalar_lea.sflag [#allocation6], %s907_s24 }
 0x33d   : > { %p1239_p2 = pnand %p2092_p0, %p2091_p4 }
 0x33f   : > { %1527 = dma.done.wait (!%p1239_p2), %s908_s27, 1536  }
 0x340   : > { %1529 = vsyncadd (!%p1239_p2), %s908_s27, 4294965760  ;;  %s23_s23 = sadd.s32 1, %s2090_s28   ;;  %s2093_s16 = sld [smem:[#allocation22_spill]] }
 0x341   : > { %p20_p1 = scmp.ge.s32.totalorder %s23_s23, 4   ;;  %s2094_s29 = sld [smem:[#allocation21_spill]] }
 0x342   : > { %s2095_s18 = smov %s1536_s19  ;;  %s2096_s19 = smov %s1540_s20 }
 0x343   : > { %s2098_s21 = smov %s1548_s22  ;;  %22 = sbr.rel (!%p20_p1) target bundleno = 12 (0xc), region = 122 }
 0x346   : > { %s2097_s20 = smov %s2093_s16 }
 0x347   : > { %s2099_s22 = smov %s2094_s29 }
 0x34a   :  { %913 = vsyncpa [#allocation5], 1 }
 0x34b   :  { %915 = vsyncpa [#allocation5 + $0x1], 1 }
 0x34c   :  { %916 = vsyncpa [#allocation8], 1 }
 0x34d   :  { %918 = vsyncpa [#allocation8 + $0x1], 1 }
 0x34e   :  { %919 = vsyncpa [#allocation11], 1 }
 0x34f   :  { %920 = vsyncpa [#allocation6], 1 }
 0x350   :  { %922 = vsyncpa [#allocation6 + $0x1], 1 }

// kernel: gpt_forward.12
= control target key start
LH: loop header
LB: loop body
LE: loop exit
PB: predicated region body
PF: predicated region fallthrough
CT: control target
= control target key end

     0   :  { %s3039_s0 = inlined_call_operand.hbm [shape: f32[32,256], index: 0, kind: input, shape index: {}]   ;;  %s3040_s1 = inlined_call_operand.hbm [shape: f32[256,1024], index: 1, kind: input, shape index: {}]   ;;  %s3041_s2 = inlined_call_operand.hbm [shape: f32[1,1024], index: 2, kind: input, shape index: {}]   ;;  %s3042_s3 = inlined_call_operand.hbm [shape: f32[1024,256], index: 3, kind: input, shape index: {}]   ;;  %s3043_s4 = inlined_call_operand.hbm [shape: f32[1,256], index: 4, kind: input, shape index: {}]   ;;  %s3044_s5 = inlined_call_operand.hbm [shape: f32[1,256], index: 5, kind: input, shape index: {}]   ;;  %s3045_s6 = inlined_call_operand.hbm [shape: f32[1,256], index: 6, kind: input, shape index: {}]   ;;  %s3046_s7 = inlined_call_operand.hbm [shape: f32[32,256], index: 7, kind: output, shape index: {}]  }
   0x1   :  { %3065 = sst [smem:[#allocation28_spill]] %s3040_s1 }
   0x2   :  { %3066 = sst [smem:[#allocation29_spill]] %s3043_s4 }
   0x3   :  { %3067 = sst [smem:[#allocation30_spill]] %s3044_s5 }
   0x4   :  { %3068 = sst [smem:[#allocation31_spill]] %s3046_s7 }
   0x5   :  { %12 = vsyncpa [#allocation5], 0 }
   0x6   :  { %13 = vsyncpa [#allocation8], 0 }
   0x7   :  { %15 = vsyncpa [#allocation8 + $0x1], 0 }
   0x8   :  { %16 = vsyncpa [#allocation11], 0 }
   0x9   :  { %18 = vsyncpa [#allocation11 + $0x1], 0 }
   0xa   :  { %19 = vsyncpa [#allocation14], 0 }
   0xb   :  { %20 = vsyncpa [#allocation6], 0  ;;  %s2354_s24 = smov 0   ;;  %s2356_s25 = smov 0  }
   0xc   :  { %s2358_s26 = smov 0   ;;  %s2360_s27 = smov 0  }
   0xd   :  { %s2362_s28 = smov 0   ;;  %s2364_s29 = smov 0  }
   0xe LB: > { %3069 = sst [smem:[#allocation23_spill]] %s2280_s25  ;;  %s2383_s30 = sadd.s32 4294967295, %s2296_s29   ;;  %s2296_s29 = sphi %s2364_s29, %s26_s29   ;;  %s2292_s28 = sphi %s2362_s28, %s3108_s28   ;;  %s2288_s27 = sphi %s2360_s27, %s3107_s27   ;;  %s2284_s26 = sphi %s2358_s26, %s3106_s26   ;;  %s2280_s25 = sphi %s2356_s25, %s3105_s25   ;;  %s2276_s24 = sphi %s2354_s24, %s3102_s24  }
   0xf   : > { %3070 = sst [smem:[#allocation24_spill]] %s2288_s27  ;;  %p84_p0 = scmp.ne.s32.totalorder %s2280_s25, %s2276_s24 }
  0x10   : > { %p3047_p1 = scmp.eq.s32.totalorder %s2383_s30, 0  ;;  %p1539_p2 = scmp.ge.s32.totalorder %s2296_s29, 1 }
  0x11   : > { %p236_p3 = scmp.lt.s32.totalorder %s2296_s29, 3  ;;  %s2298_s10 = smov [#allocation12]  }
  0x12   : > { %p2391_p4 = por %p3047_p1, %p84_p0  ;;  %s266_s11 = sshll.u32 %s2298_s10, 4  ;;  %s267_s11 = int_to_ptr.vmem [resolvable:$true] %s266_s11 }
  0x13   : > { %p2395_p5 = pnand %p1539_p2, %p236_p3  ;;  %s2299_s12 = smov [#allocation13]  }
  0x14   : > { %s3071_s8 = scalar_select %p2391_p4, 1, 0 }
  0x15   : > { %s3073_s9 = scalar_select %p2395_p5, 1, 0 }
  0x16   : > { %3072 = sst [smem:[#allocation25_spill]] %s3071_s8  ;;  %p1863_p6 = pneg %p2395_p5 }
  0x17   : > { %s277_s13 = sshll.u32 %s2299_s12, 4  ;;  %s3075_s4 = sld [smem:[#allocation29_spill]]  ;;  %s2407_s13 = int_to_ptr.vmem [resolvable:$true] %s277_s13 }
  0x18   : > { %p2403_p7 = pnand %p1863_p6, %p3047_p1 }
  0x1a   : > { %s3074_s14 = scalar_select %p2403_p7, 1, 0 }
  0x1b   : > { %p2417_p9 = pneg %p2403_p7 }
  0x1d   : > { %s1998_s17 = scalar_lea.hbm %s3075_s4, 32 }
  0x1e   : > { %p1999_p8 = scmp.ne.s32.totalorder %s3075_s4, %s1998_s17  ;;  %p2005_p12 = scmp.lt.u32.totalorder %s1998_s17, %s3075_s4 }
  0x1f   : > { %s3076_s20 = scalar_select %p2417_p9, 1, 0 }
  0x20   : > { %p2001_p10 = pnand %p2417_p9, %p1999_p8 }
  0x22   : > { %p2002_p11 = pneg %p2001_p10 }
  0x24   : > { %p2007_p13 = pnand %p2005_p12, %p2002_p11 }
  0x26   : > { %2010 = shalt.err (!%p2007_p13)
}
  0x27   : > { %s2011_s23 = scalar_lea.vmem %s267_s11, 32  ;;  %p2019_p6 = scmp.lt.s32.totalorder %s267_s11, %s267_s11 }
  0x28   : > { %p2012_p0 = scmp.ne.s32.totalorder %s267_s11, %s2011_s23  ;;  %p2020_p1 = scmp.lt.s32.totalorder %s2011_s23, %s2011_s23 }
  0x2a   : > { %p2014_p2 = pnand %p2012_p0, %p2417_p9  ;;  %p2021_p4 = por %p2020_p1, %p2019_p6 }
  0x2c   : > { %p2015_p3 = pneg %p2014_p2 }
  0x2e   : > { %p2022_p5 = pnand %p2021_p4, %p2015_p3 }
  0x30   : > { %2025 = shalt.err (!%p2022_p5)
}
  0x31   : > { %1869 = dma.hbm_to_vmem [thread:$0]  (!%p2403_p7), %s3075_s4, 32, %s267_s11, [#allocation11]  }
  0x32   : > { %s3077_s5 = sld [smem:[#allocation30_spill]] }
  0x38   : > { %s2026_s16 = scalar_lea.hbm %s3077_s5, 32 }
  0x39   : > { %p2027_p8 = scmp.ne.s32.totalorder %s3077_s5, %s2026_s16  ;;  %p2033_p4 = scmp.lt.u32.totalorder %s2026_s16, %s3077_s5 }
  0x3b   : > { %p2029_p10 = pnand %p2027_p8, %p2417_p9 }
  0x3d   : > { %p2030_p1 = pneg %p2029_p10 }
  0x3f   : > { %p2035_p5 = pnand %p2033_p4, %p2030_p1 }
  0x41   : > { %2038 = shalt.err (!%p2035_p5)
}
  0x42   : > { %s2039_s11 = scalar_lea.vmem %s2407_s13, 32  ;;  %p2047_p0 = scmp.lt.s32.totalorder %s2407_s13, %s2407_s13 }
  0x43   : > { %p2040_p11 = scmp.ne.s32.totalorder %s2407_s13, %s2039_s11  ;;  %p2048_p2 = scmp.lt.s32.totalorder %s2039_s11, %s2039_s11 }
  0x45   : > { %p2042_p12 = pnand %p2040_p11, %p2417_p9  ;;  %p2049_p3 = por %p2048_p2, %p2047_p0 }
  0x47   : > { %p2043_p13 = pneg %p2042_p12 }
  0x49   : > { %p2050_p6 = pnand %p2049_p3, %p2043_p13 }
  0x4b   : > { %2053 = shalt.err (!%p2050_p6)
}
  0x4c   : > { %1872 = dma.hbm_to_vmem [thread:$0]  (!%p2403_p7), %s3077_s5, 32, %s2407_s13, [#allocation14]  }
  0x4d   : > { %s35_s24 = sadd.s32 1, %s2292_s28  ;;  %s71_s10 = sadd.s32 1, %s2284_s26 }
  0x4e   : > { %p36_p8 = scmp.ge.s32.totalorder %s35_s24, 2  ;;  %p78_p10 = scmp.ne.s32.totalorder %s2284_s26, %s2280_s25 }
  0x4f   : > { %p79_p1 = scmp.eq.s32.totalorder %s2296_s29, 0  ;;  %p1890_p4 = scmp.lt.s32.totalorder %s2296_s29, 2 }
  0x50   : > { %s3110_s24 = smov (%p36_p8, %s35_s24), 0  ;;  %s3051_s12 = sand.u32 1, %s2296_s29  }
  0x51   : > { %3078 = sst [smem:[#allocation26_spill]] %s3110_s24  ;;  %p80_p5 = por %p79_p1, %p78_p10 }
  0x52   : > { %s68_s15 = ssub.s32 %s2292_s28, %s3110_s24  ;;  %s3050_s16 = sand.u32 1, %s2284_s26  }
  0x53   : > { %p69_p11 = scmp.eq.s32.totalorder %s68_s15, 0  ;;  %s2470_s17 = sshll.u32 %s3050_s16, 10 }
  0x54   : > { %s1569_s13 = sshll.u32 %s2292_s28, 9  ;;  %s3080_s1 = sld [smem:[#allocation28_spill]] }
  0x55   : > { %s2474_s18 = scalar_select %p69_p11, %s2284_s26, %s71_s10  }
  0x56   : > { %s303_s22 = scalar_lea.vmem [#allocation7], %s2470_s17  ;;  %p2484_p12 = pnand %p1890_p4, %p80_p5 }
  0x57   : > { %3079 = sst [smem:[#allocation27_spill]] %s2474_s18  ;;  %s310_s23 = sshll.u32 %s303_s22, 4  ;;  %s2488_s23 = int_to_ptr.vmem [resolvable:$true] %s310_s23 }
  0x58   : > { %s3081_s15 = scalar_select %p2484_p12, 1, 0 }
  0x59   : > { %s2492_s10 = scalar_lea.sflag [#allocation8], %s3051_s12  ;;  %p2498_p0 = pneg %p2484_p12 }
  0x5a   : > { %s2479_s11 = scalar_lea.hbm %s3080_s1, %s1569_s13  ;;  %s2059_s16 = scalar_lea.hbm %s3080_s1, 32768 }
  0x5b   : > { %s2054_s19 = scalar_lea.hbm %s2479_s11, 16384  ;;  %p2060_p6 = scmp.lt.u32.totalorder %s2479_s11, %s3080_s1 }
  0x5c   : > { %p2055_p13 = scmp.ne.s32.totalorder %s2479_s11, %s2054_s19  ;;  %p2061_p8 = scmp.lt.u32.totalorder %s2059_s16, %s2054_s19 }
  0x5d   : > { %s3082_s13 = scalar_select %p2498_p0, 1, 0 }
  0x5e   : > { %p2057_p2 = pnand %p2498_p0, %p2055_p13  ;;  %p2062_p10 = por %p2061_p8, %p2060_p6 }
  0x5f   : > { %p2063_p1 = scmp.lt.u32.totalorder %s2054_s19, %s2479_s11 }
  0x60   : > { %p2058_p3 = pneg %p2057_p2 }
  0x61   : > { %p2064_p4 = por %p2063_p1, %p2062_p10 }
  0x63   : > { %p2065_p5 = pnand %p2064_p4, %p2058_p3 }
  0x65   : > { %2068 = shalt.err (!%p2065_p5)
}
  0x66   : > { %s2069_s12 = scalar_lea.vmem %s2488_s23, 16384  ;;  %s2300_s21 = smov [#allocation7]  }
  0x67   : > { %p2070_p11 = scmp.ne.s32.totalorder %s2488_s23, %s2069_s12  ;;  %s2074_s22 = sshll.u32 %s2300_s21, 4  ;;  %s2075_s22 = int_to_ptr.vmem [resolvable:$false] %s2074_s22 }
  0x68   : > { %s2076_s4 = scalar_lea.vmem %s2075_s22, 32768  ;;  %p2077_p7 = scmp.lt.s32.totalorder %s2488_s23, %s2075_s22 }
  0x69   : > { %p2072_p13 = pnand %p2070_p11, %p2498_p0  ;;  %p2078_p9 = scmp.lt.s32.totalorder %s2076_s4, %s2069_s12 }
  0x6b   : > { %p2073_p2 = pneg %p2072_p13  ;;  %p2079_p6 = por %p2078_p9, %p2077_p7 }
  0x6d   : > { %p2080_p8 = pnand %p2079_p6, %p2073_p2 }
  0x6f   : > { %2083 = shalt.err (!%p2080_p8)
}
  0x70   : > { %s2301_s5 = smov 1024   ;;  %s2302_s16 = smov 512  }
  0x71   : > { %s2303_s19 = smov 32   ;;  %s2304_s1 = smov [#allocation4]  }
  0x72   : > { %1879 = dma.hbm_to_vmem [thread:$0]  (!%p2484_p12), %s2479_s11, 16384, %s2488_s23, %s2492_s10, %s2301_s5, %s2302_s16, %s2303_s19  }
  0x73   : > { %s252_s24 = sshll.u32 %s2304_s1, 4  ;;  %s2084_s12 = scalar_lea.hbm %s3039_s0, 1024  ;;  %s253_s24 = int_to_ptr.vmem [resolvable:$true] %s252_s24 }
  0x74   : > { %p2085_p7 = scmp.ne.s32.totalorder %s3039_s0, %s2084_s12  ;;  %p3083_p9 = scmp.ne.s32.totalorder %s3076_s20, 0 }
  0x75   : > { %p2091_p1 = scmp.lt.u32.totalorder %s2084_s12, %s3039_s0 }
  0x76   : > { %p2087_p3 = pnand %p2085_p7, %p3083_p9 }
  0x78   : > { %p2088_p10 = pneg %p2087_p3 }
  0x7a   : > { %p2093_p4 = pnand %p2091_p1, %p2088_p10 }
  0x7c   : > { %2096 = shalt.err (!%p2093_p4)
}
  0x7d   : > { %s2097_s11 = scalar_lea.vmem %s253_s24, 1024  ;;  %p2105_p2 = scmp.lt.s32.totalorder %s253_s24, %s253_s24 }
  0x7e   : > { %p2098_p5 = scmp.ne.s32.totalorder %s253_s24, %s2097_s11  ;;  %p2106_p6 = scmp.lt.s32.totalorder %s2097_s11, %s2097_s11 }
  0x80   : > { %p2100_p11 = pnand %p2098_p5, %p3083_p9  ;;  %p2107_p8 = por %p2106_p6, %p2105_p2 }
  0x82   : > { %p2101_p13 = pneg %p2100_p11 }
  0x84   : > { %p2108_p12 = pnand %p2107_p8, %p2101_p13 }
  0x86   : > { %2111 = shalt.err (!%p2108_p12)
}
  0x87   : > { %s2305_s1 = smov 256   ;;  %s2306_s7 = smov 16  }
  0x88   : > { %p3084_p7 = scmp.ne.s32.totalorder %s3074_s14, 0  ;;  %s3085_s23 = sand.u32 1, %s2284_s26  }
  0x89   : > { %s1548_s5 = sshll.u32 %s3085_s23, 2  ;;  %s2307_s16 = smov [#allocation15]  }
  0x8a   : > { %1866 = dma.hbm_to_vmem [thread:$0]  (!%p3084_p7), %s3039_s0, 1024, %s253_s24, [#allocation5], %s2305_s1, %s2305_s1, %s2306_s7  }
  0x8b   : > { %s288_s19 = sshll.u32 %s2307_s16, 4  ;;  %s1570_s21 = sshll.u32 %s2292_s28, 6  ;;  %s289_s19 = int_to_ptr.vmem [resolvable:$true] %s288_s19 }
  0x8c   : > { %s2112_s4 = scalar_lea.hbm %s3045_s6, 32 }
  0x8d   : > { %p2113_p12 = scmp.ne.s32.totalorder %s3045_s6, %s2112_s4  ;;  %p2119_p1 = scmp.lt.u32.totalorder %s2112_s4, %s3045_s6 }
  0x8f   : > { %p2115_p3 = pnand %p2113_p12, %p3083_p9 }
  0x91   : > { %p2116_p10 = pneg %p2115_p3 }
  0x93   : > { %p2121_p4 = pnand %p2119_p1, %p2116_p10 }
  0x95   : > { %2124 = shalt.err (!%p2121_p4)
}
  0x96   : > { %s2125_s24 = scalar_lea.vmem %s289_s19, 32  ;;  %p2133_p2 = scmp.lt.s32.totalorder %s289_s19, %s289_s19 }
  0x97   : > { %p2126_p5 = scmp.ne.s32.totalorder %s289_s19, %s2125_s24  ;;  %p2134_p6 = scmp.lt.s32.totalorder %s2125_s24, %s2125_s24 }
  0x99   : > { %p2128_p11 = pnand %p2126_p5, %p3083_p9  ;;  %p2135_p8 = por %p2134_p6, %p2133_p2 }
  0x9b   : > { %p2129_p13 = pneg %p2128_p11 }
  0x9d   : > { %p2136_p0 = pnand %p2135_p8, %p2129_p13 }
  0x9f   : > { %2139 = shalt.err (!%p2136_p0)
}
  0xa0   : > { %1875 = dma.hbm_to_vmem [thread:$0]  (!%p3084_p7), %s3045_s6, 32, %s289_s19, [#allocation14]  }
  0xa1   : > { %s2567_s16 = scalar_lea.hbm %s3041_s2, %s1570_s21  ;;  %s324_s20 = scalar_lea.vmem [#allocation9], %s1548_s5 }
  0xa2   : > { %s332_s12 = sshll.u32 %s324_s20, 4  ;;  %s2140_s22 = scalar_lea.hbm %s2567_s16, 64  ;;  %s333_s12 = int_to_ptr.vmem [resolvable:$true] %s332_s12 }
  0xa3   : > { %p2141_p0 = scmp.ne.s32.totalorder %s2567_s16, %s2140_s22  ;;  %p3086_p9 = scmp.ne.s32.totalorder %s3082_s13, 0 }
  0xa4   : > { %s2145_s19 = scalar_lea.hbm %s3041_s2, 128  ;;  %p2146_p7 = scmp.lt.u32.totalorder %s2567_s16, %s3041_s2 }
  0xa5   : > { %p2143_p12 = pnand %p2141_p0, %p3086_p9  ;;  %p2147_p10 = scmp.lt.u32.totalorder %s2145_s19, %s2140_s22 }
  0xa6   : > { %p2149_p4 = scmp.lt.u32.totalorder %s2140_s22, %s2567_s16 }
  0xa7   : > { %p2144_p3 = pneg %p2143_p12  ;;  %p2148_p1 = por %p2147_p10, %p2146_p7 }
  0xa9   : > { %p2150_p5 = por %p2149_p4, %p2148_p1 }
  0xab   : > { %p2151_p11 = pnand %p2150_p5, %p2144_p3 }
  0xad   : > { %2154 = shalt.err (!%p2151_p11)
}
  0xae   : > { %s2155_s5 = scalar_lea.vmem %s333_s12, 64  ;;  %s2308_s21 = smov [#allocation9]  }
  0xaf   : > { %p2156_p13 = scmp.ne.s32.totalorder %s333_s12, %s2155_s5  ;;  %s2160_s24 = sshll.u32 %s2308_s21, 4  ;;  %s2161_s24 = int_to_ptr.vmem [resolvable:$false] %s2160_s24 }
  0xb0   : > { %s2162_s8 = scalar_lea.vmem %s2161_s24, 128  ;;  %p2163_p8 = scmp.lt.s32.totalorder %s333_s12, %s2161_s24 }
  0xb1   : > { %p2158_p2 = pnand %p2156_p13, %p3086_p9  ;;  %p2164_p0 = scmp.lt.s32.totalorder %s2162_s8, %s2155_s5 }
  0xb3   : > { %p2159_p6 = pneg %p2158_p2  ;;  %p2165_p12 = por %p2164_p0, %p2163_p8 }
  0xb5   : > { %p2166_p7 = pnand %p2165_p12, %p2159_p6 }
  0xb7   : > { %2169 = shalt.err (!%p2166_p7)
}
  0xb8   : > { %p3087_p10 = scmp.ne.s32.totalorder %s3081_s15, 0  ;;  %s1572_s18 = sshll.u32 %s2292_s28, 14 }
  0xb9   : > { %s2591_s20 = scalar_lea.hbm %s3042_s3, %s1572_s18  ;;  %s343_s22 = scalar_lea.vmem [#allocation10], %s2470_s17 }
  0xba   : > { %1882 = dma.hbm_to_vmem [thread:$0]  (!%p3087_p10), %s2567_s16, 64, %s333_s12, %s2492_s10  }
  0xbb   : > { %s351_s14 = sshll.u32 %s343_s22, 4  ;;  %s3088_s4 = sand.u32 1, %s2296_s29   ;;  %s2594_s14 = int_to_ptr.vmem [resolvable:$true] %s351_s14 }
  0xbc   : > { %s2598_s19 = scalar_lea.sflag [#allocation11], %s3088_s4  ;;  %s2170_s11 = scalar_lea.hbm %s2591_s20, 16384 }
  0xbd   : > { %p2171_p3 = scmp.ne.s32.totalorder %s2591_s20, %s2170_s11  ;;  %s2175_s12 = scalar_lea.hbm %s3042_s3, 32768 }
  0xbe   : > { %p2176_p5 = scmp.lt.u32.totalorder %s2591_s20, %s3042_s3  ;;  %p2177_p11 = scmp.lt.u32.totalorder %s2175_s12, %s2170_s11 }
  0xbf   : > { %p2173_p1 = pnand %p2171_p3, %p3086_p9  ;;  %p2179_p2 = scmp.lt.u32.totalorder %s2170_s11, %s2591_s20 }
  0xc0   : > { %p2178_p13 = por %p2177_p11, %p2176_p5 }
  0xc1   : > { %p2174_p4 = pneg %p2173_p1 }
  0xc2   : > { %p2180_p6 = por %p2179_p2, %p2178_p13 }
  0xc4   : > { %p2181_p8 = pnand %p2180_p6, %p2174_p4 }
  0xc6   : > { %2184 = shalt.err (!%p2181_p8)
}
  0xc7   : > { %s2185_s17 = scalar_lea.vmem %s2594_s14, 16384  ;;  %s2309_s21 = smov [#allocation10]  }
  0xc8   : > { %p2186_p0 = scmp.ne.s32.totalorder %s2594_s14, %s2185_s17  ;;  %s2190_s24 = sshll.u32 %s2309_s21, 4  ;;  %s2191_s24 = int_to_ptr.vmem [resolvable:$false] %s2190_s24 }
  0xc9   : > { %s2192_s8 = scalar_lea.vmem %s2191_s24, 32768  ;;  %p2193_p3 = scmp.lt.s32.totalorder %s2594_s14, %s2191_s24 }
  0xca   : > { %p2188_p12 = pnand %p2186_p0, %p3086_p9  ;;  %p2194_p1 = scmp.lt.s32.totalorder %s2192_s8, %s2185_s17 }
  0xcc   : > { %p2189_p7 = pneg %p2188_p12  ;;  %p2195_p5 = por %p2194_p1, %p2193_p3 }
  0xce   : > { %p2196_p11 = pnand %p2195_p5, %p2189_p7 }
  0xd0   : > { %2199 = shalt.err (!%p2196_p11)
}
  0xd1   : > { %1885 = dma.hbm_to_vmem [thread:$0]  (!%p3087_p10), %s2591_s20, 16384, %s2594_s14, %s2598_s19, %s2305_s1, %s2305_s1, %s2306_s7  }
  0xd2   : > { %p3089_p9 = scmp.ne.s32.totalorder %s3073_s9, 0 }
  0xd3   : > { %p3090_p4 = scmp.eq.s32.totalorder (!%p3089_p9), %s2383_s30, 0 }
  0xd4   : > { %363 = sbr.rel (%p3089_p9) target bundleno = 1208 (0x4b8), region = 48 }
  0xdb   : > { %2251 = dma.done.wait (%p3090_p4), [#allocation5], 1024   ;;  %p3091_p13 = pmov %p3090_p4 }
  0xdc   : > { %s3092_s13 = sld [smem:[#allocation23_spill]]  ;;  %s3093_s18 = sld [smem:[#allocation25_spill]] }
  0xdd   : > { %2253 = vsyncadd (%p3091_p13), [#allocation5], 4294966272  ;;  %s369_s15 = sand.u32 1, %s2383_s30  }
  0xde   : > { %s370_s22 = scalar_lea.sflag [#allocation8], %s369_s15 }
  0xe2   : > { %s371_s25 = sand.u32 1, %s3092_s13   ;;  %p3094_p2 = scmp.ne.s32.totalorder %s3093_s18, 0 }
  0xe3   : > { %s1557_s23 = sshll.u32 %s371_s25, 10 }
  0xe4   : > { %s2633_s4 = scalar_lea.vmem [#allocation7], %s1557_s23 }
  0xe5   : > { %2255 = dma.done.wait (%p3094_p2), %s370_s22, 16448  }
  0xe6   : > { %2257 = vsyncadd (%p3094_p2), %s370_s22, 4294950848  ;;  %s2639_s9 = sshll.u32 %s371_s25, 2  ;;  %s388_s7 = scalar_lea.sflag [#allocation11], %s369_s15 }
  0xe7   : > { %s382_s1 = scalar_lea.vmem [#allocation9], %s2639_s9  ;;  %s2642_s20 = scalar_lea.vmem [#allocation10], %s1557_s23 }
  0xe8   : > { %2259 = dma.done.wait (%p3094_p2), %s388_s7, 16384  }
  0xe9   : > { %2261 = vsyncadd (%p3094_p2), %s388_s7, 4294950912  ;;  %p3095_p10 = pmov %p3090_p4 }
  0xea   : > { %p3096_p6 = pmov %p3090_p4 }
  0xeb   : > { %2263 = dma.done.wait (%p3095_p10), [#allocation11], 32  }
  0xec   : > { %2265 = vsyncadd (%p3096_p6), [#allocation11], 4294967264  ;;  %p3097_p8 = pmov %p3090_p4 }
  0xed   : > { %p3098_p0 = pmov %p3090_p4 }
  0xee   : > { %2267 = dma.done.wait (%p3097_p8), [#allocation14], 64  }
  0xef   : > { %2269 = vsyncadd (%p3098_p0), [#allocation14], 4294967232  ;;  %s3099_s14 = sld [smem:[#allocation24_spill]] }
  0xf5   : > { %p1563_p12 = scmp.ne.s32.totalorder %s3099_s14, 0 }
  0xf6   : > { %v448_v0 = vld [vmem:[#allocation4] sm:$0xff] (!%p1563_p12)  ;;  %v449_v1 = vld [vmem:[#allocation4 + $0x8] sm:$0xff] (!%p1563_p12)  ;;  %v450_v5 = vld [vmem:[#allocation4 + $0x10] sm:$0xff] (!%p1563_p12)  ;;  %v2310_v40 = vmov (!%p1563_p12), 0.0   ;;  %v523_v43 = vlaneseq (!%p1563_p12) }
  0xf7   : > { %447 = sbr.rel (%p1563_p12) target bundleno = 571 (0x23b), region = 80  ;;  %v452_v2 = vld [vmem:[#allocation4 + $0x20] sm:$0xff] (!%p1563_p12)  ;;  %v456_v3 = vadd.f32 (!%p1563_p12), %v449_v1, %v448_v0  ;;  %v453_v4 = vld [vmem:[#allocation4 + $0x28] sm:$0xff] (!%p1563_p12)  ;;  %v451_v6 = vld [vmem:[#allocation4 + $0x18] sm:$0xff] (!%p1563_p12)  ;;  %569 = vst [vmem:[#allocation2] sm:$0xff] (!%p1563_p12), %v2310_v40 }
  0xf8   : > { %v462_v7 = vadd.f32 (!%p1563_p12), %v453_v4, %v452_v2  ;;  %v454_v8 = vld [vmem:[#allocation4 + $0x30] sm:$0xff] (!%p1563_p12)  ;;  %v455_v9 = vld [vmem:[#allocation4 + $0x38] sm:$0xff] (!%p1563_p12)  ;;  %v459_v10 = vadd.f32 (!%p1563_p12), %v451_v6, %v450_v5  ;;  %570 = vst [vmem:[#allocation2 + $0x8] sm:$0xff] (!%p1563_p12), %v2310_v40  ;;  %571 = vst [vmem:[#allocation2 + $0x10] sm:$0xff] (!%p1563_p12), %v2310_v40  ;;  %v524_v49 = vshrl.u32 (!%p1563_p12), %v523_v43, 7 }
  0xf9   : > { %457 = vadd.xlane.f32.xlu0 (!%p1563_p12), %v456_v3  ;;  %v465_v11 = vadd.f32 (!%p1563_p12), %v455_v9, %v454_v8  ;;  %572 = vst [vmem:[#allocation2 + $0x18] sm:$0xff] (!%p1563_p12), %v2310_v40  ;;  %573 = vst [vmem:[#allocation2 + $0x20] sm:$0xff] (!%p1563_p12), %v2310_v40  ;;  %v521_v56 = vld [vmem:[#allocation13] sm:$0x3] (!%p1563_p12)  ;;  %v541_v58 = vld [vmem:[#allocation15] sm:$0x3] (!%p1563_p12) }
  0xfa   : > { %463 = vadd.xlane.f32.xlu1 (!%p1563_p12), %v462_v7  ;;  %574 = vst [vmem:[#allocation2 + $0x28] sm:$0xff] (!%p1563_p12), %v2310_v40  ;;  %575 = vst [vmem:[#allocation2 + $0x30] sm:$0xff] (!%p1563_p12), %v2310_v40  ;;  %v525_v54 = vsub.s32 (!%p1563_p12), 0, %v524_v49  ;;  %v529_v55 = vsub.s32 (!%p1563_p12), 1, %v524_v49 }
  0xfb   : > { %576 = vst [vmem:[#allocation2 + $0x38] sm:$0xff] (!%p1563_p12), %v2310_v40 }
  0xfc   : > { %v526_v59 = vrot.slane (!%p1563_p12), %v521_v56, %v525_v54  ;;  %v530_v60 = vrot.slane (!%p1563_p12), %v521_v56, %v529_v55  ;;  %v546_v62 = vrot.slane (!%p1563_p12), %v541_v58, %v525_v54  ;;  %v550_v63 = vrot.slane (!%p1563_p12), %v541_v58, %v529_v55 }
  0xfd   : > { %460 = vadd.xlane.f32.xlu0 (!%p1563_p12), %v459_v10 }
  0xfe   : > { %466 = vadd.xlane.f32.xlu1 %v465_v11 }
 0x186   : > { %v458_v12 = vpop.xlane.xlu0 %457 }
 0x187   : > { %v469_v13 = vmul.f32 0.00390625, %v458_v12  ;;  %v464_v14 = vpop.xlane.xlu1 %463 }
 0x188   : > { %v471_v15 = vmul.f32 0.00390625, %v464_v14 }
 0x189   : > { %v2657_v16 = vsub.f32 %v448_v0, %v469_v13  ;;  %v2659_v17 = vsub.f32 %v449_v1, %v469_v13 }
 0x18a   : > { %v2661_v18 = vsub.f32 %v452_v2, %v471_v15  ;;  %v2663_v19 = vsub.f32 %v453_v4, %v471_v15  ;;  %v461_v20 = vpop.xlane.xlu0 %460 }
 0x18b   : > { %v470_v21 = vmul.f32 0.00390625, %v461_v20  ;;  %v467_v22 = vpop.xlane.xlu1 %466  ;;  %v481_v23 = vmul.f32 %v2657_v16, %v2657_v16  ;;  %v482_v24 = vmul.f32 %v2659_v17, %v2659_v17 }
 0x18c   : > { %v472_v25 = vmul.f32 0.00390625, %v467_v22  ;;  %v485_v26 = vmul.f32 %v2661_v18, %v2661_v18  ;;  %v486_v27 = vmul.f32 %v2663_v19, %v2663_v19 }
 0x18d   : > { %v475_v28 = vsub.f32 %v450_v5, %v470_v21  ;;  %v476_v29 = vsub.f32 %v451_v6, %v470_v21  ;;  %v489_v30 = vadd.f32 %v482_v24, %v481_v23 }
 0x18e   : > { %v2673_v31 = vsub.f32 %v454_v8, %v472_v25  ;;  %v2675_v32 = vsub.f32 %v455_v9, %v472_v25  ;;  %v495_v33 = vadd.f32 %v486_v27, %v485_v26 }
 0x18f   : > { %490 = vadd.xlane.f32.xlu0 %v489_v30  ;;  %v483_v34 = vmul.f32 %v475_v28, %v475_v28  ;;  %v484_v35 = vmul.f32 %v476_v29, %v476_v29 }
 0x190   : > { %v487_v36 = vmul.f32 %v2673_v31, %v2673_v31  ;;  %v488_v37 = vmul.f32 %v2675_v32, %v2675_v32 }
 0x191   : > { %v492_v38 = vadd.f32 %v484_v35, %v483_v34 }
 0x192   : > { %v498_v39 = vadd.f32 %v488_v37, %v487_v36 }
 0x193   : > { %496 = vadd.xlane.f32.xlu0 %v495_v33  ;;  %493 = vadd.xlane.f32.xlu1 %v492_v38 }
 0x197   : > { %499 = vadd.xlane.f32.xlu1 %v498_v39 }
 0x21c   : > { %v491_v41 = vpop.xlane.xlu0 %490 }
 0x21d   : > { %v501_v42 = vmul.f32 0.00390625, %v491_v41 }
 0x21f   : > { %v505_v44 = vadd.f32 1e-05, %v501_v42 }
 0x220   : > { %v494_v45 = vpop.xlane.xlu1 %493  ;;  %v497_v46 = vpop.xlane.xlu0 %496 }
 0x221   : > { %1958 = vrsqrt.f32 %v505_v44  ;;  %v502_v47 = vmul.f32 0.00390625, %v494_v45  ;;  %v503_v48 = vmul.f32 0.00390625, %v497_v46 }
 0x223   : > { %v506_v50 = vadd.f32 1e-05, %v502_v47  ;;  %v507_v51 = vadd.f32 1e-05, %v503_v48 }
 0x224   : > { %v500_v52 = vpop.xlane.xlu1 %499 }
 0x225   : > { %1960 = vrsqrt.f32 %v506_v50  ;;  %v504_v53 = vmul.f32 0.00390625, %v500_v52 }
 0x226   : > { %1962 = vrsqrt.f32 %v507_v51 }
 0x227   : > { %v508_v57 = vadd.f32 1e-05, %v504_v53 }
 0x229   : > { %1964 = vrsqrt.f32 %v508_v57 }
 0x22b   : > { %v1959_v61 = vpop.eup %1958 }
 0x22c   : > { %v513_v0 = vmul.f32 %v1959_v61, %v2657_v16  ;;  %v514_v1 = vmul.f32 %v1959_v61, %v2659_v17 }
 0x22e   : > { %v533_v2 = vmul.f32 %v526_v59, %v513_v0  ;;  %v534_v3 = vmul.f32 %v530_v60, %v514_v1 }
 0x22f   : > { %v1961_v4 = vpop.eup %1960 }
 0x230   : > { %v1963_v5 = vpop.eup %1962  ;;  %v553_v6 = vadd.f32 %v546_v62, %v533_v2  ;;  %v554_v7 = vadd.f32 %v550_v63, %v534_v3  ;;  %v515_v8 = vmul.f32 %v1961_v4, %v475_v28  ;;  %v516_v9 = vmul.f32 %v1961_v4, %v476_v29 }
 0x231   : > { %v517_v10 = vmul.f32 %v1963_v5, %v2661_v18  ;;  %v518_v11 = vmul.f32 %v1963_v5, %v2663_v19 }
 0x232   : > { %561 = vst [vmem:[#allocation3] sm:$0xff] %v553_v6  ;;  %562 = vst [vmem:[#allocation3 + $0x8] sm:$0xff] %v554_v7  ;;  %v535_v12 = vmul.f32 %v526_v59, %v515_v8  ;;  %v536_v13 = vmul.f32 %v530_v60, %v516_v9 }
 0x233   : > { %v1965_v14 = vpop.eup %1964  ;;  %v537_v15 = vmul.f32 %v526_v59, %v517_v10  ;;  %v538_v16 = vmul.f32 %v530_v60, %v518_v11 }
 0x234   : > { %v555_v17 = vadd.f32 %v546_v62, %v535_v12  ;;  %v556_v20 = vadd.f32 %v550_v63, %v536_v13  ;;  %v519_v21 = vmul.f32 %v1965_v14, %v2673_v31  ;;  %v520_v22 = vmul.f32 %v1965_v14, %v2675_v32 }
 0x235   : > { %v557_v23 = vadd.f32 %v546_v62, %v537_v15  ;;  %v558_v24 = vadd.f32 %v550_v63, %v538_v16 }
 0x236   : > { %563 = vst [vmem:[#allocation3 + $0x10] sm:$0xff] %v555_v17  ;;  %564 = vst [vmem:[#allocation3 + $0x18] sm:$0xff] %v556_v20  ;;  %v539_v18 = vmul.f32 %v526_v59, %v519_v21  ;;  %v540_v25 = vmul.f32 %v530_v60, %v520_v22 }
 0x237   : > { %565 = vst [vmem:[#allocation3 + $0x20] sm:$0xff] %v557_v23  ;;  %566 = vst [vmem:[#allocation3 + $0x28] sm:$0xff] %v558_v24 }
 0x238   : > { %v559_v19 = vadd.f32 %v546_v62, %v539_v18  ;;  %v560_v26 = vadd.f32 %v550_v63, %v540_v25 }
 0x23a   : > { %567 = vst [vmem:[#allocation3 + $0x30] sm:$0xff] %v559_v19  ;;  %568 = vst [vmem:[#allocation3 + $0x38] sm:$0xff] %v560_v26 }
 0x23b PF: > { %v586_v27 = vld [vmem:[%s2633_s4 + $0x8] sm:$0xff]  ;;  %v585_v29 = vld [vmem:[%s2633_s4] sm:$0xff]  ;;  %s3100_s19 = sld [smem:[#allocation24_spill]] }
 0x23c   : > { %v590_v28 = vld [vmem:[%s2633_s4 + $0x28] sm:$0xff]  ;;  %v589_v31 = vld [vmem:[%s2633_s4 + $0x20] sm:$0xff] }
 0x23d   : > { %v1573_v30 = vpack.c.bf16 %v590_v28, %v586_v27  ;;  %v594_v32 = vld [vmem:[%s2633_s4 + $0x48] sm:$0xff]  ;;  %v1575_v34 = vpack.c.bf16 %v589_v31, %v585_v29  ;;  %v593_v36 = vld [vmem:[%s2633_s4 + $0x40] sm:$0xff] }
 0x23e   : > { %v598_v33 = vld [vmem:[%s2633_s4 + $0x68] sm:$0xff]  ;;  %v597_v37 = vld [vmem:[%s2633_s4 + $0x60] sm:$0xff] }
 0x23f   : > { %v1577_v35 = vpack.c.bf16 %v598_v33, %v594_v32  ;;  %v602_v38 = vld [vmem:[%s2633_s4 + $0x88] sm:$0xff]  ;;  %1574 = vmatprep.subr.bf16.mxu1 %v1573_v30  ;;  %v1579_v40 = vpack.c.bf16 %v597_v37, %v593_v36  ;;  %v601_v42 = vld [vmem:[%s2633_s4 + $0x80] sm:$0xff] }
 0x240   : > { %v606_v39 = vld [vmem:[%s2633_s4 + $0xa8] sm:$0xff]  ;;  %1576 = vmatpush1.bf16.msra.mxu1 %v1575_v34  ;;  %v605_v43 = vld [vmem:[%s2633_s4 + $0xa0] sm:$0xff] }
 0x241   : > { %1578 = vmatprep.subr.bf16.mxu1 %v1577_v35  ;;  %v1581_v41 = vpack.c.bf16 %v606_v39, %v602_v38  ;;  %v610_v44 = vld [vmem:[%s2633_s4 + $0xc8] sm:$0xff]  ;;  %v1583_v46 = vpack.c.bf16 %v605_v43, %v601_v42  ;;  %v609_v48 = vld [vmem:[%s2633_s4 + $0xc0] sm:$0xff]  ;;  %v1002_v43 = vld [vmem:[%s2642_s20 + $0x8] sm:$0xff]  ;;  %p1564_p7 = scmp.ne.s32.totalorder %s3100_s19, 1 }
 0x242   : > { %v614_v45 = vld [vmem:[%s2633_s4 + $0xe8] sm:$0xff]  ;;  %v613_v49 = vld [vmem:[%s2633_s4 + $0xe0] sm:$0xff] }
 0x243   : > { %v1585_v47 = vpack.c.bf16 %v614_v45, %v610_v44  ;;  %v618_v50 = vld [vmem:[%s2633_s4 + $0x108] sm:$0xff]  ;;  %v1587_v52 = vpack.c.bf16 %v613_v49, %v609_v48  ;;  %v617_v54 = vld [vmem:[%s2633_s4 + $0x100] sm:$0xff]  ;;  %v1006_v48 = vld [vmem:[%s2642_s20 + $0x28] sm:$0xff] }
 0x244   : > { %1580 = vmatpush1.bf16.msra.mxu1 %v1579_v40  ;;  %v622_v51 = vld [vmem:[%s2633_s4 + $0x128] sm:$0xff]  ;;  %v621_v55 = vld [vmem:[%s2633_s4 + $0x120] sm:$0xff] }
 0x245   : > { %1582 = vmatprep.subr.bf16.mxu1 %v1581_v41  ;;  %v1589_v53 = vpack.c.bf16 %v622_v51, %v618_v50  ;;  %v626_v56 = vld [vmem:[%s2633_s4 + $0x148] sm:$0xff]  ;;  %v1591_v58 = vpack.c.bf16 %v621_v55, %v617_v54  ;;  %v625_v60 = vld [vmem:[%s2633_s4 + $0x140] sm:$0xff]  ;;  %v1010_v55 = vld [vmem:[%s2642_s20 + $0x48] sm:$0xff] }
 0x246   : > { %v630_v57 = vld [vmem:[%s2633_s4 + $0x168] sm:$0xff]  ;;  %v629_v61 = vld [vmem:[%s2633_s4 + $0x160] sm:$0xff] }
 0x247   : > { %v1593_v59 = vpack.c.bf16 %v630_v57, %v626_v56  ;;  %v634_v62 = vld [vmem:[%s2633_s4 + $0x188] sm:$0xff]  ;;  %v1595_v0 = vpack.c.bf16 %v629_v61, %v625_v60  ;;  %v633_v2 = vld [vmem:[%s2633_s4 + $0x180] sm:$0xff] }
 0x248   : > { %1584 = vmatpush1.bf16.msra.mxu1 %v1583_v46  ;;  %v638_v63 = vld [vmem:[%s2633_s4 + $0x1a8] sm:$0xff]  ;;  %v637_v3 = vld [vmem:[%s2633_s4 + $0x1a0] sm:$0xff] }
 0x249   : > { %1586 = vmatprep.subr.bf16.mxu1 %v1585_v47  ;;  %v1597_v1 = vpack.c.bf16 %v638_v63, %v634_v62  ;;  %v2715_v4 = vld [vmem:[#allocation3 + $0x8] sm:$0xff]  ;;  %v1599_v7 = vpack.c.bf16 %v637_v3, %v633_v2  ;;  %v641_v9 = vld [vmem:[%s2633_s4 + $0x1c0] sm:$0xff]  ;;  %v1003_v47 = vld [vmem:[%s2642_s20 + $0x10] sm:$0xff] }
 0x24a   : > { %v642_v5 = vld [vmem:[%s2633_s4 + $0x1c8] sm:$0xff]  ;;  %799 = vmatprep.mubr.f32.mxu1 %v2715_v4  ;;  %v645_v10 = vld [vmem:[%s2633_s4 + $0x1e0] sm:$0xff]  ;;  %v1014_v2 = vld [vmem:[%s2642_s20 + $0x68] sm:$0xff] }
 0x24b   : > { %v646_v6 = vld [vmem:[%s2633_s4 + $0x1e8] sm:$0xff]  ;;  %v1603_v13 = vpack.c.bf16 %v645_v10, %v641_v9  ;;  %v649_v15 = vld [vmem:[%s2633_s4 + $0x200] sm:$0xff] }
 0x24c   : > { %1588 = vmatpush1.bf16.msra.mxu1 %v1587_v52  ;;  %v1601_v8 = vpack.c.bf16 %v646_v6, %v642_v5  ;;  %v650_v11 = vld [vmem:[%s2633_s4 + $0x208] sm:$0xff]  ;;  %v653_v16 = vld [vmem:[%s2633_s4 + $0x220] sm:$0xff]  ;;  %v1007_v52 = vld [vmem:[%s2642_s20 + $0x30] sm:$0xff] }
 0x24d   : > { %1590 = vmatprep.subr.bf16.mxu1 %v1589_v53  ;;  %v654_v12 = vld [vmem:[%s2633_s4 + $0x228] sm:$0xff]  ;;  %v1607_v21 = vpack.c.bf16 %v653_v16, %v649_v15  ;;  %v657_v23 = vld [vmem:[%s2633_s4 + $0x240] sm:$0xff]  ;;  %v1018_v15 = vld [vmem:[%s2642_s20 + $0x88] sm:$0xff] }
 0x24e   : > { %v1605_v14 = vpack.c.bf16 %v654_v12, %v650_v11  ;;  %v658_v17 = vld [vmem:[%s2633_s4 + $0x248] sm:$0xff]  ;;  %v661_v24 = vld [vmem:[%s2633_s4 + $0x260] sm:$0xff] }
 0x24f   : > { %v662_v20 = vld [vmem:[%s2633_s4 + $0x268] sm:$0xff]  ;;  %v1611_v19 = vpack.c.bf16 %v661_v24, %v657_v23  ;;  %v665_v27 = vld [vmem:[%s2633_s4 + $0x280] sm:$0xff]  ;;  %v588_v23 = vld [vmem:[%s2633_s4 + $0x18] sm:$0xff] }
 0x250   : > { %1592 = vmatpush1.bf16.msra.mxu1 %v1591_v58  ;;  %v1609_v22 = vpack.c.bf16 %v662_v20, %v658_v17  ;;  %v666_v18 = vld [vmem:[%s2633_s4 + $0x288] sm:$0xff]  ;;  %v669_v28 = vld [vmem:[%s2633_s4 + $0x2a0] sm:$0xff] }
 0x251   : > { %1594 = vmatprep.subr.bf16.mxu1 %v1593_v59  ;;  %v670_v25 = vld [vmem:[%s2633_s4 + $0x2a8] sm:$0xff]  ;;  %v1615_v31 = vpack.c.bf16 %v669_v28, %v665_v27  ;;  %v673_v33 = vld [vmem:[%s2633_s4 + $0x2c0] sm:$0xff]  ;;  %v1022_v27 = vld [vmem:[%s2642_s20 + $0xa8] sm:$0xff] }
 0x252   : > { %v1613_v26 = vpack.c.bf16 %v670_v25, %v666_v18  ;;  %v674_v29 = vld [vmem:[%s2633_s4 + $0x2c8] sm:$0xff]  ;;  %v677_v34 = vld [vmem:[%s2633_s4 + $0x2e0] sm:$0xff]  ;;  %v592_v18 = vld [vmem:[%s2633_s4 + $0x38] sm:$0xff] }
 0x253   : > { %v678_v30 = vld [vmem:[%s2633_s4 + $0x2e8] sm:$0xff]  ;;  %v1619_v37 = vpack.c.bf16 %v677_v34, %v673_v33  ;;  %v681_v38 = vld [vmem:[%s2633_s4 + $0x300] sm:$0xff]  ;;  %v596_v33 = vld [vmem:[%s2633_s4 + $0x58] sm:$0xff] }
 0x254   : > { %1596 = vmatpush1.bf16.msra.mxu1 %v1595_v0  ;;  %v1617_v32 = vpack.c.bf16 %v678_v30, %v674_v29  ;;  %v682_v35 = vld [vmem:[%s2633_s4 + $0x308] sm:$0xff]  ;;  %v685_v39 = vld [vmem:[%s2633_s4 + $0x320] sm:$0xff]  ;;  %v1637_v30 = vpack.c.bf16 %v592_v18, %v588_v23  ;;  %v2828_v23 = vld [vmem:[#allocation3 + $0x30] sm:$0xff] }
 0x255   : > { %1598 = vmatprep.subr.bf16.mxu1 %v1597_v1  ;;  %v686_v36 = vld [vmem:[%s2633_s4 + $0x328] sm:$0xff]  ;;  %v1004_v44 = vld [vmem:[%s2642_s20 + $0x18] sm:$0xff]  ;;  %v1623_v53 = vpack.c.bf16 %v685_v39, %v681_v38  ;;  %v1011_v1 = vld [vmem:[%s2642_s20 + $0x50] sm:$0xff] }
 0x256   : > { %v690_v40 = vld [vmem:[%s2633_s4 + $0x348] sm:$0xff]  ;;  %v1621_v41 = vpack.c.bf16 %v686_v36, %v682_v35  ;;  %v1701_v45 = vpack.c.bf16 %v1004_v44, %v1002_v43  ;;  %v1008_v50 = vld [vmem:[%s2642_s20 + $0x38] sm:$0xff]  ;;  %v600_v35 = vld [vmem:[%s2633_s4 + $0x78] sm:$0xff] }
 0x257   : > { %v694_v42 = vld [vmem:[%s2633_s4 + $0x368] sm:$0xff]  ;;  %v1705_v54 = vpack.c.bf16 %v1008_v50, %v1006_v48  ;;  %v1012_v56 = vld [vmem:[%s2642_s20 + $0x58] sm:$0xff]  ;;  %v1023_v38 = vld [vmem:[%s2642_s20 + $0xb0] sm:$0xff]  ;;  %v1641_v44 = vpack.c.bf16 %v600_v35, %v596_v33 }
 0x258   : > { %1600 = vmatpush1.bf16.msra.mxu1 %v1599_v7  ;;  %v1001_v46 = vld [vmem:[%s2642_s20] sm:$0xff]  ;;  %1702 = vmatprep.subr.bf16.mxu0 %v1701_v45  ;;  %v1625_v57 = vpack.c.bf16 %v694_v42, %v690_v40  ;;  %v689_v58 = vld [vmem:[%s2633_s4 + $0x340] sm:$0xff]  ;;  %v1709_v63 = vpack.c.bf16 %v1012_v56, %v1010_v55  ;;  %v1026_v39 = vld [vmem:[%s2642_s20 + $0xc8] sm:$0xff] }
 0x259   : > { %1602 = vmatprep.subr.bf16.mxu1 %v1601_v8  ;;  %v1703_v49 = vpack.c.bf16 %v1003_v47, %v1001_v46  ;;  %v1005_v51 = vld [vmem:[%s2642_s20 + $0x20] sm:$0xff]  ;;  %v693_v59 = vld [vmem:[%s2633_s4 + $0x360] sm:$0xff]  ;;  %v595_v43 = vld [vmem:[%s2633_s4 + $0x50] sm:$0xff] }
 0x25a   : > { %v698_v60 = vld [vmem:[%s2633_s4 + $0x388] sm:$0xff]  ;;  %v1707_v61 = vpack.c.bf16 %v1007_v52, %v1005_v51  ;;  %v1016_v3 = vld [vmem:[%s2642_s20 + $0x78] sm:$0xff]  ;;  %v1627_v5 = vpack.c.bf16 %v693_v59, %v689_v58  ;;  %v599_v45 = vld [vmem:[%s2633_s4 + $0x70] sm:$0xff] }
 0x25b   : > { %1704 = vmatpush1.bf16.msra.mxu0 %v1703_v49  ;;  %v702_v62 = vld [vmem:[%s2633_s4 + $0x3a8] sm:$0xff]  ;;  %v697_v7 = vld [vmem:[%s2633_s4 + $0x380] sm:$0xff]  ;;  %v1713_v12 = vpack.c.bf16 %v1016_v3, %v1014_v2  ;;  %v604_v46 = vld [vmem:[%s2633_s4 + $0x98] sm:$0xff]  ;;  %v1643_v55 = vpack.c.bf16 %v599_v45, %v595_v43 }
 0x25c   : > { %1604 = vmatpush1.bf16.msra.mxu1 %v1603_v13  ;;  %1706 = vmatprep.subr.bf16.mxu0 %v1705_v54  ;;  %v1009_v0 = vld [vmem:[%s2642_s20 + $0x40] sm:$0xff]  ;;  %v1629_v6 = vpack.c.bf16 %v702_v62, %v698_v60  ;;  %v701_v8 = vld [vmem:[%s2633_s4 + $0x3a0] sm:$0xff]  ;;  %v2791_v47 = vld [vmem:[#allocation3 + $0x18] sm:$0xff] }
 0x25d   : > { %1606 = vmatprep.subr.bf16.mxu1 %v1605_v14  ;;  %v706_v9 = vld [vmem:[%s2633_s4 + $0x3c8] sm:$0xff]  ;;  %v1711_v10 = vpack.c.bf16 %v1011_v1, %v1009_v0  ;;  %v1015_v14 = vld [vmem:[%s2642_s20 + $0x70] sm:$0xff]  ;;  %v1020_v16 = vld [vmem:[%s2642_s20 + $0x98] sm:$0xff]  ;;  %v1631_v17 = vpack.c.bf16 %v701_v8, %v697_v7 }
 0x25e   : > { %v710_v11 = vld [vmem:[%s2633_s4 + $0x3e8] sm:$0xff]  ;;  %v1717_v25 = vpack.c.bf16 %v1020_v16, %v1018_v15  ;;  %v1024_v28 = vld [vmem:[%s2642_s20 + $0xb8] sm:$0xff]  ;;  %v608_v49 = vld [vmem:[%s2633_s4 + $0xb8] sm:$0xff] }
 0x25f   : > { %1708 = vmatpush1.bf16.msra.mxu0 %v1707_v61  ;;  %v1013_v13 = vld [vmem:[%s2642_s20 + $0x60] sm:$0xff]  ;;  %v1633_v20 = vpack.c.bf16 %v710_v11, %v706_v9  ;;  %v1721_v36 = vpack.c.bf16 %v1024_v28, %v1022_v27  ;;  %v1028_v40 = vld [vmem:[%s2642_s20 + $0xd8] sm:$0xff]  ;;  %v1027_v52 = vld [vmem:[%s2642_s20 + $0xd0] sm:$0xff]  ;;  %v1645_v58 = vpack.c.bf16 %v608_v49, %v604_v46 }
 0x260   : > { %1608 = vmatpush1.bf16.msra.mxu1 %v1607_v21  ;;  %1710 = vmatprep.subr.bf16.mxu0 %v1709_v63  ;;  %v705_v21 = vld [vmem:[%s2633_s4 + $0x3c0] sm:$0xff]  ;;  %v1715_v24 = vpack.c.bf16 %v1015_v14, %v1013_v13  ;;  %v1725_v50 = vpack.c.bf16 %v1028_v40, %v1026_v39  ;;  %v1025_v51 = vld [vmem:[%s2642_s20 + $0xc0] sm:$0xff]  ;;  %v603_v56 = vld [vmem:[%s2633_s4 + $0x90] sm:$0xff] }
 0x261   : > { %1610 = vmatprep.subr.bf16.mxu1 %v1609_v22  ;;  %v709_v22 = vld [vmem:[%s2633_s4 + $0x3e0] sm:$0xff]  ;;  %v607_v59 = vld [vmem:[%s2633_s4 + $0xb0] sm:$0xff]  ;;  %v612_v60 = vld [vmem:[%s2633_s4 + $0xd8] sm:$0xff]  ;;  %v1727_v62 = vpack.c.bf16 %v1027_v52, %v1025_v51 }
 0x262   : > { %v1635_v29 = vpack.c.bf16 %v709_v22, %v705_v21  ;;  %v1032_v54 = vld [vmem:[%s2642_s20 + $0xf8] sm:$0xff]  ;;  %v2805_v61 = vld [vmem:[#allocation3 + $0x28] sm:$0xff]  ;;  %v616_v63 = vld [vmem:[%s2633_s4 + $0xf8] sm:$0xff] }
 0x263   : > { %1712 = vmatpush1.bf16.msra.mxu0 %v1711_v10  ;;  %v1029_v1 = vld [vmem:[%s2642_s20 + $0xe0] sm:$0xff]  ;;  %v1031_v2 = vld [vmem:[%s2642_s20 + $0xf0] sm:$0xff]  ;;  %v1034_v3 = vld [vmem:[%s2642_s20 + $0x108] sm:$0xff]  ;;  %v1649_v9 = vpack.c.bf16 %v616_v63, %v612_v60 }
 0x264   : > { %1612 = vmatpush1.bf16.msra.mxu1 %v1611_v19  ;;  %1714 = vmatprep.subr.bf16.mxu0 %v1713_v12  ;;  %v1017_v19 = vld [vmem:[%s2642_s20 + $0x80] sm:$0xff]  ;;  %v611_v7 = vld [vmem:[%s2633_s4 + $0xd0] sm:$0xff]  ;;  %v2815_v8 = vld [vmem:[#allocation3 + $0x20] sm:$0xff]  ;;  %v1731_v13 = vpack.c.bf16 %v1031_v2, %v1029_v1 }
 0x265   : > { %1614 = vmatprep.subr.bf16.mxu1 %v1613_v26  ;;  %v1019_v26 = vld [vmem:[%s2642_s20 + $0x90] sm:$0xff]  ;;  %v615_v10 = vld [vmem:[%s2633_s4 + $0xf0] sm:$0xff]  ;;  %v1033_v16 = vld [vmem:[%s2642_s20 + $0x100] sm:$0xff] }
 0x266   : > { %v1719_v34 = vpack.c.bf16 %v1019_v26, %v1017_v19  ;;  %v620_v11 = vld [vmem:[%s2633_s4 + $0x118] sm:$0xff]  ;;  %v1040_v21 = vld [vmem:[%s2642_s20 + $0x138] sm:$0xff]  ;;  %v1651_v22 = vpack.c.bf16 %v615_v10, %v611_v7  ;;  %v619_v18 = vld [vmem:[%s2633_s4 + $0x110] sm:$0xff] }
 0x267   : > { %1716 = vmatpush1.bf16.msra.mxu0 %v1715_v24  ;;  %v2819_v12 = vld [vmem:[#allocation3 + $0x38] sm:$0xff]  ;;  %v627_v35 = vld [vmem:[%s2633_s4 + $0x150] sm:$0xff] }
 0x268   : > { %1616 = vmatpush1.bf16.msra.mxu1 %v1615_v31  ;;  %v587_v31 = vld [vmem:[%s2633_s4 + $0x10] sm:$0xff]  ;;  %1718 = vmatprep.subr.bf16.mxu0 %v1717_v25  ;;  %v624_v14 = vld [vmem:[%s2633_s4 + $0x138] sm:$0xff] }
 0x269   : > { %1618 = vmatprep.subr.bf16.mxu1 %v1617_v32  ;;  %v591_v32 = vld [vmem:[%s2633_s4 + $0x30] sm:$0xff]  ;;  %v1653_v24 = vpack.c.bf16 %v624_v14, %v620_v11  ;;  %v628_v19 = vld [vmem:[%s2633_s4 + $0x158] sm:$0xff] }
 0x26a   : > { %v1639_v42 = vpack.c.bf16 %v591_v32, %v587_v31  ;;  %v623_v25 = vld [vmem:[%s2633_s4 + $0x130] sm:$0xff]  ;;  %v632_v27 = vld [vmem:[%s2633_s4 + $0x178] sm:$0xff]  ;;  %v1044_v32 = vld [vmem:[%s2642_s20 + $0x158] sm:$0xff] }
 0x26b   : > { %1720 = vmatpush1.bf16.msra.mxu0 %v1719_v34  ;;  %v1042_v31 = vld [vmem:[%s2642_s20 + $0x148] sm:$0xff]  ;;  %v1655_v33 = vpack.c.bf16 %v623_v25, %v619_v18  ;;  %v1657_v34 = vpack.c.bf16 %v632_v27, %v628_v19  ;;  %v640_v39 = vld [vmem:[%s2633_s4 + $0x1b8] sm:$0xff] }
 0x26c   : > { %1620 = vmatpush1.bf16.msra.mxu1 %v1619_v37  ;;  %v1021_v37 = vld [vmem:[%s2642_s20 + $0xa0] sm:$0xff]  ;;  %1722 = vmatprep.subr.bf16.mxu0 %v1721_v36  ;;  %v631_v36 = vld [vmem:[%s2633_s4 + $0x170] sm:$0xff]  ;;  %v1741_v40 = vpack.c.bf16 %v1044_v32, %v1042_v31  ;;  %v1043_v43 = vld [vmem:[%s2642_s20 + $0x150] sm:$0xff] }
 0x26d   : > { %1622 = vmatprep.subr.bf16.mxu1 %v1621_v41  ;;  %v2786_v41 = vld [vmem:[#allocation3] sm:$0xff]  ;;  %v1723_v48 = vpack.c.bf16 %v1023_v38, %v1021_v37  ;;  %v636_v37 = vld [vmem:[%s2633_s4 + $0x198] sm:$0xff]  ;;  %v635_v45 = vld [vmem:[%s2633_s4 + $0x190] sm:$0xff] }
 0x26e   : > { %v639_v46 = vld [vmem:[%s2633_s4 + $0x1b0] sm:$0xff]  ;;  %v644_v49 = vld [vmem:[%s2633_s4 + $0x1d8] sm:$0xff] }
 0x26f   : > { %1724 = vmatpush1.bf16.msra.mxu0 %v1723_v48  ;;  %v1663_v51 = vpack.c.bf16 %v639_v46, %v635_v45  ;;  %v651_v60 = vld [vmem:[%s2633_s4 + $0x210] sm:$0xff]  ;;  %v660_v63 = vld [vmem:[%s2633_s4 + $0x258] sm:$0xff] }
 0x270   : > { %1624 = vmatpush1.bf16.msra.mxu1 %v1623_v53  ;;  %v1030_v53 = vld [vmem:[%s2642_s20 + $0xe8] sm:$0xff]  ;;  %1726 = vmatprep.subr.bf16.mxu0 %v1725_v50  ;;  %v648_v50 = vld [vmem:[%s2633_s4 + $0x1f8] sm:$0xff] }
 0x271   : > { %1626 = vmatprep.subr.bf16.mxu1 %v1625_v57  ;;  %v2801_v57 = vld [vmem:[#allocation3 + $0x10] sm:$0xff]  ;;  %v1729_v0 = vpack.c.bf16 %v1032_v54, %v1030_v53  ;;  %v1665_v52 = vpack.c.bf16 %v648_v50, %v644_v49  ;;  %v672_v7 = vld [vmem:[%s2633_s4 + $0x2b8] sm:$0xff]  ;;  %v1045_v49 = vld [vmem:[%s2642_s20 + $0x160] sm:$0xff] }
 0x272   : > { %v643_v53 = vld [vmem:[%s2633_s4 + $0x1d0] sm:$0xff]  ;;  %v676_v14 = vld [vmem:[%s2633_s4 + $0x2d8] sm:$0xff]  ;;  %v1052_v50 = vld [vmem:[%s2642_s20 + $0x198] sm:$0xff] }
 0x273   : > { %1728 = vmatpush1.bf16.msra.mxu0 %v1727_v62  ;;  %v647_v54 = vld [vmem:[%s2633_s4 + $0x1f0] sm:$0xff]  ;;  %v692_v27 = vld [vmem:[%s2633_s4 + $0x358] sm:$0xff] }
 0x274   : > { %1628 = vmatpush1.bf16.msra.mxu1 %v1627_v5  ;;  %v1036_v5 = vld [vmem:[%s2642_s20 + $0x118] sm:$0xff]  ;;  %1730 = vmatprep.subr.bf16.mxu0 %v1729_v0  ;;  %v655_v62 = vld [vmem:[%s2633_s4 + $0x230] sm:$0xff]  ;;  %v664_v0 = vld [vmem:[%s2633_s4 + $0x278] sm:$0xff] }
 0x275   : > { %1630 = vmatprep.subr.bf16.mxu1 %v1629_v6  ;;  %v1647_v6 = vpack.c.bf16 %v607_v59, %v603_v56  ;;  %v1733_v15 = vpack.c.bf16 %v1036_v5, %v1034_v3  ;;  %v656_v56 = vld [vmem:[%s2633_s4 + $0x238] sm:$0xff]  ;;  %v1671_v1 = vpack.c.bf16 %v655_v62, %v651_v60  ;;  %v1673_v2 = vpack.c.bf16 %v664_v0, %v660_v63  ;;  %v659_v3 = vld [vmem:[%s2633_s4 + $0x250] sm:$0xff]  ;;  %v1060_v60 = vld [vmem:[%s2642_s20 + $0x1d8] sm:$0xff] }
 0x276   : > { %v663_v5 = vld [vmem:[%s2633_s4 + $0x270] sm:$0xff]  ;;  %v1057_v63 = vld [vmem:[%s2642_s20 + $0x1c0] sm:$0xff]  ;;  %v1059_v0 = vld [vmem:[%s2642_s20 + $0x1d0] sm:$0xff] }
 0x277   : > { %1732 = vmatpush1.bf16.msra.mxu0 %v1731_v13  ;;  %v667_v11 = vld [vmem:[%s2633_s4 + $0x290] sm:$0xff] }
 0x278   : > { %1632 = vmatpush1.bf16.msra.mxu1 %v1631_v17  ;;  %v1035_v17 = vld [vmem:[%s2642_s20 + $0x110] sm:$0xff]  ;;  %1734 = vmatprep.subr.bf16.mxu0 %v1733_v15  ;;  %v671_v13 = vld [vmem:[%s2633_s4 + $0x2b0] sm:$0xff] }
 0x279   : > { %1634 = vmatprep.subr.bf16.mxu1 %v1633_v20  ;;  %v1038_v20 = vld [vmem:[%s2642_s20 + $0x128] sm:$0xff]  ;;  %v1735_v26 = vpack.c.bf16 %v1035_v17, %v1033_v16  ;;  %v680_v15 = vld [vmem:[%s2633_s4 + $0x2f8] sm:$0xff]  ;;  %v1679_v16 = vpack.c.bf16 %v671_v13, %v667_v11  ;;  %v1068_v11 = vld [vmem:[%s2642_s20 + $0x218] sm:$0xff] }
 0x27a   : > { %v1737_v28 = vpack.c.bf16 %v1040_v21, %v1038_v20  ;;  %v1681_v17 = vpack.c.bf16 %v680_v15, %v676_v14  ;;  %v675_v20 = vld [vmem:[%s2633_s4 + $0x2d0] sm:$0xff]  ;;  %v715_v14 = vlaneseq }
 0x27b   : > { %1736 = vmatpush1.bf16.msra.mxu0 %v1735_v26  ;;  %v679_v21 = vld [vmem:[%s2633_s4 + $0x2f0] sm:$0xff] }
 0x27c   : > { %1636 = vmatpush1.bf16.msra.mxu1 %v1635_v29  ;;  %v1037_v29 = vld [vmem:[%s2642_s20 + $0x120] sm:$0xff]  ;;  %1738 = vmatprep.subr.bf16.mxu0 %v1737_v28  ;;  %v1683_v18 = vpack.c.bf16 %v679_v21, %v675_v20  ;;  %v683_v19 = vld [vmem:[%s2633_s4 + $0x310] sm:$0xff]  ;;  %v696_v28 = vld [vmem:[%s2633_s4 + $0x378] sm:$0xff]  ;;  %v2913_v15 = vshrl.u32 %v715_v14, 7 }
 0x27d   : > { %1638 = vmatprep.subr.bf16.mxu1 %v1637_v30  ;;  %v1039_v30 = vld [vmem:[%s2642_s20 + $0x130] sm:$0xff]  ;;  %v687_v26 = vld [vmem:[%s2633_s4 + $0x330] sm:$0xff] }
 0x27e   : > { %v1739_v38 = vpack.c.bf16 %v1039_v30, %v1037_v29  ;;  %v1687_v29 = vpack.c.bf16 %v687_v26, %v683_v19  ;;  %v1689_v30 = vpack.c.bf16 %v696_v28, %v692_v27  ;;  %v691_v31 = vld [vmem:[%s2633_s4 + $0x350] sm:$0xff]  ;;  %v721_v20 = vsub.s32 1, %v2913_v15  ;;  %v1075_v14 = vld [vmem:[%s2642_s20 + $0x250] sm:$0xff] }
 0x27f   : > { %800 = vmatmul.mubr.f32.vlgmr.msra.gmra.mrb[0].mxu1 %v2786_v41  ;;  %v695_v32 = vld [vmem:[%s2633_s4 + $0x370] sm:$0xff] }
 0x280   : > { %1640 = vmatpush1.bf16.msra.mxu1 %v1639_v42  ;;  %805 = vmatprep.mubr.f32.mxu1 %v2791_v47  ;;  %v1041_v42 = vld [vmem:[%s2642_s20 + $0x140] sm:$0xff]  ;;  %v1046_v46 = vld [vmem:[%s2642_s20 + $0x168] sm:$0xff] }
 0x281   : > { %1642 = vmatprep.subr.bf16.mxu1 %v1641_v44  ;;  %v1661_v44 = vpack.c.bf16 %v640_v39, %v636_v37  ;;  %1740 = vmatpush1.bf16.msra.mxu0 %v1739_v38  ;;  %v1743_v48 = vpack.c.bf16 %v1043_v43, %v1041_v42  ;;  %v699_v37 = vld [vmem:[%s2633_s4 + $0x390] sm:$0xff]  ;;  %v708_v39 = vld [vmem:[%s2633_s4 + $0x3d8] sm:$0xff] }
 0x282   : > { %1742 = vmatprep.subr.bf16.mxu0 %v1741_v40  ;;  %v703_v38 = vld [vmem:[%s2633_s4 + $0x3b0] sm:$0xff]  ;;  %v712_v40 = vld [vmem:[%s2633_s4 + $0x3f8] sm:$0xff] }
 0x283   : > { %806 = vmatmul.mubr.f32.gmra.mrb[2].mxu1 %v2801_v57  ;;  %v1695_v42 = vpack.c.bf16 %v703_v38, %v699_v37  ;;  %v1697_v43 = vpack.c.bf16 %v712_v40, %v708_v39 }
 0x284   : > { %1644 = vmatpush1.bf16.msra.mxu1 %v1643_v55  ;;  %811 = vmatprep.mubr.f32.mxu1 %v2805_v61  ;;  %v652_v55 = vld [vmem:[%s2633_s4 + $0x218] sm:$0xff] }
 0x285   : > { %1646 = vmatprep.subr.bf16.mxu1 %v1645_v58  ;;  %1744 = vmatpush1.bf16.msra.mxu0 %v1743_v48  ;;  %v1667_v58 = vpack.c.bf16 %v647_v54, %v643_v53  ;;  %v1669_v59 = vpack.c.bf16 %v656_v56, %v652_v55  ;;  %v1048_v48 = vld [vmem:[%s2642_s20 + $0x178] sm:$0xff]  ;;  %v1053_v55 = vld [vmem:[%s2642_s20 + $0x1a0] sm:$0xff]  ;;  %v1055_v56 = vld [vmem:[%s2642_s20 + $0x1b0] sm:$0xff] }
 0x286   : > { %v1056_v53 = vld [vmem:[%s2642_s20 + $0x1b8] sm:$0xff] }
 0x287   : > { %812 = vmatmul.mubr.f32.gmra.mrb[4].mxu1 %v2815_v8 }
 0x288   : > { %1648 = vmatpush1.bf16.msra.mxu1 %v1647_v6  ;;  %817 = vmatprep.mubr.f32.mxu1 %v2819_v12  ;;  %v668_v6 = vld [vmem:[%s2633_s4 + $0x298] sm:$0xff] }
 0x289   : > { %1650 = vmatprep.subr.bf16.mxu1 %v1649_v9  ;;  %v1675_v9 = vpack.c.bf16 %v663_v5, %v659_v3  ;;  %v1677_v10 = vpack.c.bf16 %v672_v7, %v668_v6  ;;  %v1064_v3 = vld [vmem:[%s2642_s20 + $0x1f8] sm:$0xff]  ;;  %v1061_v6 = vld [vmem:[%s2642_s20 + $0x1e0] sm:$0xff]  ;;  %v1063_v7 = vld [vmem:[%s2642_s20 + $0x1f0] sm:$0xff] }
 0x28b   : > { %818 = vmatmul.mubr.f32.gmra.mrb[6].mxu1 %v2828_v23 }
 0x28c   : > { %1652 = vmatpush1.bf16.msra.mxu1 %v1651_v22  ;;  %888 = vmatprep.mubr.f32.mxu1 %v2715_v4  ;;  %v1659_v4 = vpack.c.bf16 %v631_v36, %v627_v35  ;;  %v684_v22 = vld [vmem:[%s2633_s4 + $0x318] sm:$0xff]  ;;  %v1691_v35 = vpack.c.bf16 %v695_v32, %v691_v31 }
 0x28d   : > { %1654 = vmatprep.subr.bf16.mxu1 %v1653_v24  ;;  %v688_v24 = vld [vmem:[%s2633_s4 + $0x338] sm:$0xff] }
 0x28e   : > { %v1685_v25 = vpack.c.bf16 %v688_v24, %v684_v22 }
 0x290   : > { %1656 = vmatpush1.bf16.msra.mxu1 %v1655_v33  ;;  %v700_v33 = vld [vmem:[%s2633_s4 + $0x398] sm:$0xff] }
 0x291   : > { %1658 = vmatprep.subr.bf16.mxu1 %v1657_v34  ;;  %v704_v34 = vld [vmem:[%s2633_s4 + $0x3b8] sm:$0xff] }
 0x292   : > { %v1693_v36 = vpack.c.bf16 %v704_v34, %v700_v33 }
 0x294   : > { %1660 = vmatpush1.bf16.msra.mxu1 %v1659_v4  ;;  %v707_v4 = vld [vmem:[%s2633_s4 + $0x3d0] sm:$0xff] }
 0x295   : > { %1662 = vmatprep.subr.bf16.mxu1 %v1661_v44  ;;  %v711_v44 = vld [vmem:[%s2633_s4 + $0x3f0] sm:$0xff] }
 0x296   : > { %v1699_v45 = vpack.c.bf16 %v711_v44, %v707_v4 }
 0x298   : > { %1664 = vmatpush1.bf16.msra.mxu1 %v1663_v51 }
 0x299   : > { %1666 = vmatprep.subr.bf16.mxu1 %v1665_v52  ;;  %v1054_v52 = vld [vmem:[%s2642_s20 + $0x1a8] sm:$0xff] }
 0x29a   : > { %v1753_v54 = vpack.c.bf16 %v1056_v53, %v1054_v52 }
 0x29c   : > { %1668 = vmatpush1.bf16.msra.mxu1 %v1667_v58  ;;  %v1755_v58 = vpack.c.bf16 %v1055_v56, %v1053_v55 }
 0x29d   : > { %1670 = vmatprep.subr.bf16.mxu1 %v1669_v59  ;;  %v1058_v59 = vld [vmem:[%s2642_s20 + $0x1c8] sm:$0xff] }
 0x29e   : > { %v1757_v62 = vpack.c.bf16 %v1060_v60, %v1058_v59  ;;  %v1069_v59 = vld [vmem:[%s2642_s20 + $0x220] sm:$0xff]  ;;  %v1071_v60 = vld [vmem:[%s2642_s20 + $0x230] sm:$0xff] }
 0x2a0   : > { %1672 = vmatpush1.bf16.msra.mxu1 %v1671_v1  ;;  %v1759_v1 = vpack.c.bf16 %v1059_v0, %v1057_v63  ;;  %v1074_v63 = vld [vmem:[%s2642_s20 + $0x248] sm:$0xff]  ;;  %v1076_v0 = vld [vmem:[%s2642_s20 + $0x258] sm:$0xff] }
 0x2a1   : > { %1674 = vmatprep.subr.bf16.mxu1 %v1673_v2  ;;  %v1062_v2 = vld [vmem:[%s2642_s20 + $0x1e8] sm:$0xff] }
 0x2a2   : > { %v1761_v5 = vpack.c.bf16 %v1064_v3, %v1062_v2 }
 0x2a4   : > { %1676 = vmatpush1.bf16.msra.mxu1 %v1675_v9  ;;  %v1763_v9 = vpack.c.bf16 %v1063_v7, %v1061_v6  ;;  %v1771_v6 = vpack.c.bf16 %v1071_v60, %v1069_v59 }
 0x2a5   : > { %1678 = vmatprep.subr.bf16.mxu1 %v1677_v10  ;;  %v1066_v10 = vld [vmem:[%s2642_s20 + $0x208] sm:$0xff] }
 0x2a6   : > { %v1765_v13 = vpack.c.bf16 %v1068_v11, %v1066_v10  ;;  %v1773_v11 = vpack.c.bf16 %v1076_v0, %v1074_v63  ;;  %v1099_v63 = vld [vmem:[%s2642_s20 + $0x310] sm:$0xff]  ;;  %v1102_v0 = vld [vmem:[%s2642_s20 + $0x328] sm:$0xff] }
 0x2a8   : > { %1680 = vmatpush1.bf16.msra.mxu1 %v1679_v16  ;;  %v717_v16 = vsub.s32 0, %v2913_v15 }
 0x2a9   : > { %1682 = vmatprep.subr.bf16.mxu1 %v1681_v17  ;;  %v2918_v17 = vld [vmem:[%s382_s1] sm:$0xf] }
 0x2aa   : > { %v718_v21 = vrot.slane %v2918_v17, %v717_v16  ;;  %v722_v22 = vrot.slane %v2918_v17, %v721_v20 }
 0x2ac   : > { %1684 = vmatpush1.bf16.msra.mxu1 %v1683_v18 }
 0x2ad   : > { %1686 = vmatprep.subr.bf16.mxu1 %v1685_v25 }
 0x2b0   : > { %1688 = vmatpush1.bf16.msra.mxu1 %v1687_v29 }
 0x2b1   : > { %1690 = vmatprep.subr.bf16.mxu1 %v1689_v30 }
 0x2b4   : > { %1692 = vmatpush1.bf16.msra.mxu1 %v1691_v35 }
 0x2b5   : > { %1694 = vmatprep.subr.bf16.mxu1 %v1693_v36 }
 0x2b8   : > { %1696 = vmatpush1.bf16.msra.mxu1 %v1695_v42 }
 0x2b9   : > { %1698 = vmatprep.subr.bf16.mxu1 %v1697_v43 }
 0x2bc   : > { %1700 = vmatpush1.bf16.msra.mxu1 %v1699_v45 }
 0x2bf   : > { %889 = vmatmul.mubr.f32.vlgmr.msra.gmra.mrb[8].mxu1 %v2786_v41  ;;  %v1745_v41 = vpack.c.bf16 %v1048_v48, %v1046_v46 }
 0x2c0   : > { %894 = vmatprep.mubr.f32.mxu1 %v2791_v47  ;;  %v1047_v47 = vld [vmem:[%s2642_s20 + $0x170] sm:$0xff] }
 0x2c1   : > { %1746 = vmatprep.subr.bf16.mxu0 %v1745_v41  ;;  %v1065_v41 = vld [vmem:[%s2642_s20 + $0x200] sm:$0xff] }
 0x2c3   : > { %895 = vmatmul.mubr.f32.gmra.mrb[10].mxu1 %v2801_v57  ;;  %v1747_v57 = vpack.c.bf16 %v1047_v47, %v1045_v49  ;;  %v1067_v49 = vld [vmem:[%s2642_s20 + $0x210] sm:$0xff] }
 0x2c4   : > { %900 = vmatprep.mubr.f32.mxu1 %v2805_v61  ;;  %v1050_v61 = vld [vmem:[%s2642_s20 + $0x188] sm:$0xff]  ;;  %v1767_v53 = vpack.c.bf16 %v1067_v49, %v1065_v41  ;;  %v1085_v41 = vld [vmem:[%s2642_s20 + $0x2a0] sm:$0xff]  ;;  %v1087_v49 = vld [vmem:[%s2642_s20 + $0x2b0] sm:$0xff] }
 0x2c5   : > { %1748 = vmatpush1.bf16.msra.mxu0 %v1747_v57 }
 0x2c7   : > { %901 = vmatmul.mubr.f32.gmra.mrb[12].mxu1 %v2815_v8  ;;  %v1749_v8 = vpack.c.bf16 %v1052_v50, %v1050_v61  ;;  %v1070_v50 = vld [vmem:[%s2642_s20 + $0x228] sm:$0xff] }
 0x2c8   : > { %906 = vmatprep.mubr.f32.mxu1 %v2819_v12  ;;  %v1049_v12 = vld [vmem:[%s2642_s20 + $0x180] sm:$0xff] }
 0x2c9   : > { %1750 = vmatprep.subr.bf16.mxu0 %v1749_v8  ;;  %v1072_v8 = vld [vmem:[%s2642_s20 + $0x238] sm:$0xff] }
 0x2cb   : > { %907 = vmatmul.mubr.f32.gmra.mrb[14].mxu1 %v2828_v23  ;;  %v1051_v23 = vld [vmem:[%s2642_s20 + $0x190] sm:$0xff] }
 0x2cc   : > { %v1751_v51 = vpack.c.bf16 %v1051_v23, %v1049_v12 }
 0x2ce   : > { %1752 = vmatpush1.bf16.msra.mxu0 %v1751_v51 }
 0x2cf   : > { %1754 = vmatprep.subr.bf16.mxu0 %v1753_v54 }
 0x2d2   : > { %1756 = vmatpush1.bf16.msra.mxu0 %v1755_v58  ;;  %v1769_v58 = vpack.c.bf16 %v1072_v8, %v1070_v50  ;;  %v1089_v8 = vld [vmem:[%s2642_s20 + $0x2c0] sm:$0xff] }
 0x2d3   : > { %1758 = vmatprep.subr.bf16.mxu0 %v1757_v62 }
 0x2d6   : > { %1760 = vmatpush1.bf16.msra.mxu0 %v1759_v1 }
 0x2d7   : > { %1762 = vmatprep.subr.bf16.mxu0 %v1761_v5 }
 0x2da   : > { %1764 = vmatpush1.bf16.msra.mxu0 %v1763_v9 }
 0x2db   : > { %1766 = vmatprep.subr.bf16.mxu0 %v1765_v13  ;;  %v1073_v13 = vld [vmem:[%s2642_s20 + $0x240] sm:$0xff] }
 0x352   : > { %v801_v24 = vpop.f32.mrb[0].mxu1 }
 0x353   : > { %v802_v18 = vadd.f32 %v801_v24, %v718_v21  ;;  %v803_v25 = vpop.f32.mrb[1].mxu1  ;;  %v1080_v24 = vld [vmem:[%s2642_s20 + $0x278] sm:$0xff] }
 0x354   : > { %v804_v19 = vadd.f32 %v803_v25, %v722_v22 }
 0x355   : > { %v929_v26 = vmul.f32 0.70710677, %v802_v18  ;;  %v913_v12 = vmul.f32 0.5, %v802_v18 }
 0x356   : > { %v930_v27 = vmul.f32 0.70710677, %v804_v19  ;;  %v807_v28 = vpop.f32.mrb[2].mxu1  ;;  %v914_v57 = vmul.f32 0.5, %v804_v19 }
 0x357   : > { %1966 = verf.f32 %v929_v26  ;;  %v808_v29 = vadd.f32 %v807_v28, %v718_v21  ;;  %v809_v30 = vpop.f32.mrb[3].mxu1 }
 0x358   : > { %1968 = verf.f32 %v930_v27  ;;  %v810_v31 = vadd.f32 %v809_v30, %v722_v22  ;;  %v1775_v27 = vpack.c.bf16 %v1075_v14, %v1073_v13  ;;  %v1105_v13 = vld [vmem:[%s2642_s20 + $0x340] sm:$0xff]  ;;  %v1107_v14 = vld [vmem:[%s2642_s20 + $0x350] sm:$0xff] }
 0x359   : > { %v933_v32 = vmul.f32 0.70710677, %v808_v29  ;;  %v917_v23 = vmul.f32 0.5, %v808_v29 }
 0x35a   : > { %v934_v33 = vmul.f32 0.70710677, %v810_v31  ;;  %v813_v34 = vpop.f32.mrb[4].mxu1  ;;  %v918_v54 = vmul.f32 0.5, %v810_v31 }
 0x35b   : > { %1970 = verf.f32 %v933_v32  ;;  %v814_v35 = vadd.f32 %v813_v34, %v718_v21  ;;  %v815_v36 = vpop.f32.mrb[5].mxu1  ;;  %v1077_v32 = vld [vmem:[%s2642_s20 + $0x260] sm:$0xff] }
 0x35c   : > { %1972 = verf.f32 %v934_v33  ;;  %v816_v37 = vadd.f32 %v815_v36, %v722_v22  ;;  %v1079_v33 = vld [vmem:[%s2642_s20 + $0x270] sm:$0xff]  ;;  %v1084_v36 = vld [vmem:[%s2642_s20 + $0x298] sm:$0xff] }
 0x35d   : > { %v937_v38 = vmul.f32 0.70710677, %v814_v35  ;;  %v921_v2 = vmul.f32 0.5, %v814_v35  ;;  %v1082_v35 = vld [vmem:[%s2642_s20 + $0x288] sm:$0xff] }
 0x35e   : > { %v938_v39 = vmul.f32 0.70710677, %v816_v37  ;;  %v819_v40 = vpop.f32.mrb[6].mxu1  ;;  %v922_v7 = vmul.f32 0.5, %v816_v37 }
 0x35f   : > { %1974 = verf.f32 %v937_v38  ;;  %v820_v42 = vadd.f32 %v819_v40, %v718_v21  ;;  %v821_v43 = vpop.f32.mrb[7].mxu1 }
 0x360   : > { %1976 = verf.f32 %v938_v39  ;;  %v822_v4 = vadd.f32 %v821_v43, %v722_v22  ;;  %v1078_v22 = vld [vmem:[%s2642_s20 + $0x268] sm:$0xff]  ;;  %v1779_v39 = vpack.c.bf16 %v1079_v33, %v1077_v32  ;;  %v1081_v43 = vld [vmem:[%s2642_s20 + $0x280] sm:$0xff] }
 0x361   : > { %v1967_v44 = vpop.eup %1966  ;;  %v941_v45 = vmul.f32 0.70710677, %v820_v42  ;;  %v925_v25 = vmul.f32 0.5, %v820_v42  ;;  %v1777_v31 = vpack.c.bf16 %v1080_v24, %v1078_v22  ;;  %v1781_v42 = vpack.c.bf16 %v1084_v36, %v1082_v35  ;;  %v1110_v22 = vld [vmem:[%s2642_s20 + $0x368] sm:$0xff]  ;;  %v1112_v24 = vld [vmem:[%s2642_s20 + $0x378] sm:$0xff]  ;;  %v1113_v35 = vld [vmem:[%s2642_s20 + $0x380] sm:$0xff] }
 0x362   : > { %v1969_v46 = vpop.eup %1968  ;;  %v961_v48 = vadd.f32 1.0, %v1967_v44  ;;  %v942_v47 = vmul.f32 0.70710677, %v822_v4  ;;  %v926_v28 = vmul.f32 0.5, %v822_v4  ;;  %v1083_v4 = vld [vmem:[%s2642_s20 + $0x290] sm:$0xff]  ;;  %v1086_v44 = vld [vmem:[%s2642_s20 + $0x2a8] sm:$0xff] }
 0x363   : > { %v962_v61 = vadd.f32 1.0, %v1969_v46  ;;  %1978 = verf.f32 %v941_v45  ;;  %v1088_v45 = vld [vmem:[%s2642_s20 + $0x2b8] sm:$0xff]  ;;  %v1783_v46 = vpack.c.bf16 %v1083_v4, %v1081_v43  ;;  %v1115_v36 = vld [vmem:[%s2642_s20 + $0x390] sm:$0xff] }
 0x364   : > { %1980 = verf.f32 %v942_v47  ;;  %v977_v56 = vmul.f32 %v961_v48, %v913_v12  ;;  %v1785_v48 = vpack.c.bf16 %v1088_v45, %v1086_v44  ;;  %v1090_v47 = vld [vmem:[%s2642_s20 + $0x2c8] sm:$0xff]  ;;  %v1091_v12 = vld [vmem:[%s2642_s20 + $0x2d0] sm:$0xff]  ;;  %v1815_v4 = vpack.c.bf16 %v1115_v36, %v1113_v35 }
 0x365   : > { %v1971_v51 = vpop.eup %1970  ;;  %v978_v52 = vmul.f32 %v962_v61, %v914_v57  ;;  %v1092_v57 = vld [vmem:[%s2642_s20 + $0x2d8] sm:$0xff]  ;;  %v1787_v61 = vpack.c.bf16 %v1087_v49, %v1085_v41 }
 0x366   : > { %v1973_v55 = vpop.eup %1972  ;;  %v965_v62 = vadd.f32 1.0, %v1971_v51  ;;  %v1789_v50 = vpack.c.bf16 %v1092_v57, %v1090_v47  ;;  %v1096_v51 = vld [vmem:[%s2642_s20 + $0x2f8] sm:$0xff]  ;;  %v1122_v47 = vld [vmem:[%s2642_s20 + $0x3c8] sm:$0xff] }
 0x367   : > { %1193 = vmatprep.mubr.f32.mxu0 %v978_v52  ;;  %v966_v1 = vadd.f32 1.0, %v1973_v55  ;;  %v1791_v52 = vpack.c.bf16 %v1091_v12, %v1089_v8  ;;  %v1095_v55 = vld [vmem:[%s2642_s20 + $0x2f0] sm:$0xff]  ;;  %v1124_v57 = vld [vmem:[%s2642_s20 + $0x3d8] sm:$0xff] }
 0x368   : > { %1194 = vmatmul.mubr.f32.vlgmr.msra.gmra.mrb[0].mxu0 %v977_v56  ;;  %v981_v3 = vmul.f32 %v965_v62, %v917_v23  ;;  %v1094_v23 = vld [vmem:[%s2642_s20 + $0x2e8] sm:$0xff]  ;;  %v1097_v62 = vld [vmem:[%s2642_s20 + $0x300] sm:$0xff] }
 0x369   : > { %v1975_v5 = vpop.eup %1974  ;;  %1768 = vmatpush1.bf16.msra.mxu0 %v1767_v53  ;;  %v982_v9 = vmul.f32 %v966_v1, %v918_v54  ;;  %v1793_v53 = vpack.c.bf16 %v1096_v51, %v1094_v23  ;;  %v1093_v54 = vld [vmem:[%s2642_s20 + $0x2e0] sm:$0xff]  ;;  %v1098_v56 = vld [vmem:[%s2642_s20 + $0x308] sm:$0xff]  ;;  %v1104_v1 = vld [vmem:[%s2642_s20 + $0x338] sm:$0xff]  ;;  %v1821_v51 = vpack.c.bf16 %v1124_v57, %v1122_v47 }
 0x36a   : > { %v1977_v10 = vpop.eup %1976  ;;  %1770 = vmatprep.subr.bf16.mxu0 %v1769_v58  ;;  %v969_v21 = vadd.f32 1.0, %v1975_v5  ;;  %v1100_v58 = vld [vmem:[%s2642_s20 + $0x318] sm:$0xff]  ;;  %v1795_v59 = vpack.c.bf16 %v1095_v55, %v1093_v54  ;;  %v1101_v5 = vld [vmem:[%s2642_s20 + $0x320] sm:$0xff] }
 0x36b   : > { %v970_v18 = vadd.f32 1.0, %v1977_v10  ;;  %1199 = vmatprep.mubr.f32.mxu0 %v982_v9  ;;  %v1797_v60 = vpack.c.bf16 %v1100_v58, %v1098_v56  ;;  %v1108_v9 = vld [vmem:[%s2642_s20 + $0x358] sm:$0xff]  ;;  %v1126_v56 = vld [vmem:[%s2642_s20 + $0x3e8] sm:$0xff]  ;;  %v994_v47 = vld [vmem:[#allocation2 + $0x8] sm:$0xff] }
 0x36c   : > { %1200 = vmatmul.mubr.f32.gmra.mrb[2].mxu0 %v981_v3  ;;  %v985_v19 = vmul.f32 %v969_v21, %v921_v2  ;;  %v1799_v2 = vpack.c.bf16 %v1099_v63, %v1097_v62  ;;  %v1801_v3 = vpack.c.bf16 %v1104_v1, %v1102_v0  ;;  %v725_v21 = vsub.s32 2, %v2913_v15  ;;  %v1128_v58 = vld [vmem:[%s2642_s20 + $0x3f8] sm:$0xff] }
 0x36d   : > { %v1979_v26 = vpop.eup %1978  ;;  %1772 = vmatpush1.bf16.msra.mxu0 %v1771_v6  ;;  %v986_v29 = vmul.f32 %v970_v18, %v922_v7  ;;  %v1103_v6 = vld [vmem:[%s2642_s20 + $0x330] sm:$0xff]  ;;  %v1106_v7 = vld [vmem:[%s2642_s20 + $0x348] sm:$0xff]  ;;  %v729_v18 = vsub.s32 3, %v2913_v15  ;;  %v1825_v1 = vpack.c.bf16 %v1128_v58, %v1126_v56  ;;  %v998_v56 = vld [vmem:[#allocation2 + $0x28] sm:$0xff] }
 0x36e   : > { %v1981_v30 = vpop.eup %1980  ;;  %1774 = vmatprep.subr.bf16.mxu0 %v1773_v11  ;;  %v973_v34 = vadd.f32 1.0, %v1979_v26  ;;  %v1803_v10 = vpack.c.bf16 %v1103_v6, %v1101_v5  ;;  %v1805_v11 = vpack.c.bf16 %v1108_v9, %v1106_v7  ;;  %v1109_v26 = vld [vmem:[%s2642_s20 + $0x360] sm:$0xff] }
 0x36f   : > { %v974_v37 = vadd.f32 1.0, %v1981_v30  ;;  %1205 = vmatprep.mubr.f32.mxu0 %v986_v29  ;;  %v1114_v29 = vld [vmem:[%s2642_s20 + $0x388] sm:$0xff]  ;;  %v1116_v30 = vld [vmem:[%s2642_s20 + $0x398] sm:$0xff] }
 0x370   : > { %1206 = vmatmul.mubr.f32.gmra.mrb[4].mxu0 %v985_v19  ;;  %v989_v38 = vmul.f32 %v973_v34, %v925_v25  ;;  %v1807_v25 = vpack.c.bf16 %v1107_v14, %v1105_v13  ;;  %v1809_v19 = vpack.c.bf16 %v1112_v24, %v1110_v22  ;;  %v1813_v34 = vpack.c.bf16 %v1116_v30, %v1114_v29 }
 0x371   : > { %1776 = vmatpush1.bf16.msra.mxu0 %v1775_v27  ;;  %v990_v40 = vmul.f32 %v974_v37, %v926_v28  ;;  %v1111_v27 = vld [vmem:[%s2642_s20 + $0x370] sm:$0xff]  ;;  %v726_v28 = vrot.slane %v2918_v17, %v725_v21 }
 0x372   : > { %1778 = vmatprep.subr.bf16.mxu0 %v1777_v31  ;;  %v730_v31 = vrot.slane %v2918_v17, %v729_v18  ;;  %v1811_v32 = vpack.c.bf16 %v1111_v27, %v1109_v26 }
 0x373   : > { %1211 = vmatprep.mubr.f32.mxu0 %v990_v40  ;;  %v1120_v40 = vld [vmem:[%s2642_s20 + $0x3b8] sm:$0xff] }
 0x374   : > { %1212 = vmatmul.mubr.f32.gmra.mrb[6].mxu0 %v989_v38 }
 0x375   : > { %1780 = vmatpush1.bf16.msra.mxu0 %v1779_v39  ;;  %v1118_v39 = vld [vmem:[%s2642_s20 + $0x3a8] sm:$0xff] }
 0x376   : > { %1782 = vmatprep.subr.bf16.mxu0 %v1781_v42  ;;  %v1817_v45 = vpack.c.bf16 %v1120_v40, %v1118_v39 }
 0x379   : > { %1784 = vmatpush1.bf16.msra.mxu0 %v1783_v46  ;;  %v1117_v46 = vld [vmem:[%s2642_s20 + $0x3a0] sm:$0xff] }
 0x37a   : > { %1786 = vmatprep.subr.bf16.mxu0 %v1785_v48  ;;  %v1119_v48 = vld [vmem:[%s2642_s20 + $0x3b0] sm:$0xff] }
 0x37b   : > { %v1819_v8 = vpack.c.bf16 %v1119_v48, %v1117_v46 }
 0x37d   : > { %1788 = vmatpush1.bf16.msra.mxu0 %v1787_v61 }
 0x37e   : > { %1790 = vmatprep.subr.bf16.mxu0 %v1789_v50 }
 0x381   : > { %1792 = vmatpush1.bf16.msra.mxu0 %v1791_v52  ;;  %v1121_v52 = vld [vmem:[%s2642_s20 + $0x3c0] sm:$0xff] }
 0x382   : > { %1794 = vmatprep.subr.bf16.mxu0 %v1793_v53  ;;  %v1123_v53 = vld [vmem:[%s2642_s20 + $0x3d0] sm:$0xff] }
 0x383   : > { %v1823_v62 = vpack.c.bf16 %v1123_v53, %v1121_v52 }
 0x385   : > { %1796 = vmatpush1.bf16.msra.mxu0 %v1795_v59 }
 0x386   : > { %1798 = vmatprep.subr.bf16.mxu0 %v1797_v60 }
 0x389   : > { %1800 = vmatpush1.bf16.msra.mxu0 %v1799_v2  ;;  %v1125_v2 = vld [vmem:[%s2642_s20 + $0x3e0] sm:$0xff] }
 0x38a   : > { %1802 = vmatprep.subr.bf16.mxu0 %v1801_v3  ;;  %v1127_v3 = vld [vmem:[%s2642_s20 + $0x3f0] sm:$0xff] }
 0x38d   : > { %1804 = vmatpush1.bf16.msra.mxu0 %v1803_v10 }
 0x38e   : > { %1806 = vmatprep.subr.bf16.mxu0 %v1805_v11  ;;  %v1827_v11 = vpack.c.bf16 %v1127_v3, %v1125_v2 }
 0x391   : > { %1808 = vmatpush1.bf16.msra.mxu0 %v1807_v25 }
 0x392   : > { %v890_v33 = vpop.f32.mrb[8].mxu1  ;;  %1810 = vmatprep.subr.bf16.mxu0 %v1809_v19 }
 0x393   : > { %v891_v37 = vadd.f32 %v890_v33, %v726_v28  ;;  %v892_v38 = vpop.f32.mrb[9].mxu1 }
 0x394   : > { %v893_v42 = vadd.f32 %v892_v38, %v730_v31 }
 0x395   : > { %v931_v43 = vmul.f32 0.70710677, %v891_v37  ;;  %1812 = vmatpush1.bf16.msra.mxu0 %v1811_v32  ;;  %v915_v18 = vmul.f32 0.5, %v891_v37 }
 0x396   : > { %v932_v17 = vmul.f32 0.70710677, %v893_v42  ;;  %v896_v44 = vpop.f32.mrb[10].mxu1  ;;  %1814 = vmatprep.subr.bf16.mxu0 %v1813_v34  ;;  %v916_v22 = vmul.f32 0.5, %v893_v42 }
 0x397   : > { %1982 = verf.f32 %v931_v43  ;;  %v897_v41 = vadd.f32 %v896_v44, %v726_v28  ;;  %v898_v49 = vpop.f32.mrb[11].mxu1 }
 0x398   : > { %1984 = verf.f32 %v932_v17  ;;  %v899_v61 = vadd.f32 %v898_v49, %v730_v31  ;;  %v993_v49 = vld [vmem:[#allocation2] sm:$0xff] }
 0x399   : > { %v935_v50 = vmul.f32 0.70710677, %v897_v41  ;;  %1816 = vmatpush1.bf16.msra.mxu0 %v1815_v4 }
 0x39a   : > { %v936_v12 = vmul.f32 0.70710677, %v899_v61  ;;  %v902_v23 = vpop.f32.mrb[12].mxu1  ;;  %1818 = vmatprep.subr.bf16.mxu0 %v1817_v45  ;;  %v920_v29 = vmul.f32 0.5, %v899_v61 }
 0x39b   : > { %1986 = verf.f32 %v935_v50  ;;  %v903_v54 = vadd.f32 %v902_v23, %v726_v28  ;;  %v904_v55 = vpop.f32.mrb[13].mxu1  ;;  %v996_v23 = vld [vmem:[#allocation2 + $0x18] sm:$0xff] }
 0x39c   : > { %1988 = verf.f32 %v936_v12  ;;  %v905_v59 = vadd.f32 %v904_v55, %v730_v31  ;;  %v995_v12 = vld [vmem:[#allocation2 + $0x10] sm:$0xff]  ;;  %v997_v55 = vld [vmem:[#allocation2 + $0x20] sm:$0xff] }
 0x39d   : > { %v939_v60 = vmul.f32 0.70710677, %v903_v54  ;;  %1820 = vmatpush1.bf16.msra.mxu0 %v1819_v8  ;;  %v923_v37 = vmul.f32 0.5, %v903_v54 }
 0x39e   : > { %v940_v63 = vmul.f32 0.70710677, %v905_v59  ;;  %v908_v0 = vpop.f32.mrb[14].mxu1  ;;  %1822 = vmatprep.subr.bf16.mxu0 %v1821_v51  ;;  %v924_v38 = vmul.f32 0.5, %v905_v59 }
 0x39f   : > { %1990 = verf.f32 %v939_v60  ;;  %v909_v5 = vadd.f32 %v908_v0, %v726_v28  ;;  %v910_v6 = vpop.f32.mrb[15].mxu1  ;;  %v1000_v0 = vld [vmem:[#allocation2 + $0x38] sm:$0xff] }
 0x3a0   : > { %1992 = verf.f32 %v940_v63  ;;  %v911_v7 = vadd.f32 %v910_v6, %v730_v31  ;;  %v919_v31 = vmul.f32 0.5, %v897_v41  ;;  %v999_v63 = vld [vmem:[#allocation2 + $0x30] sm:$0xff] }
 0x3a1   : > { %v1983_v9 = vpop.eup %1982  ;;  %v943_v10 = vmul.f32 0.70710677, %v909_v5  ;;  %1824 = vmatpush1.bf16.msra.mxu0 %v1823_v62  ;;  %v927_v46 = vmul.f32 0.5, %v909_v5 }
 0x3a2   : > { %v1985_v13 = vpop.eup %1984  ;;  %v963_v14 = vadd.f32 1.0, %v1983_v9  ;;  %v944_v21 = vmul.f32 0.70710677, %v911_v7  ;;  %1826 = vmatprep.subr.bf16.mxu0 %v1825_v1  ;;  %v928_v44 = vmul.f32 0.5, %v911_v7  ;;  %v1335_v7 = vld [vmem:[#allocation12] sm:$0x3] (!%p1564_p7) }
 0x3a3   : > { %v964_v24 = vadd.f32 1.0, %v1985_v13  ;;  %1994 = verf.f32 %v943_v10  ;;  %v1355_v9 = vld [vmem:[#allocation4] sm:$0xff] (!%p1564_p7)  ;;  %v1340_v10 = vrot.slane (!%p1564_p7), %v1335_v7, %v717_v16  ;;  %v1344_v13 = vrot.slane (!%p1564_p7), %v1335_v7, %v721_v20 }
 0x3a4   : > { %1996 = verf.f32 %v944_v21  ;;  %v979_v27 = vmul.f32 %v963_v14, %v915_v18  ;;  %v1356_v14 = vld [vmem:[#allocation4 + $0x8] sm:$0xff] (!%p1564_p7)  ;;  %v1358_v18 = vld [vmem:[#allocation4 + $0x18] sm:$0xff] (!%p1564_p7) }
 0x3a5   : > { %v1987_v25 = vpop.eup %1986  ;;  %1828 = vmatpush1.bf16.msra.mxu0 %v1827_v11  ;;  %v980_v19 = vmul.f32 %v964_v24, %v916_v22  ;;  %v1357_v22 = vld [vmem:[#allocation4 + $0x10] sm:$0xff] (!%p1564_p7) }
 0x3a6   : > { %v1989_v26 = vpop.eup %1988  ;;  %v967_v28 = vadd.f32 1.0, %v1987_v25 }
 0x3a7   : > { %v968_v30 = vadd.f32 1.0, %v1989_v26  ;;  %1282 = vmatprep.mubr.f32.mxu0 %v980_v19 }
 0x3a8   : > { %1283 = vmatmul.mubr.f32.vlgmr.msra.gmra.mrb[0].mxu0 %v979_v27  ;;  %v983_v36 = vmul.f32 %v967_v28, %v919_v31 }
 0x3a9   : > { %v1991_v32 = vpop.eup %1990  ;;  %v984_v33 = vmul.f32 %v968_v30, %v920_v29  ;;  %v1359_v29 = vld [vmem:[#allocation4 + $0x20] sm:$0xff] (!%p1564_p7) }
 0x3aa   : > { %v1993_v34 = vpop.eup %1992  ;;  %v971_v35 = vadd.f32 1.0, %v1991_v32 }
 0x3ab   : > { %v972_v39 = vadd.f32 1.0, %v1993_v34  ;;  %1288 = vmatprep.mubr.f32.mxu0 %v984_v33  ;;  %v1360_v33 = vld [vmem:[#allocation4 + $0x28] sm:$0xff] (!%p1564_p7) }
 0x3ac   : > { %1289 = vmatmul.mubr.f32.gmra.mrb[2].mxu0 %v983_v36  ;;  %v987_v17 = vmul.f32 %v971_v35, %v923_v37  ;;  %v1361_v36 = vld [vmem:[#allocation4 + $0x30] sm:$0xff] (!%p1564_p7) }
 0x3ad   : > { %v1995_v40 = vpop.eup %1994  ;;  %v988_v42 = vmul.f32 %v972_v39, %v924_v38  ;;  %v1362_v39 = vld [vmem:[#allocation4 + $0x38] sm:$0xff] (!%p1564_p7) }
 0x3ae   : > { %v1997_v43 = vpop.eup %1996  ;;  %v975_v4 = vadd.f32 1.0, %v1995_v40 }
 0x3af   : > { %v976_v45 = vadd.f32 1.0, %v1997_v43  ;;  %1294 = vmatprep.mubr.f32.mxu0 %v988_v42 }
 0x3b0   : > { %1295 = vmatmul.mubr.f32.gmra.mrb[4].mxu0 %v987_v17  ;;  %v991_v41 = vmul.f32 %v975_v4, %v927_v46 }
 0x3b1   : > { %v992_v48 = vmul.f32 %v976_v45, %v928_v44 }
 0x3b3   : > { %1300 = vmatprep.mubr.f32.mxu0 %v992_v48 }
 0x3b4   : > { %1301 = vmatmul.mubr.f32.gmra.mrb[6].mxu0 %v991_v41 }
 0x47b   : > { %v1284_v57 = vpop.f32.mrb[0].mxu0 }
 0x47c   : > { %v1307_v61 = vadd.f32 %v1284_v57, %v993_v49  ;;  %v1286_v50 = vpop.f32.mrb[1].mxu0 }
 0x47d   : > { %v1308_v8 = vadd.f32 %v1286_v50, %v994_v47 }
 0x47e   : > { %1315 = vst [vmem:[#allocation2] sm:$0xff] %v1307_v61 }
 0x47f   : > { %1316 = vst [vmem:[#allocation2 + $0x8] sm:$0xff] %v1308_v8  ;;  %v1290_v51 = vpop.f32.mrb[2].mxu0 }
 0x480   : > { %v1309_v52 = vadd.f32 %v1290_v51, %v995_v12  ;;  %v1292_v53 = vpop.f32.mrb[3].mxu0 }
 0x481   : > { %v1310_v54 = vadd.f32 %v1292_v53, %v996_v23 }
 0x482   : > { %1317 = vst [vmem:[#allocation2 + $0x10] sm:$0xff] %v1309_v52 }
 0x483   : > { %1318 = vst [vmem:[#allocation2 + $0x18] sm:$0xff] %v1310_v54  ;;  %v1296_v58 = vpop.f32.mrb[4].mxu0 }
 0x484   : > { %v1311_v59 = vadd.f32 %v1296_v58, %v997_v55  ;;  %v1298_v60 = vpop.f32.mrb[5].mxu0 }
 0x485   : > { %v1312_v62 = vadd.f32 %v1298_v60, %v998_v56  ;;  %1326 = sbr.rel (%p1564_p7) target bundleno = 1176 (0x498), region = 84  ;;  %v1327_v6 = vld [vmem:[#allocation2] sm:$0xff] (!%p1564_p7) }
 0x486   : > { %1319 = vst [vmem:[#allocation2 + $0x20] sm:$0xff] %v1311_v59  ;;  %v1328_v11 = vld [vmem:[#allocation2 + $0x8] sm:$0xff] (!%p1564_p7)  ;;  %v1347_v25 = vadd.f32 (!%p1564_p7), %v1340_v10, %v1327_v6 }
 0x487   : > { %1320 = vst [vmem:[#allocation2 + $0x28] sm:$0xff] %v1312_v62  ;;  %v1302_v1 = vpop.f32.mrb[6].mxu0  ;;  %v1348_v19 = vadd.f32 (!%p1564_p7), %v1344_v13, %v1328_v11 }
 0x488   : > { %v1313_v2 = vadd.f32 %v1302_v1, %v999_v63  ;;  %v1304_v3 = vpop.f32.mrb[7].mxu0  ;;  %v1363_v34 = vadd.f32 (!%p1564_p7), %v1355_v9, %v1347_v25 }
 0x489   : > { %v1314_v5 = vadd.f32 %v1304_v3, %v1000_v0  ;;  %v1329_v21 = vld [vmem:[#allocation2 + $0x10] sm:$0xff] (!%p1564_p7)  ;;  %v1364_v35 = vadd.f32 (!%p1564_p7), %v1356_v14, %v1348_v19 }
 0x48a   : > { %1321 = vst [vmem:[#allocation2 + $0x30] sm:$0xff] %v1313_v2  ;;  %v1330_v24 = vld [vmem:[#allocation2 + $0x18] sm:$0xff] (!%p1564_p7)  ;;  %v1349_v26 = vadd.f32 (!%p1564_p7), %v1340_v10, %v1329_v21  ;;  %1371 = vst [vmem:[#allocation16] sm:$0xff] (!%p1564_p7), %v1363_v34 }
 0x48b   : > { %1322 = vst [vmem:[#allocation2 + $0x38] sm:$0xff] %v1314_v5  ;;  %v1350_v27 = vadd.f32 (!%p1564_p7), %v1344_v13, %v1330_v24  ;;  %1372 = vst [vmem:[#allocation16 + $0x8] sm:$0xff] (!%p1564_p7), %v1364_v35 }
 0x48c   : > { %v1365_v15 = vadd.f32 %v1357_v22, %v1349_v26 }
 0x48d   : > { %v1331_v28 = vld [vmem:[#allocation2 + $0x20] sm:$0xff]  ;;  %v1366_v20 = vadd.f32 %v1358_v18, %v1350_v27 }
 0x48e   : > { %v1332_v30 = vld [vmem:[#allocation2 + $0x28] sm:$0xff]  ;;  %v1351_v31 = vadd.f32 %v1340_v10, %v1331_v28  ;;  %1373 = vst [vmem:[#allocation16 + $0x10] sm:$0xff] %v1365_v15 }
 0x48f   : > { %v1352_v32 = vadd.f32 %v1344_v13, %v1332_v30  ;;  %1374 = vst [vmem:[#allocation16 + $0x18] sm:$0xff] %v1366_v20 }
 0x490   : > { %v1367_v37 = vadd.f32 %v1359_v29, %v1351_v31 }
 0x491   : > { %v1333_v16 = vld [vmem:[#allocation2 + $0x30] sm:$0xff]  ;;  %v1368_v40 = vadd.f32 %v1360_v33, %v1352_v32 }
 0x492   : > { %v1334_v38 = vld [vmem:[#allocation2 + $0x38] sm:$0xff]  ;;  %v1353_v42 = vadd.f32 %v1340_v10, %v1333_v16  ;;  %1375 = vst [vmem:[#allocation16 + $0x20] sm:$0xff] %v1367_v37 }
 0x493   : > { %v1354_v43 = vadd.f32 %v1344_v13, %v1334_v38  ;;  %1376 = vst [vmem:[#allocation16 + $0x28] sm:$0xff] %v1368_v40 }
 0x494   : > { %v1369_v4 = vadd.f32 %v1361_v36, %v1353_v42 }
 0x495   : > { %v1370_v17 = vadd.f32 %v1362_v39, %v1354_v43 }
 0x496   : > { %1377 = vst [vmem:[#allocation16 + $0x30] sm:$0xff] %v1369_v4 }
 0x497   : > { %1378 = vst [vmem:[#allocation16 + $0x38] sm:$0xff] %v1370_v17 }
 0x498 PF: > { %p1895_p3 = scmp.eq.s32.totalorder %s2383_s30, 1  ;;  %s2311_s11 = smov [#allocation16]  }
 0x499   : > { %s1389_s10 = sshll.u32 %s2311_s11, 4  ;;  %s1390_s10 = int_to_ptr.vmem [resolvable:$true] %s1389_s10 }
 0x49a   : > { %s2200_s16 = scalar_lea.vmem %s1390_s10, 1024  ;;  %p2207_p9 = scmp.lt.s32.totalorder %s1390_s10, %s1390_s10 }
 0x49b   : > { %p2201_p1 = scmp.ne.s32.totalorder %s1390_s10, %s2200_s16  ;;  %p2208_p4 = scmp.lt.s32.totalorder %s2200_s16, %s2200_s16 }
 0x49d   : > { %p2202_p5 = pnand %p2201_p1, %p1895_p3  ;;  %p2209_p13 = por %p2208_p4, %p2207_p9 }
 0x49f   : > { %p2203_p11 = pneg %p2202_p5 }
 0x4a1   : > { %p2210_p2 = pnand %p2209_p13, %p2203_p11 }
 0x4a3   : > { %2213 = shalt.err (!%p2210_p2)
}
 0x4a4   : > { %s3101_s5 = sld [smem:[#allocation31_spill]] }
 0x4aa   : > { %s2214_s17 = scalar_lea.hbm %s3101_s5, 1024 }
 0x4ab   : > { %p2215_p10 = scmp.ne.s32.totalorder %s3101_s5, %s2214_s17  ;;  %p2220_p0 = scmp.lt.u32.totalorder %s2214_s17, %s3101_s5 }
 0x4ad   : > { %p2216_p6 = pnand %p2215_p10, %p1895_p3 }
 0x4af   : > { %p2217_p8 = pneg %p2216_p6 }
 0x4b1   : > { %p2222_p12 = pnand %p2220_p0, %p2217_p8 }
 0x4b3   : > { %2225 = shalt.err (!%p2222_p12)
}
 0x4b4   : > { %s2312_s18 = smov 256   ;;  %s2313_s15 = smov 16  }
 0x4b5   : > { %1860 = dma.vmem_to_hbm [thread:$0]  (%p1895_p3), %s1390_s10, 1024, %s3101_s5, [#allocation6], %s2312_s18, %s2312_s18, %s2313_s15  }
 0x4b6   : > { %2271 = dma.done.wait (%p1895_p3), [#allocation6], 1024  }
 0x4b7   : > { %2273 = vsyncadd (%p1895_p3), [#allocation6], 4294966272 }
 0x4b8 PF: > { %s26_s29 = sadd.s32 1, %s2296_s29   ;;  %s3102_s24 = sld [smem:[#allocation23_spill]] }
 0x4b9   : > { %p23_p7 = scmp.ge.s32.totalorder %s26_s29, 4   ;;  %s3103_s22 = sld [smem:[#allocation27_spill]] }
 0x4ba   : > { %s3104_s4 = sld [smem:[#allocation26_spill]]  ;;  %s3105_s25 = smov %s2284_s26 }
 0x4bb   : > { %s3107_s27 = smov %s2292_s28  ;;  %25 = sbr.rel (!%p23_p7) target bundleno = 14 (0xe), region = 136 }
 0x4bf   : > { %s3106_s26 = smov %s3103_s22 }
 0x4c0   : > { %s3108_s28 = smov %s3104_s4 }
 0x4c2   :  { %1405 = vsyncpa [#allocation5], 1 }
 0x4c3   :  { %1407 = vsyncpa [#allocation5 + $0x1], 1 }
 0x4c4   :  { %1408 = vsyncpa [#allocation8], 1 }
 0x4c5   :  { %1410 = vsyncpa [#allocation8 + $0x1], 1 }
 0x4c6   :  { %1411 = vsyncpa [#allocation11], 1 }
 0x4c7   :  { %1413 = vsyncpa [#allocation11 + $0x1], 1 }
 0x4c8   :  { %1414 = vsyncpa [#allocation14], 1 }
 0x4c9   :  { %1415 = vsyncpa [#allocation6], 1 }
 0x4ca   :  { %1417 = vsyncpa [#allocation6 + $0x1], 1 }

// kernel: gpt_forward.17
= control target key start
LH: loop header
LB: loop body
LE: loop exit
PB: predicated region body
PF: predicated region fallthrough
CT: control target
= control target key end

     0   :  { %9 = vsyncpa [#allocation4], 0  ;;  %s674_s0 = inlined_call_operand.hbm [shape: f32[2,256], index: 0, kind: input, shape index: {}]   ;;  %s675_s1 = inlined_call_operand.hbm [shape: f32[256,256], index: 1, kind: input, shape index: {}]   ;;  %s676_s2 = inlined_call_operand.hbm [shape: f32[1,256], index: 2, kind: input, shape index: {}]   ;;  %s677_s3 = inlined_call_operand.hbm [shape: f32[1,256], index: 3, kind: input, shape index: {}]   ;;  %s678_s4 = inlined_call_operand.hbm [shape: f32[2,256], index: 4, kind: output, shape index: {}]  }
   0x1   :  { %10 = vsyncpa [#allocation7], 0 }
   0x2   :  { %11 = vsyncpa [#allocation10], 0 }
   0x3   :  { %12 = vsyncpa [#allocation5], 0  ;;  %s548_s15 = smov [#allocation6]   ;;  %s430_s19 = scalar_lea.hbm %s675_s1, 8192 }
   0x4   :  { %s28_s16 = sshll.u32 %s548_s15, 4  ;;  %p431_p0 = scmp.ne.s32.totalorder %s675_s1, %s430_s19  ;;  %s29_s16 = int_to_ptr.vmem [resolvable:$true] %s28_s16 }
   0x5   :  { %p434_p1 = scmp.lt.u32.totalorder %s430_s19, %s675_s1 }
   0x7   :  { %p436_p2 = pnand %p434_p1, %p431_p0 }
   0x9   :  { %439 = shalt.err (!%p436_p2)
}
   0xa   :  { %s440_s24 = scalar_lea.vmem %s29_s16, 8192  ;;  %p445_p4 = scmp.lt.s32.totalorder %s29_s16, %s29_s16 }
   0xb   :  { %p441_p3 = scmp.ne.s32.totalorder %s29_s16, %s440_s24  ;;  %p446_p5 = scmp.lt.s32.totalorder %s440_s24, %s440_s24 }
   0xd   :  { %p447_p6 = por %p446_p5, %p445_p4 }
   0xf   :  { %p448_p7 = pnand %p447_p6, %p441_p3 }
  0x11   :  { %451 = shalt.err (!%p448_p7)
}
  0x12   :  { %s549_s25 = smov 256   ;;  %s550_s26 = smov 16  }
  0x13   :  { %34 = dma.hbm_to_vmem [thread:$0]  %s675_s1, 8192, %s29_s16, [#allocation7], %s549_s25, %s549_s25, %s550_s26  }
  0x14   :  { %s551_s29 = smov [#allocation3]   ;;  %s552_s5 = smov [#allocation8]  }
  0x15   :  { %s19_s30 = sshll.u32 %s551_s29, 4  ;;  %s41_s6 = sshll.u32 %s552_s5, 4  ;;  %s20_s30 = int_to_ptr.vmem [resolvable:$true] %s19_s30  ;;  %s42_s6 = int_to_ptr.vmem [resolvable:$true] %s41_s6 }
  0x16   :  { %s452_s9 = scalar_lea.hbm %s674_s0, 64 }
  0x17   :  { %p453_p8 = scmp.ne.s32.totalorder %s674_s0, %s452_s9  ;;  %p456_p9 = scmp.lt.u32.totalorder %s452_s9, %s674_s0 }
  0x19   :  { %p458_p10 = pnand %p456_p9, %p453_p8 }
  0x1b   :  { %461 = shalt.err (!%p458_p10)
}
  0x1c   :  { %s462_s1 = scalar_lea.vmem %s20_s30, 64  ;;  %p467_p12 = scmp.lt.s32.totalorder %s20_s30, %s20_s30 }
  0x1d   :  { %p463_p11 = scmp.ne.s32.totalorder %s20_s30, %s462_s1  ;;  %p468_p13 = scmp.lt.s32.totalorder %s462_s1, %s462_s1 }
  0x1f   :  { %p469_p0 = por %p468_p13, %p467_p12 }
  0x21   :  { %p470_p1 = pnand %p469_p0, %p463_p11 }
  0x23   :  { %473 = shalt.err (!%p470_p1)
}
  0x24   :  { %22 = dma.hbm_to_vmem [thread:$0]  %s674_s0, 64, %s20_s30, [#allocation4]  }
  0x25   :  { %s474_s18 = scalar_lea.hbm %s676_s2, 32 }
  0x26   :  { %p475_p2 = scmp.ne.s32.totalorder %s676_s2, %s474_s18  ;;  %p478_p3 = scmp.lt.u32.totalorder %s474_s18, %s676_s2 }
  0x28   :  { %p480_p4 = pnand %p478_p3, %p475_p2 }
  0x2a   :  { %483 = shalt.err (!%p480_p4)
}
  0x2b   :  { %s484_s23 = scalar_lea.vmem %s42_s6, 32  ;;  %p489_p6 = scmp.lt.s32.totalorder %s42_s6, %s42_s6 }
  0x2c   :  { %p485_p5 = scmp.ne.s32.totalorder %s42_s6, %s484_s23  ;;  %p490_p7 = scmp.lt.s32.totalorder %s484_s23, %s484_s23 }
  0x2e   :  { %p491_p8 = por %p490_p7, %p489_p6 }
  0x30   :  { %p492_p9 = pnand %p491_p8, %p485_p5 }
  0x32   :  { %495 = shalt.err (!%p492_p9)
}
  0x33   :  { %44 = dma.hbm_to_vmem [thread:$0]  %s676_s2, 32, %s42_s6, [#allocation7]  }
  0x34   :  { %s553_s25 = smov [#allocation9]   ;;  %s496_s29 = scalar_lea.hbm %s677_s3, 32 }
  0x35   :  { %s51_s26 = sshll.u32 %s553_s25, 4  ;;  %p497_p10 = scmp.ne.s32.totalorder %s677_s3, %s496_s29  ;;  %s52_s26 = int_to_ptr.vmem [resolvable:$true] %s51_s26 }
  0x36   :  { %p500_p11 = scmp.lt.u32.totalorder %s496_s29, %s677_s3 }
  0x38   :  { %p502_p12 = pnand %p500_p11, %p497_p10 }
  0x3a   :  { %505 = shalt.err (!%p502_p12)
}
  0x3b   :  { %s506_s9 = scalar_lea.vmem %s52_s26, 32  ;;  %p511_p0 = scmp.lt.s32.totalorder %s52_s26, %s52_s26 }
  0x3c   :  { %p507_p13 = scmp.ne.s32.totalorder %s52_s26, %s506_s9  ;;  %p512_p1 = scmp.lt.s32.totalorder %s506_s9, %s506_s9 }
  0x3e   :  { %p513_p2 = por %p512_p1, %p511_p0 }
  0x40   :  { %p514_p3 = pnand %p513_p2, %p507_p13 }
  0x42   :  { %517 = shalt.err (!%p514_p3)
}
  0x43   :  { %54 = dma.hbm_to_vmem [thread:$0]  %s677_s3, 32, %s52_s26, [#allocation10]  }
  0x44   :  { %540 = dma.done.wait [#allocation4], 64  }
  0x45   :  { %541 = vsyncadd [#allocation4], 4294967232 }
  0x46   :  { %542 = dma.done.wait [#allocation7], 8224  }
  0x47   :  { %543 = vsyncadd [#allocation7], 4294959072 }
  0x48   :  { %544 = dma.done.wait [#allocation10], 32  }
  0x49   :  { %545 = vsyncadd [#allocation10], 4294967264  ;;  %v77_v0 = vlaneseq  ;;  %v554_v1 = vmov 1983009808   ;;  %v636_v6 = vld [vmem:[#allocation3] sm:$0xf] }
  0x4a   :  { %v75_v2 = vunpack.c.l.s4 %v554_v1  ;;  %vm84_vm0 = vcmask 1041408   ;;  %v174_v12 = vld [vmem:[#allocation6 + $0x8] sm:$0xff]  ;;  %v176_v13 = vld [vmem:[#allocation6 + $0x18] sm:$0xff]  ;;  %v173_v14 = vld [vmem:[#allocation6] sm:$0xff]  ;;  %s557_s3 = smov [#allocation11]  }
  0x4b   :  { %v631_v3 = vshrl.u32 %v77_v0, 7  ;;  %v354_v15 = vpack.c.bf16 %v176_v13, %v174_v12  ;;  %v175_v16 = vld [vmem:[#allocation6 + $0x10] sm:$0xff]  ;;  %v178_v17 = vld [vmem:[#allocation6 + $0x28] sm:$0xff]  ;;  %v180_v18 = vld [vmem:[#allocation6 + $0x38] sm:$0xff]  ;;  %s343_s10 = sshll.u32 %s557_s3, 4  ;;  %s344_s10 = int_to_ptr.vmem [resolvable:$true] %s343_s10 }
  0x4c   :  { %v76_v4 = vunpack.c.0.s8 %v75_v2  ;;  %v356_v19 = vpack.c.bf16 %v175_v16, %v173_v14  ;;  %v358_v20 = vpack.c.bf16 %v180_v18, %v178_v17  ;;  %v177_v21 = vld [vmem:[#allocation6 + $0x20] sm:$0xff]  ;;  %v179_v22 = vld [vmem:[#allocation6 + $0x30] sm:$0xff]  ;;  %v182_v23 = vld [vmem:[#allocation6 + $0x48] sm:$0xff]  ;;  %v555_v2 = vmov 269488144   ;;  %s518_s11 = scalar_lea.vmem %s344_s10, 64  ;;  %p523_p5 = scmp.lt.s32.totalorder %s344_s10, %s344_s10 }
  0x4d   :  { %355 = vmatprep.subr.bf16.mxu0 %v354_v15  ;;  %v184_v24 = vld [vmem:[#allocation6 + $0x58] sm:$0xff]  ;;  %v360_v25 = vpack.c.bf16 %v179_v22, %v177_v21  ;;  %v181_v27 = vld [vmem:[#allocation6 + $0x40] sm:$0xff]  ;;  %v183_v28 = vld [vmem:[#allocation6 + $0x50] sm:$0xff]  ;;  %p519_p4 = scmp.ne.s32.totalorder %s344_s10, %s518_s11  ;;  %p524_p6 = scmp.lt.s32.totalorder %s518_s11, %s518_s11 }
  0x4e   :  { %v634_v5 = vsub.s32 %v76_v4, %v631_v3  ;;  %357 = vmatpush1.bf16.msra.mxu0 %v356_v19  ;;  %v362_v26 = vpack.c.bf16 %v184_v24, %v182_v23  ;;  %v186_v29 = vld [vmem:[#allocation6 + $0x68] sm:$0xff]  ;;  %v188_v30 = vld [vmem:[#allocation6 + $0x78] sm:$0xff]  ;;  %v364_v31 = vpack.c.bf16 %v183_v28, %v181_v27  ;;  %v185_v33 = vld [vmem:[#allocation6 + $0x60] sm:$0xff]  ;;  %v94_v4 = vunpack.c.l.s4 %v555_v2 }
  0x4f   :  { %359 = vmatprep.subr.bf16.mxu0 %v358_v20  ;;  %v366_v32 = vpack.c.bf16 %v188_v30, %v186_v29  ;;  %v187_v34 = vld [vmem:[#allocation6 + $0x70] sm:$0xff]  ;;  %v190_v35 = vld [vmem:[#allocation6 + $0x88] sm:$0xff]  ;;  %v192_v36 = vld [vmem:[#allocation6 + $0x98] sm:$0xff]  ;;  %p525_p7 = por %p524_p6, %p523_p5 }
  0x50   :  { %v80_v7 = vrot.slane %v636_v6, %v634_v5  ;;  %v368_v37 = vpack.c.bf16 %v187_v34, %v185_v33  ;;  %v370_v38 = vpack.c.bf16 %v192_v36, %v190_v35  ;;  %v189_v39 = vld [vmem:[#allocation6 + $0x80] sm:$0xff]  ;;  %v191_v40 = vld [vmem:[#allocation6 + $0x90] sm:$0xff]  ;;  %v194_v41 = vld [vmem:[#allocation6 + $0xa8] sm:$0xff] }
  0x51   :  { %v196_v42 = vld [vmem:[#allocation6 + $0xb8] sm:$0xff]  ;;  %v372_v43 = vpack.c.bf16 %v191_v40, %v189_v39  ;;  %v193_v45 = vld [vmem:[#allocation6 + $0xa0] sm:$0xff]  ;;  %v195_v46 = vld [vmem:[#allocation6 + $0xb0] sm:$0xff]  ;;  %p526_p8 = pnand %p525_p7, %p519_p4 }
  0x52   :  { %v81_v8 = vcombine.high %v80_v7, %v80_v7  ;;  %v85_v9 = vsel %vm84_vm0, %v80_v7, 0.0  ;;  %361 = vmatpush1.bf16.msra.mxu0 %v360_v25  ;;  %v374_v44 = vpack.c.bf16 %v196_v42, %v194_v41  ;;  %v198_v47 = vld [vmem:[#allocation6 + $0xc8] sm:$0xff]  ;;  %v200_v48 = vld [vmem:[#allocation6 + $0xd8] sm:$0xff]  ;;  %v376_v49 = vpack.c.bf16 %v195_v46, %v193_v45  ;;  %v197_v51 = vld [vmem:[#allocation6 + $0xc0] sm:$0xff] }
  0x53   :  { %363 = vmatprep.subr.bf16.mxu0 %v362_v26  ;;  %v378_v50 = vpack.c.bf16 %v200_v48, %v198_v47  ;;  %v199_v52 = vld [vmem:[#allocation6 + $0xd0] sm:$0xff]  ;;  %v202_v53 = vld [vmem:[#allocation6 + $0xe8] sm:$0xff]  ;;  %v204_v54 = vld [vmem:[#allocation6 + $0xf8] sm:$0xff]  ;;  %v95_v7 = vunpack.c.0.s8 %v94_v4 }
  0x54   :  { %v86_v10 = vsel %vm84_vm0, %v81_v8, 0.0  ;;  %v380_v55 = vpack.c.bf16 %v199_v52, %v197_v51  ;;  %v382_v56 = vpack.c.bf16 %v204_v54, %v202_v53  ;;  %v201_v57 = vld [vmem:[#allocation6 + $0xe0] sm:$0xff]  ;;  %v203_v58 = vld [vmem:[#allocation6 + $0xf0] sm:$0xff]  ;;  %v206_v59 = vld [vmem:[#allocation6 + $0x108] sm:$0xff] }
  0x55   :  { %v87_v11 = vadd.f32 %v86_v10, %v85_v9  ;;  %v208_v60 = vld [vmem:[#allocation6 + $0x118] sm:$0xff]  ;;  %v384_v61 = vpack.c.bf16 %v203_v58, %v201_v57  ;;  %v205_v63 = vld [vmem:[#allocation6 + $0x100] sm:$0xff]  ;;  %v207_v0 = vld [vmem:[#allocation6 + $0x110] sm:$0xff]  ;;  %v643_v8 = vsub.s32 %v95_v7, %v631_v3 }
  0x56   :  { %365 = vmatpush1.bf16.msra.mxu0 %v364_v31  ;;  %v386_v62 = vpack.c.bf16 %v208_v60, %v206_v59  ;;  %v388_v1 = vpack.c.bf16 %v207_v0, %v205_v63  ;;  %v210_v19 = vld [vmem:[#allocation6 + $0x128] sm:$0xff]  ;;  %v212_v20 = vld [vmem:[#allocation6 + $0x138] sm:$0xff]  ;;  %v209_v22 = vld [vmem:[#allocation6 + $0x120] sm:$0xff]  ;;  %v136_v63 = vsub.s32 0, %v631_v3  ;;  %v140_v0 = vsub.s32 1, %v631_v3 }
  0x57   :  { %88 = vadd.xlane.f32.xlu0 %v87_v11  ;;  %367 = vmatprep.subr.bf16.mxu0 %v366_v32  ;;  %v390_v21 = vpack.c.bf16 %v212_v20, %v210_v19  ;;  %v211_v23 = vld [vmem:[#allocation6 + $0x130] sm:$0xff]  ;;  %v216_v25 = vld [vmem:[#allocation6 + $0x158] sm:$0xff]  ;;  %v213_v27 = vld [vmem:[#allocation6 + $0x140] sm:$0xff] }
  0x58   :  { %v392_v24 = vpack.c.bf16 %v211_v23, %v209_v22  ;;  %v215_v28 = vld [vmem:[#allocation6 + $0x150] sm:$0xff]  ;;  %v218_v30 = vld [vmem:[#allocation6 + $0x168] sm:$0xff]  ;;  %v220_v31 = vld [vmem:[#allocation6 + $0x178] sm:$0xff]  ;;  %v556_v22 = vmov 0.0  }
  0x59   :  { %v396_v29 = vpack.c.bf16 %v215_v28, %v213_v27  ;;  %v217_v32 = vld [vmem:[#allocation6 + $0x160] sm:$0xff]  ;;  %v398_v33 = vpack.c.bf16 %v220_v31, %v218_v30  ;;  %v219_v34 = vld [vmem:[#allocation6 + $0x170] sm:$0xff]  ;;  %v222_v35 = vld [vmem:[#allocation6 + $0x188] sm:$0xff]  ;;  %71 = vst [vmem:[#allocation2] sm:$0xf] %v556_v22 }
  0x5a   :  { %369 = vmatpush1.bf16.msra.mxu0 %v368_v37  ;;  %v224_v36 = vld [vmem:[#allocation6 + $0x198] sm:$0xff]  ;;  %v400_v37 = vpack.c.bf16 %v219_v34, %v217_v32  ;;  %v221_v39 = vld [vmem:[#allocation6 + $0x180] sm:$0xff]  ;;  %v223_v40 = vld [vmem:[#allocation6 + $0x190] sm:$0xff] }
  0x5b   :  { %371 = vmatprep.subr.bf16.mxu0 %v370_v38  ;;  %v402_v38 = vpack.c.bf16 %v224_v36, %v222_v35  ;;  %v226_v41 = vld [vmem:[#allocation6 + $0x1a8] sm:$0xff]  ;;  %v228_v42 = vld [vmem:[#allocation6 + $0x1b8] sm:$0xff]  ;;  %v225_v45 = vld [vmem:[#allocation6 + $0x1a0] sm:$0xff] }
  0x5c   :  { %v227_v46 = vld [vmem:[#allocation6 + $0x1b0] sm:$0xff]  ;;  %v230_v47 = vld [vmem:[#allocation6 + $0x1c8] sm:$0xff]  ;;  %v232_v48 = vld [vmem:[#allocation6 + $0x1d8] sm:$0xff] }
  0x5d   :  { %v229_v51 = vld [vmem:[#allocation6 + $0x1c0] sm:$0xff]  ;;  %v231_v52 = vld [vmem:[#allocation6 + $0x1d0] sm:$0xff]  ;;  %v234_v53 = vld [vmem:[#allocation6 + $0x1e8] sm:$0xff] }
  0x5e   :  { %373 = vmatpush1.bf16.msra.mxu0 %v372_v43  ;;  %v404_v43 = vpack.c.bf16 %v223_v40, %v221_v39  ;;  %v236_v54 = vld [vmem:[#allocation6 + $0x1f8] sm:$0xff]  ;;  %v233_v57 = vld [vmem:[#allocation6 + $0x1e0] sm:$0xff]  ;;  %v235_v58 = vld [vmem:[#allocation6 + $0x1f0] sm:$0xff] }
  0x5f   :  { %375 = vmatprep.subr.bf16.mxu0 %v374_v44  ;;  %v406_v44 = vpack.c.bf16 %v228_v42, %v226_v41  ;;  %v416_v59 = vpack.c.bf16 %v235_v58, %v233_v57  ;;  %v152_v2 = vld [vmem:[#allocation9] sm:$0x3] }
  0x62   :  { %377 = vmatpush1.bf16.msra.mxu0 %v376_v49  ;;  %v408_v49 = vpack.c.bf16 %v227_v46, %v225_v45 }
  0x63   :  { %379 = vmatprep.subr.bf16.mxu0 %v378_v50  ;;  %v410_v50 = vpack.c.bf16 %v232_v48, %v230_v47 }
  0x66   :  { %381 = vmatpush1.bf16.msra.mxu0 %v380_v55  ;;  %v412_v55 = vpack.c.bf16 %v231_v52, %v229_v51 }
  0x67   :  { %383 = vmatprep.subr.bf16.mxu0 %v382_v56  ;;  %v414_v56 = vpack.c.bf16 %v236_v54, %v234_v53 }
  0x6a   :  { %385 = vmatpush1.bf16.msra.mxu0 %v384_v61 }
  0x6b   :  { %387 = vmatprep.subr.bf16.mxu0 %v386_v62 }
  0x6e   :  { %389 = vmatpush1.bf16.msra.mxu0 %v388_v1  ;;  %v132_v1 = vld [vmem:[#allocation8] sm:$0x3] }
  0x6f   :  { %391 = vmatprep.subr.bf16.mxu0 %v390_v21  ;;  %v137_v4 = vrot.slane %v132_v1, %v136_v63  ;;  %v141_v7 = vrot.slane %v132_v1, %v140_v0 }
  0x72   :  { %393 = vmatpush1.bf16.msra.mxu0 %v392_v24 }
  0xe4   :  { %v89_v9 = vpop.xlane.xlu0 %88 }
  0xe5   :  { %v91_v10 = vmul.f32 0.00390625, %v89_v9  ;;  %v157_v9 = vrot.slane %v152_v2, %v136_v63 }
  0xe7   :  { %v99_v11 = vrot.slane %v91_v10, %v643_v8  ;;  %v161_v10 = vrot.slane %v152_v2, %v140_v0 }
  0xe9   :  { %v647_v12 = vsub.f32 %v636_v6, %v99_v11  ;;  %v214_v6 = vld [vmem:[#allocation6 + $0x148] sm:$0xff]  ;;  %v142_v11 = vcombine.low %v137_v4, %v141_v7 }
  0xea   :  { %v394_v26 = vpack.c.bf16 %v216_v25, %v214_v6  ;;  %v172_v25 = vld [vmem:[#allocation2] sm:$0xf] }
  0xeb   :  { %v102_v13 = vmul.f32 %v647_v12, %v647_v12 }
  0xec   :  { %395 = vmatprep.subr.bf16.mxu0 %v394_v26 }
  0xed   :  { %v110_v14 = vrot.slane %v102_v13, %v634_v5  ;;  %397 = vmatpush1.bf16.msra.mxu0 %v396_v29  ;;  %v162_v13 = vcombine.low %v157_v9, %v161_v10 }
  0xee   :  { %399 = vmatprep.subr.bf16.mxu0 %v398_v33 }
  0xef   :  { %v111_v15 = vcombine.high %v110_v14, %v110_v14  ;;  %v114_v16 = vsel %vm84_vm0, %v110_v14, 0.0 }
  0xf1   :  { %v115_v17 = vsel %vm84_vm0, %v111_v15, 0.0  ;;  %401 = vmatpush1.bf16.msra.mxu0 %v400_v37 }
  0xf2   :  { %v116_v18 = vadd.f32 %v115_v17, %v114_v16  ;;  %403 = vmatprep.subr.bf16.mxu0 %v402_v38  ;;  %v149_v16 = vrot.slane %v142_v11, %v634_v5 }
  0xf4   :  { %117 = vadd.xlane.f32.xlu0 %v116_v18  ;;  %v169_v18 = vrot.slane %v162_v13, %v634_v5 }
  0xf5   :  { %405 = vmatpush1.bf16.msra.mxu0 %v404_v43 }
  0xf6   :  { %407 = vmatprep.subr.bf16.mxu0 %v406_v44 }
  0xf9   :  { %409 = vmatpush1.bf16.msra.mxu0 %v408_v49 }
  0xfa   :  { %411 = vmatprep.subr.bf16.mxu0 %v410_v50 }
  0xfd   :  { %413 = vmatpush1.bf16.msra.mxu0 %v412_v55 }
  0xfe   :  { %415 = vmatprep.subr.bf16.mxu0 %v414_v56 }
 0x101   :  { %417 = vmatpush1.bf16.msra.mxu0 %v416_v59 }
 0x181   :  { %v118_v60 = vpop.xlane.xlu0 %117 }
 0x182   :  { %v119_v61 = vmul.f32 0.00390625, %v118_v60 }
 0x184   :  { %v120_v62 = vadd.f32 1e-05, %v119_v61 }
 0x186   :  { %428 = vrsqrt.f32 %v120_v62 }
 0x190   :  { %v429_v14 = vpop.eup %428 }
 0x191   :  { %v129_v15 = vrot.slane %v429_v14, %v643_v8 }
 0x193   :  { %v131_v17 = vmul.f32 %v129_v15, %v647_v12 }
 0x195   :  { %v151_v19 = vmul.f32 %v149_v16, %v131_v17 }
 0x197   :  { %v171_v3 = vadd.f32 %v169_v18, %v151_v19 }
 0x199   :  { %v244_v20 = vrot.slane %v171_v3, %v634_v5 }
 0x19b   :  { %v245_v21 = vcombine.high %v244_v20, %v244_v20 }
 0x19d   :  { %312 = vmatprep.mubr.f32.mxu0 %v245_v21 }
 0x19e   :  { %313 = vmatmul.mubr.f32.vlgmr.msra.gmra.mrb[0].mxu0 %v244_v20 }
 0x271   :  { %v314_v23 = vpop.f32.mrb[0].mxu0 }
 0x272   :  { %v316_v24 = vpop.f32.mrb[1].mxu0 }
 0x273   :  { %v321_v6 = vcombine.low %v314_v23, %v316_v24 }
 0x275   :  { %v328_v8 = vrot.slane %v321_v6, %v634_v5 }
 0x277   :  { %v330_v26 = vadd.f32 %v328_v8, %v172_v25 }
 0x279   :  { %331 = vst [vmem:[#allocation2] sm:$0xf] %v330_v26 }
 0x280   :  { %v335_v12 = vld [vmem:[#allocation2] sm:$0xf] }
 0x281   :  { %336 = vst [vmem:[#allocation11] sm:$0xf] %v335_v12 }
 0x282   :  { %529 = shalt.err (!%p526_p8)
}
 0x283   :  { %s530_s1 = scalar_lea.hbm %s678_s4, 64 }
 0x284   :  { %p531_p9 = scmp.ne.s32.totalorder %s678_s4, %s530_s1  ;;  %p534_p10 = scmp.lt.u32.totalorder %s530_s1, %s678_s4 }
 0x286   :  { %p536_p11 = pnand %p534_p10, %p531_p9 }
 0x288   :  { %539 = shalt.err (!%p536_p11)
}
 0x289   :  { %346 = dma.vmem_to_hbm [thread:$0]  %s344_s10, 64, %s678_s4, [#allocation5]  }
 0x28a   :  { %546 = dma.done.wait [#allocation5], 64  }
 0x28b   :  { %547 = vsyncadd [#allocation5], 4294967232 }
 0x28c   :  { %350 = vsyncpa [#allocation4], 1 }
 0x28d   :  { %351 = vsyncpa [#allocation7], 1 }
 0x28e   :  { %352 = vsyncpa [#allocation10], 1 }
 0x28f   :  { %353 = vsyncpa [#allocation5], 1 }

</bundles_post_ra>
